<compile_context>
chip_gen: v5e
topology: v5e:2x2
jax: 0.10.0
libtpu: 0.0.40
codegen_flags: <defaults>
</compile_context>

<pallas_src>
import functools

import jax
import jax.numpy as jnp
from jax import lax
from jax.experimental import pallas as pl
from jax.experimental.pallas import tpu as pltpu


# ----------------------------------------------------------------------------
# Single fused kernel: LN1 + QKV + dw/BN pooling + regional attention +
#                      local broadcast + 3x3 grouped mix conv + proj +
#                      residual + LN2 + MLP + residual
# ----------------------------------------------------------------------------

def _block_kernel(x_ref, ln1g_ref, ln1b_ref, wqkv_ref, wmap_ref, pool_ref,
                  poolT_ref, bnsc_ref, bnsh_ref, hmask_ref, taps_ref, mixb_ref,
                  wproj_ref, projb_ref, ln2g_ref, ln2b_ref, w1_ref, b1_ref,
                  w2_ref, b2_ref, o_ref, pad_ref, col_ref,
                  *, h, w, num_heads, scale, eps, cdt):
    C = x_ref.shape[-1]
    T = h * w
    Tr = pool_ref.shape[0]

    x = x_ref[0].astype(jnp.float32)                       # (T, C) residual

    # ---- LayerNorm 1 (f32) ----
    mean = jnp.mean(x, axis=-1, keepdims=True)
    xc = x - mean
    var = jnp.mean(xc * xc, axis=-1, keepdims=True)
    xn = xc * lax.rsqrt(var + eps) * ln1g_ref[...] + ln1b_ref[...]

    # ---- fused QKV projection (no bias); bf16 operands, f32 accumulate ----
    qkv = jnp.dot(xn.astype(cdt), wqkv_ref[...],
                  preferred_element_type=jnp.float32)      # (T, 3C)

    # ---- depthwise LxL / stride-L conv + eval-mode BN as a weighted
    #      region-pooling matmul: r = S @ (qkv * wmap) ----
    qkv_w = (qkv * wmap_ref[...]).astype(cdt)              # (T, 3C)
    r = jnp.dot(pool_ref[...], qkv_w,
                preferred_element_type=jnp.float32)        # (Tr, 3C)
    r = r * bnsc_ref[...] + bnsh_ref[...]

    # ---- regional attention: all heads in one contraction via a
    #      block-diagonal head mask on replicated query rows ----
    qa = r[:, :C]                                          # (Tr, C) f32
    ka = r[:, C:2 * C].astype(cdt)                         # (Tr, C)
    va = r[:, 2 * C:].astype(cdt)                          # (Tr, C)
    hmask = hmask_ref[...]                                 # (Hh*Tr, C) 0/1
    q_rep = jnp.concatenate([qa] * num_heads, axis=0) * hmask   # (Hh*Tr, C)
    s = lax.dot_general(q_rep.astype(cdt), ka,
                        (((1,), (1,)), ((), ())),
                        preferred_element_type=jnp.float32) * scale  # (Hh*Tr, Tr)
    s = s - jnp.max(s, axis=-1, keepdims=True)
    p = jnp.exp(s)
    p = p * pl.reciprocal(jnp.sum(p, axis=-1, keepdims=True), approx=True)
    o2 = jnp.dot(p.astype(cdt), va,
                 preferred_element_type=jnp.float32)       # (Hh*Tr, C)
    o2 = o2 * hmask
    regional = o2[0:Tr, :]
    for hh in range(1, num_heads):
        regional = regional + o2[hh * Tr:(hh + 1) * Tr, :]  # (Tr, C) f32

    # ---- broadcast regional onto tokens (S^T matmul) + x_local ----
    reg_tok = jnp.dot(poolT_ref[...], regional.astype(cdt),
                      preferred_element_type=jnp.float32)  # (T, C)
    xloc = xn + reg_tok

    # ---- grouped 3x3 mix conv as one K=9C im2col matmul ----
    # zero only the 1-px border of the padded scratch; interior is rewritten
    pad_ref[pl.ds(0, 1), :, :] = jnp.zeros((1, w + 2, C), cdt)
    pad_ref[pl.ds(h + 1, 1), :, :] = jnp.zeros((1, w + 2, C), cdt)
    pad_ref[pl.ds(1, h), pl.ds(0, 1), :] = jnp.zeros((h, 1, C), cdt)
    pad_ref[pl.ds(1, h), pl.ds(w + 1, 1), :] = jnp.zeros((h, 1, C), cdt)
    pad_ref[pl.ds(1, h), pl.ds(1, w), :] = xloc.reshape(h, w, C).astype(cdt)
    for t in range(9):
        ky, kx = t // 3, t % 3
        win = pad_ref[pl.ds(ky, h), pl.ds(kx, w), :]       # (h, w, C)
        col_ref[:, t * C:(t + 1) * C] = win.reshape(T, C)
    mixed = jnp.dot(col_ref[...], taps_ref[...],
                    preferred_element_type=jnp.float32) + mixb_ref[...]  # (T, C)

    # ---- output projection + residual ----
    attn_out = jnp.dot(mixed.astype(cdt), wproj_ref[...],
                       preferred_element_type=jnp.float32) + projb_ref[...]
    x1 = x + attn_out

    # ---- LayerNorm 2 + MLP (fc1 + exact GELU + fc2) + residual ----
    mean2 = jnp.mean(x1, axis=-1, keepdims=True)
    xc2 = x1 - mean2
    var2 = jnp.mean(xc2 * xc2, axis=-1, keepdims=True)
    x1n = xc2 * lax.rsqrt(var2 + eps) * ln2g_ref[...] + ln2b_ref[...]
    hid = jnp.dot(x1n.astype(cdt), w1_ref[...],
                  preferred_element_type=jnp.float32) + b1_ref[...]
    hid = 0.5 * hid * (1.0 + lax.erf(hid * (2.0 ** -0.5)))   # exact GELU
    y = jnp.dot(hid.astype(cdt), w2_ref[...],
                preferred_element_type=jnp.float32) + b2_ref[...]
    o_ref[0] = (x1 + y).astype(o_ref.dtype)


# ----------------------------------------------------------------------------
# Block forward: host-side constant prep + one fused pallas_call
# ----------------------------------------------------------------------------

def block_forward(params, x, h, w, *, num_heads, locality, conv_inflate,
                  compute_dtype=jnp.bfloat16):
    B, T, C = x.shape
    L = locality
    rh, rw = h // L, w // L
    Tr = rh * rw
    ci = conv_inflate
    G = C // ci
    d = C // num_heads
    Hm = params["W1"].shape[1]
    scale = C ** (-0.5)                # dim_out ** -0.5 (as in the reference)
    cdt = compute_dtype

    # fused QKV weight (no bias)
    w_qkv = jnp.concatenate([params["Wq"], params["Wk"], params["Wv"]],
                            axis=1).astype(cdt)                    # (C, 3C)

    # per-token depthwise weights (q|k|v stacked) and region pooling matrices
    def dw_flat(name):
        return jnp.transpose(params[f"dw{name}_w"][:, 0], (1, 2, 0))  # (L,L,C)

    w_dw = jnp.concatenate([dw_flat(n) for n in ("q", "k", "v")], axis=-1)
    yy, xx = jnp.meshgrid(jnp.arange(h), jnp.arange(w), indexing="ij")
    wmap = w_dw[yy % L, xx % L, :].reshape(T, 3 * C).astype(jnp.float32)
    reg_of_tok = ((yy // L) * rw + (xx // L)).reshape(T)
    onehot = (jnp.arange(Tr)[:, None] == reg_of_tok[None, :]).astype(jnp.float32)
    pool = onehot.astype(cdt)                                       # (Tr, T)
    poolT = onehot.T.astype(cdt)                                    # (T, Tr)

    # eval-mode BN folded into scale/shift (q|k|v)
    def bn_affine(name):
        g_, b_ = params[f"bn{name}_g"], params[f"bn{name}_b"]
        m_, v_ = params[f"bn{name}_m"], params[f"bn{name}_v"]
        sc_ = g_ / jnp.sqrt(v_ + 1e-5)
        return sc_, b_ - m_ * sc_

    scs, shs = zip(*(bn_affine(n) for n in ("q", "k", "v")))
    bn_sc = jnp.concatenate(scs).reshape(1, 3 * C)
    bn_sh = jnp.concatenate(shs).reshape(1, 3 * C)

    # block-diagonal head mask, replicated per region row: (num_heads*Tr, C)
    hmask = (jnp.arange(C)[None, :] // d ==
             jnp.arange(num_heads)[:, None]).astype(jnp.float32)
    hmask_rep = jnp.repeat(hmask, Tr, axis=0)

    # grouped 3x3 mix conv taps, densified block-diagonally to (9C, C)
    # TODO(synk): at production widths keep the grouped conv block-diagonal
    #             (per-group contractions) instead of densifying.
    wmix = params["mix_w"]                          # (C, ci, 3, 3) torch layout
    taps = jnp.zeros((3, 3, C, C), jnp.float32)
    for g in range(G):
        lo = g * ci
        blk = jnp.transpose(wmix[lo:lo + ci], (2, 3, 1, 0))   # (3,3,ci_in,ci_out)
        taps = taps.at[:, :, lo:lo + ci, lo:lo + ci].set(blk)
    taps = taps.reshape(9 * C, C).astype(cdt)

    args = (
        x,
        params["ln1_g"].reshape(1, C).astype(jnp.float32),
        params["ln1_b"].reshape(1, C).astype(jnp.float32),
        w_qkv, wmap, pool, poolT, bn_sc, bn_sh, hmask_rep, taps,
        params["mix_b"].reshape(1, C).astype(jnp.float32),
        params["Wproj"].astype(cdt),
        params["proj_b"].reshape(1, C).astype(jnp.float32),
        params["ln2_g"].reshape(1, C).astype(jnp.float32),
        params["ln2_b"].reshape(1, C).astype(jnp.float32),
        params["W1"].astype(cdt),
        params["b1"].reshape(1, Hm).astype(jnp.float32),
        params["W2"].astype(cdt),
        params["b2"].reshape(1, C).astype(jnp.float32),
    )

    in_specs = [pl.BlockSpec((1, T, C), lambda b: (b, 0, 0))]
    for a in args[1:]:
        in_specs.append(
            pl.BlockSpec(a.shape, lambda b, nd=a.ndim: (0,) * nd))

    kernel = functools.partial(_block_kernel, h=h, w=w, num_heads=num_heads,
                               scale=scale, eps=1e-5, cdt=cdt)

    out = pl.pallas_call(
        kernel,
        out_shape=jax.ShapeDtypeStruct((B, T, C), x.dtype),
        grid=(B,),
        in_specs=in_specs,
        out_specs=pl.BlockSpec((1, T, C), lambda b: (b, 0, 0)),
        scratch_shapes=[pltpu.VMEM((h + 2, w + 2, C), cdt),     # padded image
                        pltpu.VMEM((T, 9 * C), cdt)],           # im2col slab
        compiler_params=pltpu.CompilerParams(
            dimension_semantics=("parallel",),
            vmem_limit_bytes=32 * 1024 * 1024),
    )(*args)
    return out


# ----------------------------------------------------------------------------
# Pure-JAX reference (for validation only)
# ----------------------------------------------------------------------------

def block_reference(params, x, h, w, *, num_heads, locality, conv_inflate):
    B, T, C = x.shape
    L = locality
    rh, rw = h // L, w // L
    Tr = rh * rw
    d = C // num_heads
    scale = C ** (-0.5)

    def ln(t, g, b):
        m = t.mean(-1, keepdims=True)
        v_ = ((t - m) ** 2).mean(-1, keepdims=True)
        return (t - m) / jnp.sqrt(v_ + 1e-5) * g + b

    xn = ln(x, params["ln1_g"], params["ln1_b"])
    q = xn @ params["Wq"]
    k = xn @ params["Wk"]
    v = xn @ params["Wv"]

    def dw(t, name):
        img = t.reshape(B, h, w, C)
        rhs = jnp.transpose(params[f"dw{name}_w"], (2, 3, 1, 0))   # (L,L,1,C)
        y = lax.conv_general_dilated(
            img, rhs, (L, L), "VALID",
            dimension_numbers=("NHWC", "HWIO", "NHWC"), feature_group_count=C)
        g, b = params[f"bn{name}_g"], params[f"bn{name}_b"]
        m, var = params[f"bn{name}_m"], params[f"bn{name}_v"]
        y = (y - m) / jnp.sqrt(var + 1e-5) * g + b
        return y.reshape(B, Tr, C)

    qr, kr, vr = dw(q, "q"), dw(k, "k"), dw(v, "v")

    def heads(t):
        return t.reshape(B, Tr, num_heads, d).transpose(0, 2, 1, 3)

    s = jnp.einsum("bhld,bhtd->bhlt", heads(qr), heads(kr)) * scale
    p = jax.nn.softmax(s, axis=-1)
    reg = jnp.einsum("bhlt,bhtd->bhld", p, heads(vr))
    reg = reg.transpose(0, 2, 1, 3).reshape(B, rh, rw, 1, 1, C)

    xnimg = xn.reshape(B, rh, L, rw, L, C).transpose(0, 1, 3, 2, 4, 5)
    xloc = xnimg + reg
    img = xloc.transpose(0, 1, 3, 2, 4, 5).reshape(B, h, w, C)

    rhs = jnp.transpose(params["mix_w"], (2, 3, 1, 0))             # (3,3,ci,C)
    y = lax.conv_general_dilated(
        img, rhs, (1, 1), ((1, 1), (1, 1)),
        dimension_numbers=("NHWC", "HWIO", "NHWC"),
        feature_group_count=C // conv_inflate) + params["mix_b"]
    y = y.reshape(B, T, C)

    attn_out = y @ params["Wproj"] + params["proj_b"]
    x1 = x + attn_out
    x1n = ln(x1, params["ln2_g"], params["ln2_b"])
    hdn = jax.nn.gelu(x1n @ params["W1"] + params["b1"], approximate=False)
    return x1 + (hdn @ params["W2"] + params["b2"])


# ----------------------------------------------------------------------------
# Deterministic parameter init
# ----------------------------------------------------------------------------

def init_params(key, C, num_heads, L, conv_inflate, hidden):
    keys = iter(jax.random.split(key, 40))

    def nrm(shape, s=0.05):
        return s * jax.random.normal(next(keys), shape, jnp.float32)

    p = {}
    p["ln1_g"] = 1.0 + nrm((C,))
    p["ln1_b"] = nrm((C,))
    p["Wq"], p["Wk"], p["Wv"] = nrm((C, C)), nrm((C, C)), nrm((C, C))
    for nm in ("q", "k", "v"):
        p[f"dw{nm}_w"] = nrm((C, 1, L, L))
        p[f"bn{nm}_g"] = 1.0 + nrm((C,))
        p[f"bn{nm}_b"] = nrm((C,))
        p[f"bn{nm}_m"] = nrm((C,))
        p[f"bn{nm}_v"] = 1.0 + 0.1 * jnp.abs(
            jax.random.normal(next(keys), (C,), jnp.float32))
    p["mix_w"] = nrm((C, conv_inflate, 3, 3))
    p["mix_b"] = nrm((C,))
    p["Wproj"] = nrm((C, C))
    p["proj_b"] = nrm((C,))
    p["ln2_g"] = 1.0 + nrm((C,))
    p["ln2_b"] = nrm((C,))
    p["W1"] = nrm((C, hidden))
    p["b1"] = nrm((hidden,))
    p["W2"] = nrm((hidden, C))
    p["b2"] = nrm((C,))
    return p


if __name__ == "__main__":
    B, C, H, W = 2, 32, 8, 8          # dim_in = dim_out = 32, T = 64
    num_heads, locality, conv_inflate = 2, 4, 4
    mlp_hidden = int(C * 4.0)

    key = jax.random.PRNGKey(0)
    kx, kp = jax.random.split(key)
    x = jax.random.normal(kx, (B, H * W, C), jnp.float32)
    params = init_params(kp, C, num_heads, locality, conv_inflate, mlp_hidden)

    ref = block_reference(params, x, H, W, num_heads=num_heads,
                          locality=locality, conv_inflate=conv_inflate)

    # bf16 MXU operands (f32 accumulation) -- the production fast path
    out_bf16 = block_forward(params, x, H, W, num_heads=num_heads,
                             locality=locality, conv_inflate=conv_inflate,
                             compute_dtype=jnp.bfloat16)
    out_bf16 = jax.block_until_ready(out_bf16)
    err_bf16 = float(jnp.max(jnp.abs(out_bf16 - ref)))

    # f32 operands -- exact-math check of the fused-kernel semantics
    out_f32 = block_forward(params, x, H, W, num_heads=num_heads,
                            locality=locality, conv_inflate=conv_inflate,
                            compute_dtype=jnp.float32)
    out_f32 = jax.block_until_ready(out_f32)
    err_f32 = float(jnp.max(jnp.abs(out_f32 - ref)))

    ok = (out_bf16.shape == (B, H * W, C)
          and bool(jnp.all(jnp.isfinite(out_bf16)))
          and bool(jnp.all(jnp.isfinite(out_f32)))
          and err_f32 < 5e-3 and err_bf16 < 5e-2)
    if ok:
        print("KERNEL_OK")
    else:
        print(f"MISMATCH err_f32={err_f32} err_bf16={err_bf16}")
</pallas_src>

<mosaic_0001>
module attributes {stable_mosaic.version = 11 : i64} {
  func.func @_block_kernel(%arg0: i32, %arg1: memref<1x64x32xf32, #tpu.memory_space<vmem>>, %arg2: memref<1x32xf32, #tpu.memory_space<vmem>>, %arg3: memref<1x32xf32, #tpu.memory_space<vmem>>, %arg4: memref<32x96xbf16, #tpu.memory_space<vmem>>, %arg5: memref<64x96xf32, #tpu.memory_space<vmem>>, %arg6: memref<4x64xbf16, #tpu.memory_space<vmem>>, %arg7: memref<64x4xbf16, #tpu.memory_space<vmem>>, %arg8: memref<1x96xf32, #tpu.memory_space<vmem>>, %arg9: memref<1x96xf32, #tpu.memory_space<vmem>>, %arg10: memref<8x32xf32, #tpu.memory_space<vmem>>, %arg11: memref<288x32xbf16, #tpu.memory_space<vmem>>, %arg12: memref<1x32xf32, #tpu.memory_space<vmem>>, %arg13: memref<32x32xbf16, #tpu.memory_space<vmem>>, %arg14: memref<1x32xf32, #tpu.memory_space<vmem>>, %arg15: memref<1x32xf32, #tpu.memory_space<vmem>>, %arg16: memref<1x32xf32, #tpu.memory_space<vmem>>, %arg17: memref<32x128xbf16, #tpu.memory_space<vmem>>, %arg18: memref<1x128xf32, #tpu.memory_space<vmem>>, %arg19: memref<128x32xbf16, #tpu.memory_space<vmem>>, %arg20: memref<1x32xf32, #tpu.memory_space<vmem>>, %arg21: memref<1x64x32xf32, #tpu.memory_space<vmem>>, %arg22: memref<10x10x32xbf16, #tpu.memory_space<vmem>>, %arg23: memref<64x288xbf16, #tpu.memory_space<vmem>>) attributes {dimension_semantics = [#tpu.dimension_semantics<parallel>], iteration_bounds = array<i64: 2>, scalar_prefetch = 0 : i64, scratch_operands = 2 : i64, tpu.core_type = #tpu.core_type<tc>, window_params = [{transform_indices = @transform_0, window_bounds = array<i64: 1, 64, 32>}, {pipeline_mode = #tpu.pipeline_mode<synchronous>, transform_indices = @transform_1, window_bounds = array<i64: 1, 32>}, {pipeline_mode = #tpu.pipeline_mode<synchronous>, transform_indices = @transform_2, window_bounds = array<i64: 1, 32>}, {pipeline_mode = #tpu.pipeline_mode<synchronous>, transform_indices = @transform_3, window_bounds = array<i64: 32, 96>}, {pipeline_mode = #tpu.pipeline_mode<synchronous>, transform_indices = @transform_4, window_bounds = array<i64: 64, 96>}, {pipeline_mode = #tpu.pipeline_mode<synchronous>, transform_indices = @transform_5, window_bounds = array<i64: 4, 64>}, {pipeline_mode = #tpu.pipeline_mode<synchronous>, transform_indices = @transform_6, window_bounds = array<i64: 64, 4>}, {pipeline_mode = #tpu.pipeline_mode<synchronous>, transform_indices = @transform_7, window_bounds = array<i64: 1, 96>}, {pipeline_mode = #tpu.pipeline_mode<synchronous>, transform_indices = @transform_8, window_bounds = array<i64: 1, 96>}, {pipeline_mode = #tpu.pipeline_mode<synchronous>, transform_indices = @transform_9, window_bounds = array<i64: 8, 32>}, {pipeline_mode = #tpu.pipeline_mode<synchronous>, transform_indices = @transform_10, window_bounds = array<i64: 288, 32>}, {pipeline_mode = #tpu.pipeline_mode<synchronous>, transform_indices = @transform_11, window_bounds = array<i64: 1, 32>}, {pipeline_mode = #tpu.pipeline_mode<synchronous>, transform_indices = @transform_12, window_bounds = array<i64: 32, 32>}, {pipeline_mode = #tpu.pipeline_mode<synchronous>, transform_indices = @transform_13, window_bounds = array<i64: 1, 32>}, {pipeline_mode = #tpu.pipeline_mode<synchronous>, transform_indices = @transform_14, window_bounds = array<i64: 1, 32>}, {pipeline_mode = #tpu.pipeline_mode<synchronous>, transform_indices = @transform_15, window_bounds = array<i64: 1, 32>}, {pipeline_mode = #tpu.pipeline_mode<synchronous>, transform_indices = @transform_16, window_bounds = array<i64: 32, 128>}, {pipeline_mode = #tpu.pipeline_mode<synchronous>, transform_indices = @transform_17, window_bounds = array<i64: 1, 128>}, {pipeline_mode = #tpu.pipeline_mode<synchronous>, transform_indices = @transform_18, window_bounds = array<i64: 128, 32>}, {pipeline_mode = #tpu.pipeline_mode<synchronous>, transform_indices = @transform_19, window_bounds = array<i64: 1, 32>}, {transform_indices = @transform_20, window_bounds = array<i64: 1, 64, 32>}]} {
    %c0 = arith.constant 0 : index
    %c0_0 = arith.constant 0 : index
    %c0_1 = arith.constant 0 : index
    %0 = vector.load %arg1[%c0, %c0_0, %c0_1] : memref<1x64x32xf32, #tpu.memory_space<vmem>>, vector<1x64x32xf32>
    %1 = vector.shape_cast %0 : vector<1x64x32xf32> to vector<64x32xf32>
    %cst = arith.constant dense<0.000000e+00> : vector<64xf32>
    %2 = vector.multi_reduction <add>, %1, %cst [1] : vector<64x32xf32> to vector<64xf32>
    %3 = vector.shape_cast %2 : vector<64xf32> to vector<64x1xf32>
    %cst_2 = arith.constant 3.200000e+01 : f32
    %4 = vector.broadcast %cst_2 : f32 to vector<64x1xf32>
    %5 = arith.divf %3, %4 : vector<64x1xf32>
    %6 = vector.broadcast %5 : vector<64x1xf32> to vector<64x32xf32>
    %7 = arith.subf %1, %6 : vector<64x32xf32>
    %8 = arith.mulf %7, %7 : vector<64x32xf32>
    %cst_3 = arith.constant dense<0.000000e+00> : vector<64xf32>
    %9 = vector.multi_reduction <add>, %8, %cst_3 [1] : vector<64x32xf32> to vector<64xf32>
    %10 = vector.shape_cast %9 : vector<64xf32> to vector<64x1xf32>
    %cst_4 = arith.constant 3.200000e+01 : f32
    %11 = vector.broadcast %cst_4 : f32 to vector<64x1xf32>
    %12 = arith.divf %10, %11 : vector<64x1xf32>
    %cst_5 = arith.constant 9.99999974E-6 : f32
    %13 = vector.broadcast %cst_5 : f32 to vector<64x1xf32>
    %14 = arith.addf %12, %13 : vector<64x1xf32>
    %15 = math.rsqrt %14 : vector<64x1xf32>
    %16 = vector.broadcast %15 : vector<64x1xf32> to vector<64x32xf32>
    %17 = arith.mulf %7, %16 : vector<64x32xf32>
    %c0_6 = arith.constant 0 : index
    %c0_7 = arith.constant 0 : index
    %18 = vector.load %arg2[%c0_6, %c0_7] : memref<1x32xf32, #tpu.memory_space<vmem>>, vector<1x32xf32>
    %19 = vector.broadcast %18 : vector<1x32xf32> to vector<64x32xf32>
    %20 = arith.mulf %17, %19 : vector<64x32xf32>
    %c0_8 = arith.constant 0 : index
    %c0_9 = arith.constant 0 : index
    %21 = vector.load %arg3[%c0_8, %c0_9] : memref<1x32xf32, #tpu.memory_space<vmem>>, vector<1x32xf32>
    %22 = vector.broadcast %21 : vector<1x32xf32> to vector<64x32xf32>
    %23 = arith.addf %20, %22 : vector<64x32xf32>
    %24 = arith.truncf %23 : vector<64x32xf32> to vector<64x32xbf16>
    %c0_10 = arith.constant 0 : index
    %c0_11 = arith.constant 0 : index
    %25 = vector.load %arg4[%c0_10, %c0_11] : memref<32x96xbf16, #tpu.memory_space<vmem>>, vector<32x96xbf16>
    %cst_12 = arith.constant dense<0.000000e+00> : vector<64x96xf32>
    %26 = tpu.matmul %24, %25, %cst_12 {dimension_numbers = #tpu.dot_dimension_numbers<[1], [0], [0], [1], [0, 0, 1, 1], [], []>} : vector<64x32xbf16>, vector<32x96xbf16>, vector<64x96xf32> -> vector<64x96xf32>
    %c0_13 = arith.constant 0 : index
    %c0_14 = arith.constant 0 : index
    %27 = vector.load %arg5[%c0_13, %c0_14] : memref<64x96xf32, #tpu.memory_space<vmem>>, vector<64x96xf32>
    %28 = arith.mulf %26, %27 : vector<64x96xf32>
    %29 = arith.truncf %28 : vector<64x96xf32> to vector<64x96xbf16>
    %c0_15 = arith.constant 0 : index
    %c0_16 = arith.constant 0 : index
    %30 = vector.load %arg6[%c0_15, %c0_16] : memref<4x64xbf16, #tpu.memory_space<vmem>>, vector<4x64xbf16>
    %cst_17 = arith.constant dense<0.000000e+00> : vector<4x96xf32>
    %31 = tpu.matmul %30, %29, %cst_17 {dimension_numbers = #tpu.dot_dimension_numbers<[1], [0], [0], [1], [0, 0, 1, 1], [], []>} : vector<4x64xbf16>, vector<64x96xbf16>, vector<4x96xf32> -> vector<4x96xf32>
    %c0_18 = arith.constant 0 : index
    %c0_19 = arith.constant 0 : index
    %32 = vector.load %arg8[%c0_18, %c0_19] : memref<1x96xf32, #tpu.memory_space<vmem>>, vector<1x96xf32>
    %33 = vector.broadcast %32 : vector<1x96xf32> to vector<4x96xf32>
    %34 = arith.mulf %31, %33 : vector<4x96xf32>
    %c0_20 = arith.constant 0 : index
    %c0_21 = arith.constant 0 : index
    %35 = vector.load %arg9[%c0_20, %c0_21] : memref<1x96xf32, #tpu.memory_space<vmem>>, vector<1x96xf32>
    %36 = vector.broadcast %35 : vector<1x96xf32> to vector<4x96xf32>
    %37 = arith.addf %34, %36 : vector<4x96xf32>
    %38 = vector.extract_strided_slice %37 {offsets = [0, 0], sizes = [4, 32], strides = [1, 1]} : vector<4x96xf32> to vector<4x32xf32>
    %39 = vector.extract_strided_slice %37 {offsets = [0, 32], sizes = [4, 32], strides = [1, 1]} : vector<4x96xf32> to vector<4x32xf32>
    %40 = arith.truncf %39 : vector<4x32xf32> to vector<4x32xbf16>
    %41 = vector.extract_strided_slice %37 {offsets = [0, 64], sizes = [4, 32], strides = [1, 1]} : vector<4x96xf32> to vector<4x32xf32>
    %42 = arith.truncf %41 : vector<4x32xf32> to vector<4x32xbf16>
    %c0_22 = arith.constant 0 : index
    %c0_23 = arith.constant 0 : index
    %43 = vector.load %arg10[%c0_22, %c0_23] : memref<8x32xf32, #tpu.memory_space<vmem>>, vector<8x32xf32>
    %44 = tpu.concatenate %38, %38 in 0 : vector<4x32xf32>, vector<4x32xf32> -> vector<8x32xf32>
    %45 = arith.mulf %44, %43 : vector<8x32xf32>
    %46 = arith.truncf %45 : vector<8x32xf32> to vector<8x32xbf16>
    %cst_24 = arith.constant dense<0.000000e+00> : vector<8x4xf32>
    %47 = tpu.matmul %46, %40, %cst_24 {dimension_numbers = #tpu.dot_dimension_numbers<[1], [1], [0], [0], [0, 0, 1, 0], [], []>} : vector<8x32xbf16>, vector<4x32xbf16>, vector<8x4xf32> -> vector<8x4xf32>
    %cst_25 = arith.constant 0.176776692 : f32
    %48 = vector.broadcast %cst_25 : f32 to vector<8x4xf32>
    %49 = arith.mulf %47, %48 : vector<8x4xf32>
    %cst_26 = arith.constant dense<0xFF800000> : vector<8xf32>
    %50 = vector.multi_reduction <maximumf>, %49, %cst_26 [1] : vector<8x4xf32> to vector<8xf32>
    %51 = vector.shape_cast %50 : vector<8xf32> to vector<8x1xf32>
    %52 = vector.broadcast %51 : vector<8x1xf32> to vector<8x4xf32>
    %53 = arith.subf %49, %52 : vector<8x4xf32>
    %54 = math.exp %53 : vector<8x4xf32>
    %cst_27 = arith.constant dense<0.000000e+00> : vector<8xf32>
    %55 = vector.multi_reduction <add>, %54, %cst_27 [1] : vector<8x4xf32> to vector<8xf32>
    %56 = vector.shape_cast %55 : vector<8xf32> to vector<8x1xf32>
    %57 = tpu.reciprocal %56 {approx = true} : vector<8x1xf32> -> vector<8x1xf32>
    %58 = vector.broadcast %57 : vector<8x1xf32> to vector<8x4xf32>
    %59 = arith.mulf %54, %58 : vector<8x4xf32>
    %60 = arith.truncf %59 : vector<8x4xf32> to vector<8x4xbf16>
    %cst_28 = arith.constant dense<0.000000e+00> : vector<8x32xf32>
    %61 = tpu.matmul %60, %42, %cst_28 {dimension_numbers = #tpu.dot_dimension_numbers<[1], [0], [0], [1], [0, 0, 1, 1], [], []>} : vector<8x4xbf16>, vector<4x32xbf16>, vector<8x32xf32> -> vector<8x32xf32>
    %62 = arith.mulf %61, %43 : vector<8x32xf32>
    %63 = vector.extract_strided_slice %62 {offsets = [0, 0], sizes = [4, 32], strides = [1, 1]} : vector<8x32xf32> to vector<4x32xf32>
    %64 = vector.extract_strided_slice %62 {offsets = [4, 0], sizes = [4, 32], strides = [1, 1]} : vector<8x32xf32> to vector<4x32xf32>
    %65 = arith.addf %63, %64 : vector<4x32xf32>
    %c0_29 = arith.constant 0 : index
    %c0_30 = arith.constant 0 : index
    %66 = vector.load %arg7[%c0_29, %c0_30] : memref<64x4xbf16, #tpu.memory_space<vmem>>, vector<64x4xbf16>
    %67 = arith.truncf %65 : vector<4x32xf32> to vector<4x32xbf16>
    %cst_31 = arith.constant dense<0.000000e+00> : vector<64x32xf32>
    %68 = tpu.matmul %66, %67, %cst_31 {dimension_numbers = #tpu.dot_dimension_numbers<[1], [0], [0], [1], [0, 0, 1, 1], [], []>} : vector<64x4xbf16>, vector<4x32xbf16>, vector<64x32xf32> -> vector<64x32xf32>
    %69 = arith.addf %23, %68 : vector<64x32xf32>
    %cst_32 = arith.constant 0.000000e+00 : bf16
    %70 = vector.broadcast %cst_32 : bf16 to vector<1x10x32xbf16>
    %c0_33 = arith.constant 0 : index
    %c0_34 = arith.constant 0 : index
    %c0_35 = arith.constant 0 : index
    %71 = vector.load %arg22[%c0_33, %c0_34, %c0_35] : memref<10x10x32xbf16, #tpu.memory_space<vmem>>, vector<1x10x32xbf16>
    tpu.vector_store %arg22[%c0_33, %c0_34, %c0_35], %70 {strides = array<i32>} : memref<10x10x32xbf16, #tpu.memory_space<vmem>>, vector<1x10x32xbf16>,
    %cst_36 = arith.constant 0.000000e+00 : bf16
    %72 = vector.broadcast %cst_36 : bf16 to vector<1x10x32xbf16>
    %c9 = arith.constant 9 : index
    %c0_37 = arith.constant 0 : index
    %c0_38 = arith.constant 0 : index
    %73 = vector.load %arg22[%c9, %c0_37, %c0_38] : memref<10x10x32xbf16, #tpu.memory_space<vmem>>, vector<1x10x32xbf16>
    tpu.vector_store %arg22[%c9, %c0_37, %c0_38], %72 {strides = array<i32>} : memref<10x10x32xbf16, #tpu.memory_space<vmem>>, vector<1x10x32xbf16>,
    %cst_39 = arith.constant 0.000000e+00 : bf16
    %74 = vector.broadcast %cst_39 : bf16 to vector<8x1x32xbf16>
    %c1 = arith.constant 1 : index
    %c0_40 = arith.constant 0 : index
    %c0_41 = arith.constant 0 : index
    %75 = vector.load %arg22[%c1, %c0_40, %c0_41] : memref<10x10x32xbf16, #tpu.memory_space<vmem>>, vector<8x1x32xbf16>
    tpu.vector_store %arg22[%c1, %c0_40, %c0_41], %74 {strides = array<i32>} : memref<10x10x32xbf16, #tpu.memory_space<vmem>>, vector<8x1x32xbf16>,
    %cst_42 = arith.constant 0.000000e+00 : bf16
    %76 = vector.broadcast %cst_42 : bf16 to vector<8x1x32xbf16>
    %c1_43 = arith.constant 1 : index
    %c9_44 = arith.constant 9 : index
    %c0_45 = arith.constant 0 : index
    %77 = vector.load %arg22[%c1_43, %c9_44, %c0_45] : memref<10x10x32xbf16, #tpu.memory_space<vmem>>, vector<8x1x32xbf16>
    tpu.vector_store %arg22[%c1_43, %c9_44, %c0_45], %76 {strides = array<i32>} : memref<10x10x32xbf16, #tpu.memory_space<vmem>>, vector<8x1x32xbf16>,
    %78 = vector.shape_cast %69 : vector<64x32xf32> to vector<8x8x32xf32>
    %79 = arith.truncf %78 : vector<8x8x32xf32> to vector<8x8x32xbf16>
    %c1_46 = arith.constant 1 : index
    %c1_47 = arith.constant 1 : index
    %c0_48 = arith.constant 0 : index
    %80 = vector.load %arg22[%c1_46, %c1_47, %c0_48] : memref<10x10x32xbf16, #tpu.memory_space<vmem>>, vector<8x8x32xbf16>
    tpu.vector_store %arg22[%c1_46, %c1_47, %c0_48], %79 {strides = array<i32>} : memref<10x10x32xbf16, #tpu.memory_space<vmem>>, vector<8x8x32xbf16>,
    %c0_49 = arith.constant 0 : index
    %c0_50 = arith.constant 0 : index
    %c0_51 = arith.constant 0 : index
    %81 = vector.load %arg22[%c0_49, %c0_50, %c0_51] : memref<10x10x32xbf16, #tpu.memory_space<vmem>>, vector<8x8x32xbf16>
    %82 = vector.shape_cast %81 : vector<8x8x32xbf16> to vector<64x32xbf16>
    %c0_52 = arith.constant 0 : index
    %c0_53 = arith.constant 0 : index
    %83 = vector.load %arg23[%c0_52, %c0_53] : memref<64x288xbf16, #tpu.memory_space<vmem>>, vector<64x32xbf16>
    tpu.vector_store %arg23[%c0_52, %c0_53], %82 {strides = array<i32>} : memref<64x288xbf16, #tpu.memory_space<vmem>>, vector<64x32xbf16>,
    %c0_54 = arith.constant 0 : index
    %c1_55 = arith.constant 1 : index
    %c0_56 = arith.constant 0 : index
    %84 = vector.load %arg22[%c0_54, %c1_55, %c0_56] : memref<10x10x32xbf16, #tpu.memory_space<vmem>>, vector<8x8x32xbf16>
    %85 = vector.shape_cast %84 : vector<8x8x32xbf16> to vector<64x32xbf16>
    %c0_57 = arith.constant 0 : index
    %c32 = arith.constant 32 : index
    %86 = vector.load %arg23[%c0_57, %c32] : memref<64x288xbf16, #tpu.memory_space<vmem>>, vector<64x32xbf16>
    tpu.vector_store %arg23[%c0_57, %c32], %85 {strides = array<i32>} : memref<64x288xbf16, #tpu.memory_space<vmem>>, vector<64x32xbf16>,
    %c0_58 = arith.constant 0 : index
    %c2 = arith.constant 2 : index
    %c0_59 = arith.constant 0 : index
    %87 = vector.load %arg22[%c0_58, %c2, %c0_59] : memref<10x10x32xbf16, #tpu.memory_space<vmem>>, vector<8x8x32xbf16>
    %88 = vector.shape_cast %87 : vector<8x8x32xbf16> to vector<64x32xbf16>
    %c0_60 = arith.constant 0 : index
    %c64 = arith.constant 64 : index
    %89 = vector.load %arg23[%c0_60, %c64] : memref<64x288xbf16, #tpu.memory_space<vmem>>, vector<64x32xbf16>
    tpu.vector_store %arg23[%c0_60, %c64], %88 {strides = array<i32>} : memref<64x288xbf16, #tpu.memory_space<vmem>>, vector<64x32xbf16>,
    %c1_61 = arith.constant 1 : index
    %c0_62 = arith.constant 0 : index
    %c0_63 = arith.constant 0 : index
    %90 = vector.load %arg22[%c1_61, %c0_62, %c0_63] : memref<10x10x32xbf16, #tpu.memory_space<vmem>>, vector<8x8x32xbf16>
    %91 = vector.shape_cast %90 : vector<8x8x32xbf16> to vector<64x32xbf16>
    %c0_64 = arith.constant 0 : index
    %c96 = arith.constant 96 : index
    %92 = vector.load %arg23[%c0_64, %c96] : memref<64x288xbf16, #tpu.memory_space<vmem>>, vector<64x32xbf16>
    tpu.vector_store %arg23[%c0_64, %c96], %91 {strides = array<i32>} : memref<64x288xbf16, #tpu.memory_space<vmem>>, vector<64x32xbf16>,
    %c1_65 = arith.constant 1 : index
    %c1_66 = arith.constant 1 : index
    %c0_67 = arith.constant 0 : index
    %93 = vector.load %arg22[%c1_65, %c1_66, %c0_67] : memref<10x10x32xbf16, #tpu.memory_space<vmem>>, vector<8x8x32xbf16>
    %94 = vector.shape_cast %93 : vector<8x8x32xbf16> to vector<64x32xbf16>
    %c0_68 = arith.constant 0 : index
    %c128 = arith.constant 128 : index
    %95 = vector.load %arg23[%c0_68, %c128] : memref<64x288xbf16, #tpu.memory_space<vmem>>, vector<64x32xbf16>
    tpu.vector_store %arg23[%c0_68, %c128], %94 {strides = array<i32>} : memref<64x288xbf16, #tpu.memory_space<vmem>>, vector<64x32xbf16>,
    %c1_69 = arith.constant 1 : index
    %c2_70 = arith.constant 2 : index
    %c0_71 = arith.constant 0 : index
    %96 = vector.load %arg22[%c1_69, %c2_70, %c0_71] : memref<10x10x32xbf16, #tpu.memory_space<vmem>>, vector<8x8x32xbf16>
    %97 = vector.shape_cast %96 : vector<8x8x32xbf16> to vector<64x32xbf16>
    %c0_72 = arith.constant 0 : index
    %c160 = arith.constant 160 : index
    %98 = vector.load %arg23[%c0_72, %c160] : memref<64x288xbf16, #tpu.memory_space<vmem>>, vector<64x32xbf16>
    tpu.vector_store %arg23[%c0_72, %c160], %97 {strides = array<i32>} : memref<64x288xbf16, #tpu.memory_space<vmem>>, vector<64x32xbf16>,
    %c2_73 = arith.constant 2 : index
    %c0_74 = arith.constant 0 : index
    %c0_75 = arith.constant 0 : index
    %99 = vector.load %arg22[%c2_73, %c0_74, %c0_75] : memref<10x10x32xbf16, #tpu.memory_space<vmem>>, vector<8x8x32xbf16>
    %100 = vector.shape_cast %99 : vector<8x8x32xbf16> to vector<64x32xbf16>
    %c0_76 = arith.constant 0 : index
    %c192 = arith.constant 192 : index
    %101 = vector.load %arg23[%c0_76, %c192] : memref<64x288xbf16, #tpu.memory_space<vmem>>, vector<64x32xbf16>
    tpu.vector_store %arg23[%c0_76, %c192], %100 {strides = array<i32>} : memref<64x288xbf16, #tpu.memory_space<vmem>>, vector<64x32xbf16>,
    %c2_77 = arith.constant 2 : index
    %c1_78 = arith.constant 1 : index
    %c0_79 = arith.constant 0 : index
    %102 = vector.load %arg22[%c2_77, %c1_78, %c0_79] : memref<10x10x32xbf16, #tpu.memory_space<vmem>>, vector<8x8x32xbf16>
    %103 = vector.shape_cast %102 : vector<8x8x32xbf16> to vector<64x32xbf16>
    %c0_80 = arith.constant 0 : index
    %c224 = arith.constant 224 : index
    %104 = vector.load %arg23[%c0_80, %c224] : memref<64x288xbf16, #tpu.memory_space<vmem>>, vector<64x32xbf16>
    tpu.vector_store %arg23[%c0_80, %c224], %103 {strides = array<i32>} : memref<64x288xbf16, #tpu.memory_space<vmem>>, vector<64x32xbf16>,
    %c2_81 = arith.constant 2 : index
    %c2_82 = arith.constant 2 : index
    %c0_83 = arith.constant 0 : index
    %105 = vector.load %arg22[%c2_81, %c2_82, %c0_83] : memref<10x10x32xbf16, #tpu.memory_space<vmem>>, vector<8x8x32xbf16>
    %106 = vector.shape_cast %105 : vector<8x8x32xbf16> to vector<64x32xbf16>
    %c0_84 = arith.constant 0 : index
    %c256 = arith.constant 256 : index
    %107 = vector.load %arg23[%c0_84, %c256] : memref<64x288xbf16, #tpu.memory_space<vmem>>, vector<64x32xbf16>
    tpu.vector_store %arg23[%c0_84, %c256], %106 {strides = array<i32>} : memref<64x288xbf16, #tpu.memory_space<vmem>>, vector<64x32xbf16>,
    %c0_85 = arith.constant 0 : index
    %c0_86 = arith.constant 0 : index
    %108 = vector.load %arg23[%c0_85, %c0_86] : memref<64x288xbf16, #tpu.memory_space<vmem>>, vector<64x288xbf16>
    %c0_87 = arith.constant 0 : index
    %c0_88 = arith.constant 0 : index
    %109 = vector.load %arg11[%c0_87, %c0_88] : memref<288x32xbf16, #tpu.memory_space<vmem>>, vector<288x32xbf16>
    %cst_89 = arith.constant dense<0.000000e+00> : vector<64x32xf32>
    %110 = tpu.matmul %108, %109, %cst_89 {dimension_numbers = #tpu.dot_dimension_numbers<[1], [0], [0], [1], [0, 0, 1, 1], [], []>} : vector<64x288xbf16>, vector<288x32xbf16>, vector<64x32xf32> -> vector<64x32xf32>
    %c0_90 = arith.constant 0 : index
    %c0_91 = arith.constant 0 : index
    %111 = vector.load %arg12[%c0_90, %c0_91] : memref<1x32xf32, #tpu.memory_space<vmem>>, vector<1x32xf32>
    %112 = vector.broadcast %111 : vector<1x32xf32> to vector<64x32xf32>
    %113 = arith.addf %110, %112 : vector<64x32xf32>
    %114 = arith.truncf %113 : vector<64x32xf32> to vector<64x32xbf16>
    %c0_92 = arith.constant 0 : index
    %c0_93 = arith.constant 0 : index
    %115 = vector.load %arg13[%c0_92, %c0_93] : memref<32x32xbf16, #tpu.memory_space<vmem>>, vector<32x32xbf16>
    %cst_94 = arith.constant dense<0.000000e+00> : vector<64x32xf32>
    %116 = tpu.matmul %114, %115, %cst_94 {dimension_numbers = #tpu.dot_dimension_numbers<[1], [0], [0], [1], [0, 0, 1, 1], [], []>} : vector<64x32xbf16>, vector<32x32xbf16>, vector<64x32xf32> -> vector<64x32xf32>
    %c0_95 = arith.constant 0 : index
    %c0_96 = arith.constant 0 : index
    %117 = vector.load %arg14[%c0_95, %c0_96] : memref<1x32xf32, #tpu.memory_space<vmem>>, vector<1x32xf32>
    %118 = vector.broadcast %117 : vector<1x32xf32> to vector<64x32xf32>
    %119 = arith.addf %116, %118 : vector<64x32xf32>
    %120 = arith.addf %1, %119 : vector<64x32xf32>
    %cst_97 = arith.constant dense<0.000000e+00> : vector<64xf32>
    %121 = vector.multi_reduction <add>, %120, %cst_97 [1] : vector<64x32xf32> to vector<64xf32>
    %122 = vector.shape_cast %121 : vector<64xf32> to vector<64x1xf32>
    %cst_98 = arith.constant 3.200000e+01 : f32
    %123 = vector.broadcast %cst_98 : f32 to vector<64x1xf32>
    %124 = arith.divf %122, %123 : vector<64x1xf32>
    %125 = vector.broadcast %124 : vector<64x1xf32> to vector<64x32xf32>
    %126 = arith.subf %120, %125 : vector<64x32xf32>
    %127 = arith.mulf %126, %126 : vector<64x32xf32>
    %cst_99 = arith.constant dense<0.000000e+00> : vector<64xf32>
    %128 = vector.multi_reduction <add>, %127, %cst_99 [1] : vector<64x32xf32> to vector<64xf32>
    %129 = vector.shape_cast %128 : vector<64xf32> to vector<64x1xf32>
    %cst_100 = arith.constant 3.200000e+01 : f32
    %130 = vector.broadcast %cst_100 : f32 to vector<64x1xf32>
    %131 = arith.divf %129, %130 : vector<64x1xf32>
    %cst_101 = arith.constant 9.99999974E-6 : f32
    %132 = vector.broadcast %cst_101 : f32 to vector<64x1xf32>
    %133 = arith.addf %131, %132 : vector<64x1xf32>
    %134 = math.rsqrt %133 : vector<64x1xf32>
    %135 = vector.broadcast %134 : vector<64x1xf32> to vector<64x32xf32>
    %136 = arith.mulf %126, %135 : vector<64x32xf32>
    %c0_102 = arith.constant 0 : index
    %c0_103 = arith.constant 0 : index
    %137 = vector.load %arg15[%c0_102, %c0_103] : memref<1x32xf32, #tpu.memory_space<vmem>>, vector<1x32xf32>
    %138 = vector.broadcast %137 : vector<1x32xf32> to vector<64x32xf32>
    %139 = arith.mulf %136, %138 : vector<64x32xf32>
    %c0_104 = arith.constant 0 : index
    %c0_105 = arith.constant 0 : index
    %140 = vector.load %arg16[%c0_104, %c0_105] : memref<1x32xf32, #tpu.memory_space<vmem>>, vector<1x32xf32>
    %141 = vector.broadcast %140 : vector<1x32xf32> to vector<64x32xf32>
    %142 = arith.addf %139, %141 : vector<64x32xf32>
    %143 = arith.truncf %142 : vector<64x32xf32> to vector<64x32xbf16>
    %c0_106 = arith.constant 0 : index
    %c0_107 = arith.constant 0 : index
    %144 = vector.load %arg17[%c0_106, %c0_107] : memref<32x128xbf16, #tpu.memory_space<vmem>>, vector<32x128xbf16>
    %cst_108 = arith.constant dense<0.000000e+00> : vector<64x128xf32>
    %145 = tpu.matmul %143, %144, %cst_108 {dimension_numbers = #tpu.dot_dimension_numbers<[1], [0], [0], [1], [0, 0, 1, 1], [], []>} : vector<64x32xbf16>, vector<32x128xbf16>, vector<64x128xf32> -> vector<64x128xf32>
    %c0_109 = arith.constant 0 : index
    %c0_110 = arith.constant 0 : index
    %146 = vector.load %arg18[%c0_109, %c0_110] : memref<1x128xf32, #tpu.memory_space<vmem>>, vector<1x128xf32>
    %147 = vector.broadcast %146 : vector<1x128xf32> to vector<64x128xf32>
    %148 = arith.addf %145, %147 : vector<64x128xf32>
    %cst_111 = arith.constant 5.000000e-01 : f32
    %149 = vector.broadcast %cst_111 : f32 to vector<64x128xf32>
    %150 = arith.mulf %149, %148 : vector<64x128xf32>
    %cst_112 = arith.constant 0.707106769 : f32
    %151 = vector.broadcast %cst_112 : f32 to vector<64x128xf32>
    %152 = arith.mulf %148, %151 : vector<64x128xf32>
    %153 = math.erf %152 : vector<64x128xf32>
    %cst_113 = arith.constant 1.000000e+00 : f32
    %154 = vector.broadcast %cst_113 : f32 to vector<64x128xf32>
    %155 = arith.addf %154, %153 : vector<64x128xf32>
    %156 = arith.mulf %150, %155 : vector<64x128xf32>
    %157 = arith.truncf %156 : vector<64x128xf32> to vector<64x128xbf16>
    %c0_114 = arith.constant 0 : index
    %c0_115 = arith.constant 0 : index
    %158 = vector.load %arg19[%c0_114, %c0_115] : memref<128x32xbf16, #tpu.memory_space<vmem>>, vector<128x32xbf16>
    %cst_116 = arith.constant dense<0.000000e+00> : vector<64x32xf32>
    %159 = tpu.matmul %157, %158, %cst_116 {dimension_numbers = #tpu.dot_dimension_numbers<[1], [0], [0], [1], [0, 0, 1, 1], [], []>} : vector<64x128xbf16>, vector<128x32xbf16>, vector<64x32xf32> -> vector<64x32xf32>
    %c0_117 = arith.constant 0 : index
    %c0_118 = arith.constant 0 : index
    %160 = vector.load %arg20[%c0_117, %c0_118] : memref<1x32xf32, #tpu.memory_space<vmem>>, vector<1x32xf32>
    %161 = vector.broadcast %160 : vector<1x32xf32> to vector<64x32xf32>
    %162 = arith.addf %159, %161 : vector<64x32xf32>
    %163 = arith.addf %120, %162 : vector<64x32xf32>
    %c0_119 = arith.constant 0 : index
    %c0_120 = arith.constant 0 : index
    %c0_121 = arith.constant 0 : index
    %164 = vector.load %arg21[%c0_119, %c0_120, %c0_121] : memref<1x64x32xf32, #tpu.memory_space<vmem>>, vector<1x64x32xf32>
    %165 = vector.shape_cast %164 : vector<1x64x32xf32> to vector<64x32xf32>
    %166 = vector.shape_cast %163 : vector<64x32xf32> to vector<1x64x32xf32>
    tpu.vector_store %arg21[%c0_119, %c0_120, %c0_121], %166 {strides = array<i32>} : memref<1x64x32xf32, #tpu.memory_space<vmem>>, vector<1x64x32xf32>,
    return
  }
  func.func @transform_0(%arg0: i32) -> (i32, i32, i32) {
    %c0_i32 = arith.constant 0 : i32
    %c0_i32_0 = arith.constant 0 : i32
    %c0_i32_1 = arith.constant 0 : i32
    return %arg0, %c0_i32, %c0_i32_0 : i32, i32, i32
  }
  func.func @transform_1(%arg0: i32) -> (i32, i32) {
    %c0_i32 = arith.constant 0 : i32
    %c0_i32_0 = arith.constant 0 : i32
    %c0_i32_1 = arith.constant 0 : i32
    return %c0_i32, %c0_i32_0 : i32, i32
  }
  func.func @transform_2(%arg0: i32) -> (i32, i32) {
    %c0_i32 = arith.constant 0 : i32
    %c0_i32_0 = arith.constant 0 : i32
    %c0_i32_1 = arith.constant 0 : i32
    return %c0_i32, %c0_i32_0 : i32, i32
  }
  func.func @transform_3(%arg0: i32) -> (i32, i32) {
    %c0_i32 = arith.constant 0 : i32
    %c0_i32_0 = arith.constant 0 : i32
    %c0_i32_1 = arith.constant 0 : i32
    return %c0_i32, %c0_i32_0 : i32, i32
  }
  func.func @transform_4(%arg0: i32) -> (i32, i32) {
    %c0_i32 = arith.constant 0 : i32
    %c0_i32_0 = arith.constant 0 : i32
    %c0_i32_1 = arith.constant 0 : i32
    return %c0_i32, %c0_i32_0 : i32, i32
  }
  func.func @transform_5(%arg0: i32) -> (i32, i32) {
    %c0_i32 = arith.constant 0 : i32
    %c0_i32_0 = arith.constant 0 : i32
    %c0_i32_1 = arith.constant 0 : i32
    return %c0_i32, %c0_i32_0 : i32, i32
  }
  func.func @transform_6(%arg0: i32) -> (i32, i32) {
    %c0_i32 = arith.constant 0 : i32
    %c0_i32_0 = arith.constant 0 : i32
    %c0_i32_1 = arith.constant 0 : i32
    return %c0_i32, %c0_i32_0 : i32, i32
  }
  func.func @transform_7(%arg0: i32) -> (i32, i32) {
    %c0_i32 = arith.constant 0 : i32
    %c0_i32_0 = arith.constant 0 : i32
    %c0_i32_1 = arith.constant 0 : i32
    return %c0_i32, %c0_i32_0 : i32, i32
  }
  func.func @transform_8(%arg0: i32) -> (i32, i32) {
    %c0_i32 = arith.constant 0 : i32
    %c0_i32_0 = arith.constant 0 : i32
    %c0_i32_1 = arith.constant 0 : i32
    return %c0_i32, %c0_i32_0 : i32, i32
  }
  func.func @transform_9(%arg0: i32) -> (i32, i32) {
    %c0_i32 = arith.constant 0 : i32
    %c0_i32_0 = arith.constant 0 : i32
    %c0_i32_1 = arith.constant 0 : i32
    return %c0_i32, %c0_i32_0 : i32, i32
  }
  func.func @transform_10(%arg0: i32) -> (i32, i32) {
    %c0_i32 = arith.constant 0 : i32
    %c0_i32_0 = arith.constant 0 : i32
    %c0_i32_1 = arith.constant 0 : i32
    return %c0_i32, %c0_i32_0 : i32, i32
  }
  func.func @transform_11(%arg0: i32) -> (i32, i32) {
    %c0_i32 = arith.constant 0 : i32
    %c0_i32_0 = arith.constant 0 : i32
    %c0_i32_1 = arith.constant 0 : i32
    return %c0_i32, %c0_i32_0 : i32, i32
  }
  func.func @transform_12(%arg0: i32) -> (i32, i32) {
    %c0_i32 = arith.constant 0 : i32
    %c0_i32_0 = arith.constant 0 : i32
    %c0_i32_1 = arith.constant 0 : i32
    return %c0_i32, %c0_i32_0 : i32, i32
  }
  func.func @transform_13(%arg0: i32) -> (i32, i32) {
    %c0_i32 = arith.constant 0 : i32
    %c0_i32_0 = arith.constant 0 : i32
    %c0_i32_1 = arith.constant 0 : i32
    return %c0_i32, %c0_i32_0 : i32, i32
  }
  func.func @transform_14(%arg0: i32) -> (i32, i32) {
    %c0_i32 = arith.constant 0 : i32
    %c0_i32_0 = arith.constant 0 : i32
    %c0_i32_1 = arith.constant 0 : i32
    return %c0_i32, %c0_i32_0 : i32, i32
  }
  func.func @transform_15(%arg0: i32) -> (i32, i32) {
    %c0_i32 = arith.constant 0 : i32
    %c0_i32_0 = arith.constant 0 : i32
    %c0_i32_1 = arith.constant 0 : i32
    return %c0_i32, %c0_i32_0 : i32, i32
  }
  func.func @transform_16(%arg0: i32) -> (i32, i32) {
    %c0_i32 = arith.constant 0 : i32
    %c0_i32_0 = arith.constant 0 : i32
    %c0_i32_1 = arith.constant 0 : i32
    return %c0_i32, %c0_i32_0 : i32, i32
  }
  func.func @transform_17(%arg0: i32) -> (i32, i32) {
    %c0_i32 = arith.constant 0 : i32
    %c0_i32_0 = arith.constant 0 : i32
    %c0_i32_1 = arith.constant 0 : i32
    return %c0_i32, %c0_i32_0 : i32, i32
  }
  func.func @transform_18(%arg0: i32) -> (i32, i32) {
    %c0_i32 = arith.constant 0 : i32
    %c0_i32_0 = arith.constant 0 : i32
    %c0_i32_1 = arith.constant 0 : i32
    return %c0_i32, %c0_i32_0 : i32, i32
  }
  func.func @transform_19(%arg0: i32) -> (i32, i32) {
    %c0_i32 = arith.constant 0 : i32
    %c0_i32_0 = arith.constant 0 : i32
    %c0_i32_1 = arith.constant 0 : i32
    return %c0_i32, %c0_i32_0 : i32, i32
  }
  func.func @transform_20(%arg0: i32) -> (i32, i32, i32) {
    %c0_i32 = arith.constant 0 : i32
    %c0_i32_0 = arith.constant 0 : i32
    %c0_i32_1 = arith.constant 0 : i32
    return %arg0, %c0_i32, %c0_i32_0 : i32, i32, i32
  }
}

</mosaic_0001>

<bundles_post_ra>
// kernel: tpu_custom_call.1
= control target key start
LH: loop header
LB: loop body
LE: loop exit
PB: predicated region body
PF: predicated region fallthrough
CT: control target
= control target key end

     0   :  { %s4898_s0 = inlined_call_operand.vmem [shape: f32[2,64,32], index: 0, kind: input, shape index: {}]   ;;  %s4899_s1 = inlined_call_operand.vmem [shape: f32[1,32], index: 1, kind: input, shape index: {}]   ;;  %s4900_s2 = inlined_call_operand.vmem [shape: f32[1,32], index: 2, kind: input, shape index: {}]   ;;  %s4901_s3 = inlined_call_operand.vmem [shape: bf16[32,96], index: 3, kind: input, shape index: {}]   ;;  %s4902_s4 = inlined_call_operand.vmem [shape: f32[64,96], index: 4, kind: input, shape index: {}]   ;;  %s4903_s5 = inlined_call_operand.vmem [shape: bf16[4,64], index: 5, kind: input, shape index: {}]   ;;  %s4904_s6 = inlined_call_operand.vmem [shape: bf16[64,4], index: 6, kind: input, shape index: {}]   ;;  %s4905_s7 = inlined_call_operand.vmem [shape: f32[1,96], index: 7, kind: input, shape index: {}]   ;;  %s4906_s8 = inlined_call_operand.vmem [shape: f32[1,96], index: 8, kind: input, shape index: {}]   ;;  %s4907_s9 = inlined_call_operand.vmem [shape: f32[8,32], index: 9, kind: input, shape index: {}]   ;;  %s4908_s10 = inlined_call_operand.vmem [shape: bf16[288,32], index: 10, kind: input, shape index: {}]   ;;  %s4909_s11 = inlined_call_operand.vmem [shape: f32[1,32], index: 11, kind: input, shape index: {}]   ;;  %s4910_s12 = inlined_call_operand.vmem [shape: bf16[32,32], index: 12, kind: input, shape index: {}]   ;;  %s4911_s13 = inlined_call_operand.vmem [shape: f32[1,32], index: 13, kind: input, shape index: {}]   ;;  %s4912_s14 = inlined_call_operand.vmem [shape: f32[1,32], index: 14, kind: input, shape index: {}]   ;;  %s4913_s15 = inlined_call_operand.vmem [shape: f32[1,32], index: 15, kind: input, shape index: {}]   ;;  %s4914_s16 = inlined_call_operand.vmem [shape: bf16[32,128], index: 16, kind: input, shape index: {}]   ;;  %s4915_s17 = inlined_call_operand.vmem [shape: f32[1,128], index: 17, kind: input, shape index: {}]   ;;  %s4916_s18 = inlined_call_operand.vmem [shape: bf16[128,32], index: 18, kind: input, shape index: {}]   ;;  %s4917_s19 = inlined_call_operand.vmem [shape: f32[1,32], index: 19, kind: input, shape index: {}]   ;;  %s4918_s20 = inlined_call_operand.vmem [shape: f32[2,64,32], index: 20, kind: output, shape index: {}]  }
   0x1   :  { %4922 = sst [smem:[#allocation4_spill]] %s4898_s0 }
   0x2   :  { %4923 = sst [smem:[#allocation5_spill]] %s4899_s1  ;;  %s3862_s1 = smov 0  }
   0x3   :  { %4924 = sst [smem:[#allocation6_spill]] %s4900_s2 }
   0x4   :  { %4925 = sst [smem:[#allocation7_spill]] %s4901_s3 }
   0x5   :  { %4926 = sst [smem:[#allocation8_spill]] %s4902_s4 }
   0x6 LB: > { %s3351_s22 = sadd.s32 4294967295, %s3750_s1   ;;  %p3355_p0 = scmp.ge.s32.totalorder %s3750_s1, 1  ;;  %s3750_s1 = sphi %s3862_s1, %s30_s1  }
   0x7   : > { %p562_p1 = scmp.lt.s32.totalorder %s3750_s1, 3 }
   0x9   : > { %p563_p2 = pnand %p3355_p0, %p562_p1 }
   0xa   : > { %p620_p3 = scmp.lt.s32.totalorder (!%p563_p2), %s3351_s22, 1  ;;  %s4927_s25 = sld [smem:[#allocation4_spill]] (!%p563_p2) }
   0xb   : > { %566 = sbr.rel (%p563_p2) target bundleno = 2681 (0xa79), region = 100  ;;  %s4928_s28 = sld [smem:[#allocation7_spill]] (!%p563_p2) }
   0xc   : > { %s4929_s21 = sld [smem:[#allocation5_spill]] (!%p563_p2)  ;;  %s3753_s0 = smov (!%p563_p2), 96  }
   0xd   : > { %s4931_s4 = sld [smem:[#allocation8_spill]] (!%p563_p2)  ;;  %s3754_s2 = smov (!%p563_p2), 64  }
  0x10   : > { %s4944_s22 = smov (!%p620_p3, %s3351_s22), 1  ;;  %vm639_vm0 = vcmask 261120   ;;  %v3752_v14 = vmov 32.0  }
  0x11   : > { %s4921_s23 = sshll.u32 %s4944_s22, 6  ;;  %3682 = vrcp.f32 %v3752_v14  ;;  %v3612_v58 = vld [vmem:[%s4928_s28 + $0x8] sm:$0xff]  ;;  %v3611_v62 = vld [vmem:[%s4928_s28] sm:$0xff]  ;;  %s4942_s26 = sshll.u32 %s4944_s22, 6 }
  0x12   : > { %s3878_s3 = scalar_lea.vmem %s4927_s25, %s4921_s23  ;;  %885 = vmatpush.bf16.msra.mxu0 %v3612_v58  ;;  %s4930_s25 = sld [smem:[#allocation6_spill]] }
  0x13   : > { %v635_v0 = vld [vmem:[%s3878_s3 + $0x20] sm:$0xff]  ;;  %v633_v1 = vld [vmem:[%s3878_s3 + $0x10] sm:$0xff]  ;;  %v636_v6 = vld [vmem:[%s3878_s3 + $0x28] sm:$0xff]  ;;  %s3756_s23 = smov 32   ;;  %s629_s30 = scalar_lea.vmem %s4918_s20, %s4942_s26 }
  0x14   : > { %v631_v2 = vld [vmem:[%s3878_s3] sm:$0xff]  ;;  %v652_v3 = vsel %vm639_vm0, %v635_v0, 0.0  ;;  %v646_v4 = vsel %vm639_vm0, %v633_v1, 0.0  ;;  %v634_v7 = vld [vmem:[%s3878_s3 + $0x18] sm:$0xff]  ;;  %v632_v8 = vld [vmem:[%s3878_s3 + $0x8] sm:$0xff]  ;;  %v655_v9 = vsel %vm639_vm0, %v636_v6, 0.0 }
  0x15   : > { %v640_v5 = vsel %vm639_vm0, %v631_v2, 0.0  ;;  %653 = vadd.xlane.f32.xlu2 %v652_v3  ;;  %647 = vadd.xlane.f32.xlu1 %v646_v4  ;;  %v649_v10 = vsel %vm639_vm0, %v634_v7, 0.0  ;;  %v643_v11 = vsel %vm639_vm0, %v632_v8, 0.0  ;;  %v637_v12 = vld [vmem:[%s3878_s3 + $0x30] sm:$0xff]  ;;  %v638_v36 = vld [vmem:[%s3878_s3 + $0x38] sm:$0xff] }
  0x16   : > { %641 = vadd.xlane.f32.xlu0 %v640_v5  ;;  %v658_v13 = vsel %vm639_vm0, %v637_v12, 0.0  ;;  %v661_v41 = vsel %vm639_vm0, %v638_v36, 0.0  ;;  %886 = vmatpush.bf16.msra.mxu0 %v3611_v62 }
  0x17   : > { %v3683_v15 = vpop.eup %3682 }
  0x18   : > { %v665_v16 = vmul.f32 32.0, %v3683_v15  ;;  %vm669_vm1 = vweird.f32 %v3683_v15 }
  0x1a   : > { %v666_v17 = vsub.f32 1.0, %v665_v16 }
  0x1c   : > { %v667_v18 = vmul.f32 %v3683_v15, %v666_v17 }
  0x1d   : > { %656 = vadd.xlane.f32.xlu2 %v655_v9  ;;  %650 = vadd.xlane.f32.xlu1 %v649_v10 }
  0x1e   : > { %644 = vadd.xlane.f32.xlu0 %v643_v11  ;;  %v668_v19 = vadd.f32 %v3683_v15, %v667_v18 }
  0x20   : > { %v3894_v20 = vsel %vm669_vm1, %v3683_v15, %v668_v19 }
  0x25   : > { %659 = vadd.xlane.f32.xlu2 %v658_v13 }
  0x88   : > { %v654_v21 = vpop.xlane.xlu2 %653  ;;  %v648_v22 = vpop.xlane.xlu1 %647 }
  0x89   : > { %v642_v23 = vpop.xlane.xlu0 %641  ;;  %v675_v32 = vmul.f32 %v3894_v20, %v654_v21  ;;  %v673_v33 = vmul.f32 %v3894_v20, %v648_v22 }
  0x8a   : > { %v671_v24 = vmul.f32 %v3894_v20, %v642_v23 }
  0x8b   : > { %v3913_v39 = vsub.f32 %v635_v0, %v675_v32  ;;  %v3915_v40 = vsub.f32 %v633_v1, %v673_v33 }
  0x8c   : > { %v3897_v25 = vsub.f32 %v631_v2, %v671_v24 }
  0x8d   : > { %v691_v48 = vmul.f32 %v3913_v39, %v3913_v39  ;;  %v689_v49 = vmul.f32 %v3915_v40, %v3915_v40 }
  0x8e   : > { %v687_v26 = vmul.f32 %v3897_v25, %v3897_v25 }
  0x8f   : > { %v707_v53 = vsel %vm639_vm0, %v691_v48, 0.0  ;;  %v701_v54 = vsel %vm639_vm0, %v689_v49, 0.0 }
  0x90   : > { %v657_v27 = vpop.xlane.xlu2 %656  ;;  %v651_v28 = vpop.xlane.xlu1 %650  ;;  %v695_v29 = vsel %vm639_vm0, %v687_v26, 0.0 }
  0x91   : > { %v674_v30 = vmul.f32 %v3894_v20, %v651_v28  ;;  %696 = vadd.xlane.f32.xlu0 %v695_v29  ;;  %v645_v31 = vpop.xlane.xlu0 %644  ;;  %v676_v47 = vmul.f32 %v3894_v20, %v657_v27 }
  0x92   : > { %v672_v34 = vmul.f32 %v3894_v20, %v645_v31 }
  0x93   : > { %v3906_v35 = vsub.f32 %v634_v7, %v674_v30  ;;  %v3932_v52 = vsub.f32 %v636_v6, %v676_v47 }
  0x94   : > { %v3909_v37 = vsub.f32 %v632_v8, %v672_v34 }
  0x95   : > { %v690_v38 = vmul.f32 %v3906_v35, %v3906_v35  ;;  %v692_v56 = vmul.f32 %v3932_v52, %v3932_v52 }
  0x96   : > { %v688_v42 = vmul.f32 %v3909_v37, %v3909_v37 }
  0x97   : > { %v704_v43 = vsel %vm639_vm0, %v690_v38, 0.0  ;;  %v710_v57 = vsel %vm639_vm0, %v692_v56, 0.0 }
  0x98   : > { %v660_v44 = vpop.xlane.xlu2 %659  ;;  %705 = vadd.xlane.f32.xlu2 %v704_v43  ;;  %v698_v45 = vsel %vm639_vm0, %v688_v42, 0.0 }
  0x99   : > { %v677_v46 = vmul.f32 %v3894_v20, %v660_v44  ;;  %662 = vadd.xlane.f32.xlu0 %v661_v41  ;;  %699 = vadd.xlane.f32.xlu1 %v698_v45  ;;  %v3970_v44 = vld [vmem:[%s4929_s21] ss:$0 sm:$0xff] }
  0x9b   : > { %v3928_v50 = vsub.f32 %v637_v12, %v677_v46 }
  0x9d   : > { %v693_v51 = vmul.f32 %v3928_v50, %v3928_v50 }
  0x9f   : > { %v713_v55 = vsel %vm639_vm0, %v693_v51, 0.0 }
  0xa0   : > { %714 = vadd.xlane.f32.xlu2 %v713_v55 }
  0xa1   : > { %708 = vadd.xlane.f32.xlu0 %v707_v53  ;;  %702 = vadd.xlane.f32.xlu1 %v701_v54 }
  0xa9   : > { %711 = vadd.xlane.f32.xlu1 %v710_v57 }
 0x104   : > { %v697_v59 = vpop.xlane.xlu0 %696 }
 0x105   : > { %v719_v60 = vmul.f32 %v697_v59, %v3894_v20 }
 0x107   : > { %v727_v61 = vadd.f32 1e-05, %v719_v60 }
 0x109   : > { %3684 = vrsqrt.f32 %v727_v61  ;;  %vm741_vm3 = vweird.f32 %v727_v61 }
 0x10b   : > { %v706_v63 = vpop.xlane.xlu2 %705 }
 0x10c   : > { %v722_v0 = vmul.f32 %v706_v63, %v3894_v20  ;;  %v700_v1 = vpop.xlane.xlu1 %699  ;;  %v663_v2 = vpop.xlane.xlu0 %662 }
 0x10d   : > { %v720_v3 = vmul.f32 %v700_v1, %v3894_v20  ;;  %v678_v4 = vmul.f32 %v3894_v20, %v663_v2 }
 0x10e   : > { %v3950_v5 = vadd.f32 1e-05, %v722_v0 }
 0x10f   : > { %v3685_v6 = vpop.eup %3684  ;;  %v728_v7 = vadd.f32 1e-05, %v720_v3  ;;  %v3952_v8 = vsub.f32 %v638_v36, %v678_v4 }
 0x110   : > { %v736_v9 = vmul.f32 %v3685_v6, %v727_v61  ;;  %3686 = vrsqrt.f32 %v3950_v5  ;;  %vm742_vm2 = vweird.f32 %v3685_v6  ;;  %vm771_vm10 = vweird.f32 %v3950_v5 }
 0x111   : > { %3688 = vrsqrt.f32 %v728_v7  ;;  %v694_v10 = vmul.f32 %v3952_v8, %v3952_v8  ;;  %vm743_vm4 = vmor %vm741_vm3, %vm742_vm2  ;;  %vm751_vm5 = vweird.f32 %v728_v7 }
 0x112   : > { %v737_v11 = vmul.f32 %v3685_v6, %v736_v9 }
 0x113   : > { %v716_v12 = vsel %vm639_vm0, %v694_v10, 0.0 }
 0x114   : > { %v738_v13 = vmul.f32 0.5, %v737_v11  ;;  %v703_v14 = vpop.xlane.xlu1 %702  ;;  %717 = vadd.xlane.f32.xlu0 %v716_v12  ;;  %v709_v16 = vpop.xlane.xlu0 %708 }
 0x115   : > { %v721_v15 = vmul.f32 %v703_v14, %v3894_v20  ;;  %v723_v23 = vmul.f32 %v709_v16, %v3894_v20 }
 0x116   : > { %v3959_v17 = vpop.eup %3686  ;;  %v739_v18 = vsub.f32 1.5, %v738_v13 }
 0x117   : > { %v3689_v19 = vpop.eup %3688  ;;  %v729_v21 = vadd.f32 1e-05, %v721_v15  ;;  %v766_v26 = vmul.f32 %v3959_v17, %v3950_v5  ;;  %v731_v29 = vadd.f32 1e-05, %v723_v23  ;;  %vm772_vm11 = vweird.f32 %v3959_v17 }
 0x118   : > { %v746_v22 = vmul.f32 %v3689_v19, %v728_v7  ;;  %v740_v24 = vmul.f32 %v3685_v6, %v739_v18  ;;  %vm752_vm6 = vweird.f32 %v3689_v19  ;;  %vm773_vm13 = vmor %vm771_vm10, %vm772_vm11  ;;  %vm929_vm11 = vcmask 523264  }
 0x119   : > { %3690 = vrsqrt.f32 %v729_v21  ;;  %v767_v32 = vmul.f32 %v3959_v17, %v766_v26  ;;  %vm753_vm7 = vmor %vm751_vm5, %vm752_vm6  ;;  %vm761_vm8 = vweird.f32 %v729_v21  ;;  %vm781_vm1 = vweird.f32 %v731_v29 }
 0x11a   : > { %v747_v27 = vmul.f32 %v3689_v19, %v746_v22  ;;  %v744_v31 = vsel %vm743_vm4, %v3685_v6, %v740_v24  ;;  %3692 = vrsqrt.f32 %v731_v29 }
 0x11b   : > { %v815_v41 = vmul.f32 %v744_v31, %v3897_v25  ;;  %v768_v45 = vmul.f32 0.5, %v767_v32  ;;  %v3977_v25 = vld [vmem:[%s4930_s25] ss:$0 sm:$0xff] }
 0x11c   : > { %v748_v28 = vmul.f32 0.5, %v747_v27  ;;  %v712_v30 = vpop.xlane.xlu1 %711  ;;  %v715_v27 = vpop.xlane.xlu2 %714 }
 0x11d   : > { %v724_v33 = vmul.f32 %v712_v30, %v3894_v20  ;;  %v827_v51 = vmul.f32 %v3970_v44, %v815_v41  ;;  %v769_v53 = vsub.f32 1.5, %v768_v45 }
 0x11e   : > { %v749_v34 = vsub.f32 1.5, %v748_v28 }
 0x11f   : > { %v3691_v36 = vpop.eup %3690  ;;  %v732_v38 = vadd.f32 1e-05, %v724_v33  ;;  %v3986_v59 = vadd.f32 %v3977_v25, %v827_v51  ;;  %v770_v60 = vmul.f32 %v3959_v17, %v769_v53 }
 0x120   : > { %v750_v42 = vmul.f32 %v3689_v19, %v749_v34  ;;  %v756_v43 = vmul.f32 %v3691_v36, %v729_v21  ;;  %vm762_vm9 = vweird.f32 %v3691_v36  ;;  %v3693_v55 = vpop.eup %3692 }
 0x121   : > { %3694 = vrsqrt.f32 %v732_v38  ;;  %vm763_vm12 = vmor %vm761_vm8, %vm762_vm9  ;;  %v776_v61 = vmul.f32 %v3693_v55, %v731_v29  ;;  %v774_v2 = vsel %vm773_vm13, %v3959_v17, %v770_v60  ;;  %vm791_vm14 = vweird.f32 %v732_v38 }
 0x122   : > { %v754_v46 = vsel %vm753_vm7, %v3689_v19, %v750_v42  ;;  %v757_v47 = vmul.f32 %v3691_v36, %v756_v43  ;;  %v818_v6 = vmul.f32 %v774_v2, %v3906_v35  ;;  %vm782_vm2 = vweird.f32 %v3693_v55 }
 0x123   : > { %v816_v48 = vmul.f32 %v754_v46, %v3909_v37  ;;  %v777_v3 = vmul.f32 %v3693_v55, %v776_v61  ;;  %vm783_vm4 = vmor %vm781_vm1, %vm782_vm2  ;;  %vm988_vm13 = vcmask 31744   ;;  %vm1111_vm1 = vcmask 253952  }
 0x124   : > { %v758_v49 = vmul.f32 0.5, %v757_v47  ;;  %v830_v11 = vmul.f32 %v3970_v44, %v818_v6  ;;  %vm1340_vm2 = vsmask.f32 3328 }
 0x125   : > { %v828_v54 = vmul.f32 %v3970_v44, %v816_v48  ;;  %v778_v7 = vmul.f32 0.5, %v777_v3 }
 0x126   : > { %v759_v56 = vsub.f32 1.5, %v758_v49 }
 0x127   : > { %v3983_v37 = vadd.f32 %v3977_v25, %v828_v54  ;;  %v3695_v57 = vpop.eup %3694  ;;  %v779_v12 = vsub.f32 1.5, %v778_v7 }
 0x128   : > { %v760_v58 = vmul.f32 %v3691_v36, %v759_v56  ;;  %v786_v62 = vmul.f32 %v3695_v57, %v732_v38  ;;  %vm792_vm15 = vweird.f32 %v3695_v57 }
 0x129   : > { %v847_v63 = vpack.c.bf16 %v3983_v37, %v3986_v59  ;;  %vm793_vm3 = vmor %vm791_vm14, %vm792_vm15  ;;  %v780_v35 = vmul.f32 %v3693_v55, %v779_v12  ;;  %vm1006_vm14 = vcmask 1041408   ;;  %vm1109_vm15 = vcmask 257024  }
 0x12a   : > { %v764_v0 = vsel %vm763_vm12, %v3691_v36, %v760_v58  ;;  %v787_v1 = vmul.f32 %v3695_v57, %v786_v62  ;;  %vm961_vm12 = vcmask 1043456  }
 0x12b   : > { %3368 = vmatmul.msk.bf16.vlgmr.msra.gmra.mxu0 %vm639_vm0, %v847_v63  ;;  %v817_v4 = vmul.f32 %v764_v0, %v3915_v40  ;;  %v4001_v40 = vadd.f32 %v3977_v25, %v830_v11  ;;  %v784_v17 = vsel %vm783_vm4, %v3693_v55, %v780_v35  ;;  %v910_v11 = vld [vmem:[%s4931_s4 + $0x10] sm:$0xff]  ;;  %v909_v35 = vld [vmem:[%s4931_s4 + $0x8] sm:$0xff] }
 0x12c   : > { %v788_v5 = vmul.f32 0.5, %v787_v1  ;;  %v819_v19 = vmul.f32 %v784_v17, %v3913_v39  ;;  %v913_v1 = vld [vmem:[%s4931_s4 + $0x28] sm:$0xff] }
 0x12d   : > { %v829_v9 = vmul.f32 %v3970_v44, %v817_v4 }
 0x12e   : > { %v789_v10 = vsub.f32 1.5, %v788_v5  ;;  %v831_v22 = vmul.f32 %v3970_v44, %v819_v19  ;;  %v912_v5 = vld [vmem:[%s4931_s4 + $0x20] sm:$0xff] }
 0x12f   : > { %v3998_v13 = vadd.f32 %v3977_v25, %v829_v9  ;;  %v911_v9 = vld [vmem:[%s4931_s4 + $0x18] sm:$0xff] }
 0x130   : > { %v790_v14 = vmul.f32 %v3695_v57, %v789_v10  ;;  %v4014_v24 = vadd.f32 %v3977_v25, %v831_v22  ;;  %v928_v22 = vld [vmem:[%s4903_s5] sm:$0x3] }
 0x131   : > { %v848_v15 = vpack.c.bf16 %v4001_v40, %v3998_v13 }
 0x132   : > { %v794_v16 = vsel %vm793_vm3, %v3695_v57, %v790_v14  ;;  %vm1341_vm3 = vsmask.f32 7440 }
 0x133   : > { %v820_v18 = vmul.f32 %v794_v16, %v3932_v52  ;;  %v725_v52 = vmul.f32 %v715_v27, %v3894_v20  ;;  %v908_v16 = vld [vmem:[%s4931_s4] sm:$0xff]  ;;  %vm4099_vm4 = vmor %vm1340_vm2, %vm1341_vm3 }
 0x134   : > { %v3675_v27 = vld [vmem:[%s4906_s8] ss:$0 sm:$0xff] }
 0x135   : > { %v832_v21 = vmul.f32 %v3970_v44, %v820_v18  ;;  %v733_v28 = vadd.f32 1e-05, %v725_v52 }
 0x137   : > { %v4011_v23 = vadd.f32 %v3977_v25, %v832_v21  ;;  %3696 = vrsqrt.f32 %v733_v28  ;;  %vm801_vm5 = vweird.f32 %v733_v28 }
 0x139   : > { %v849_v26 = vpack.c.bf16 %v4011_v23, %v4014_v24 }
 0x13b   : > { %3369 = vmatmul.msk.bf16.gmra.mxu0 %vm639_vm0, %v848_v15 }
 0x13d   : > { %v3697_v39 = vpop.eup %3696 }
 0x13e   : > { %v796_v29 = vmul.f32 %v3697_v39, %v733_v28  ;;  %vm802_vm6 = vweird.f32 %v3697_v39 }
 0x13f   : > { %vm803_vm7 = vmor %vm801_vm5, %vm802_vm6  ;;  %vm1118_vm5 = vsmask.f32 256  ;;  %vm1144_vm6 = vsmask.f32 7938 }
 0x140   : > { %v797_v30 = vmul.f32 %v3697_v39, %v796_v29 }
 0x142   : > { %v798_v34 = vmul.f32 0.5, %v797_v30 }
 0x144   : > { %v799_v36 = vsub.f32 1.5, %v798_v34 }
 0x146   : > { %v800_v41 = vmul.f32 %v3697_v39, %v799_v36 }
 0x148   : > { %v804_v45 = vsel %vm803_vm7, %v3697_v39, %v800_v41  ;;  %vm4106_vm7 = vmand %vm1111_vm1, %vm1118_vm5 }
 0x149   : > { %v821_v48 = vmul.f32 %v804_v45, %v3928_v50 }
 0x14b   : > { %3370 = vmatmul.msk.bf16.gmra.mxu0 %vm639_vm0, %v849_v26  ;;  %v833_v54 = vmul.f32 %v3970_v44, %v821_v48  ;;  %v3674_v26 = vld [vmem:[%s4905_s7] ss:$0 sm:$0xff] }
 0x14d   : > { %v4026_v56 = vadd.f32 %v3977_v25, %v833_v54 }
 0x187   : > { %v718_v31 = vpop.xlane.xlu0 %717 }
 0x188   : > { %v726_v32 = vmul.f32 %v718_v31, %v3894_v20 }
 0x18a   : > { %v734_v33 = vadd.f32 1e-05, %v726_v32 }
 0x18c   : > { %3698 = vrsqrt.f32 %v734_v33  ;;  %vm811_vm9 = vweird.f32 %v734_v33 }
 0x192   : > { %v3699_v38 = vpop.eup %3698 }
 0x193   : > { %v806_v42 = vmul.f32 %v3699_v38, %v734_v33  ;;  %vm812_vm8 = vweird.f32 %v3699_v38  ;;  %v957_v33 = vld [vmem:[%s4907_s9] sm:$0xff] }
 0x194   : > { %vm813_vm10 = vmor %vm811_vm9, %vm812_vm8  ;;  %vm1520_vm9 = vcmask 1042432  }
 0x195   : > { %v807_v43 = vmul.f32 %v3699_v38, %v806_v42  ;;  %vm4115_vm8 = vmand %vm1111_vm1, %vm1144_vm6 }
 0x197   : > { %v808_v46 = vmul.f32 0.5, %v807_v43 }
 0x199   : > { %v809_v47 = vsub.f32 1.5, %v808_v46 }
 0x19b   : > { %v810_v49 = vmul.f32 %v3699_v38, %v809_v47 }
 0x19d   : > { %v814_v51 = vsel %vm813_vm10, %v3699_v38, %v810_v49  ;;  %vm1521_vm10 = vcmask 1046532  }
 0x19e   : > { %v822_v53 = vmul.f32 %v814_v51, %v3952_v8 }
 0x1a0   : > { %v834_v55 = vmul.f32 %v3970_v44, %v822_v53  ;;  %v914_v44 = vld [vmem:[%s4931_s4 + $0x30] sm:$0xff] }
 0x1a2   : > { %v4029_v57 = vadd.f32 %v3977_v25, %v834_v55  ;;  %v915_v25 = vld [vmem:[%s4931_s4 + $0x38] sm:$0xff] }
 0x1a4   : > { %v850_v58 = vpack.c.bf16 %v4029_v57, %v4026_v56 }
 0x1a6   : > { %3371 = vmatmul.msk.bf16.gmra.mxu0 %vm639_vm0, %v850_v58 }
 0x1a8   : > { %v888_v50 = vpop.f32.mrf.mxu0 }
 0x1a9   : > { %v916_v19 = vmul.f32 %v908_v16, %v888_v50 }
 0x1b0   : > { %v890_v60 = vpop.f32.mrf.mxu0 }
 0x1b1   : > { %v917_v17 = vmul.f32 %v909_v35, %v890_v60 }
 0x1b3   : > { %v924_v21 = vpack.c.bf16 %v917_v17, %v916_v19  ;;  %v1120_v19 = vld [vmem:[#allocation2 + $0x8] sm:$0x1] }
 0x1b8   : > { %v893_v61 = vpop.f32.mrf.mxu0 }
 0x1b9   : > { %v918_v15 = vmul.f32 %v910_v11, %v893_v61 }
 0x1c0   : > { %v895_v62 = vpop.f32.mrf.mxu0 }
 0x1c1   : > { %v919_v12 = vmul.f32 %v911_v9, %v895_v62 }
 0x1c3   : > { %v925_v18 = vpack.c.bf16 %v919_v12, %v918_v15 }
 0x1c8   : > { %v898_v8 = vpop.f32.mrf.mxu0 }
 0x1c9   : > { %v920_v10 = vmul.f32 %v912_v5, %v898_v8  ;;  %v3616_v5 = vld [vmem:[%s4904_s6 + $0x18] sm:$0xff] }
 0x1d0   : > { %v900_v63 = vpop.f32.mrf.mxu0 }
 0x1d1   : > { %v921_v6 = vmul.f32 %v913_v1, %v900_v63 }
 0x1d3   : > { %v926_v14 = vpack.c.bf16 %v921_v6, %v920_v10  ;;  %v3755_v6 = vmov 0  }
 0x1d4   : > { %1114 = vst.msk [vmem:[#allocation2 + $0x48] sm:$0xf] %vm1109_vm15, %v3755_v6 }
 0x1d5   : > { %1110 = vst.msk [vmem:[#allocation2] sm:$0xf] %vm1109_vm15, %v3755_v6 }
 0x1d6   : > { %1112 = vst.msk [vmem:[#allocation2 + $0x4] sm:$0x1] %vm1111_vm1, %v3755_v6 }
 0x1d7   : > { %1115 = vst.msk [vmem:[#allocation2 + $0x4c] sm:$0x1] %vm1111_vm1, %v3755_v6  ;;  %vm1628_vm1 = vcmask 1044224  }
 0x1dd   : > { %v1325_v11 = vld [vmem:[#allocation2 + $0x4] sm:$0x1] }
 0x1de   : > { %v1353_v35 = vshll.u32 %v1325_v11, 16  ;;  %v1161_v11 = vld [vmem:[#allocation2 + $0x34] sm:$0x1] }
 0x1e0   : > { %v1355_v16 = vrot.slane %v1353_v35, 5 }
 0x223   : > { %v903_v0 = vpop.f32.mrf.mxu0 }
 0x224   : > { %v922_v3 = vmul.f32 %v914_v44, %v903_v0 }
 0x22b   : > { %v905_v2 = vpop.f32.mrf.mxu0 }
 0x22c   : > { %v923_v4 = vmul.f32 %v915_v25, %v905_v2  ;;  %v3613_v2 = vld [vmem:[%s4904_s6] sm:$0xff] }
 0x22e   : > { %v927_v7 = vpack.c.bf16 %v923_v4, %v922_v3  ;;  %v3614_v3 = vld [vmem:[%s4904_s6 + $0x8] sm:$0xff]  ;;  %v3615_v4 = vld [vmem:[%s4904_s6 + $0x10] sm:$0xff] }
 0x230   : > { %937 = vmatpush.bf16.msrb.mxu0 %v927_v7  ;;  %v1324_v7 = vld [vmem:[#allocation2] sm:$0xf] }
 0x231   : > { %v1344_v9 = vshrl.u32 %v1324_v7, 16  ;;  %v1347_v10 = vshll.u32 %v1324_v7, 16  ;;  %v3646_v7 = vld [vmem:[%s4908_s10 + $0x88] sm:$0xff] }
 0x233   : > { %v1346_v12 = vrot.slane %v1344_v9, 4 }
 0x234   : > { %938 = vmatpush.bf16.msrb.mxu0 %v926_v14  ;;  %v1349_v14 = vrot.slane %v1347_v10, 5  ;;  %v1135_v10 = vld [vmem:[#allocation2 + $0x30] sm:$0x1] }
 0x235   : > { %v1136_v35 = vsel %vm4106_vm7, 0, %v1135_v10 }
 0x236   : > { %v1350_v15 = vor.u32 %v1349_v14, %v1346_v12  ;;  %1137 = vst [vmem:[#allocation2 + $0x30] sm:$0x1] %v1136_v35 }
 0x238   : > { %939 = vmatpush.bf16.msrb.mxu0 %v925_v18  ;;  %v1351_v18 = vrot.slane %v1350_v15, 4  ;;  %v1162_v15 = vsel %vm4115_vm8, 0, %v1161_v11 }
 0x239   : > { %1163 = vst [vmem:[#allocation2 + $0x34] sm:$0x1] %v1162_v15 }
 0x23c   : > { %940 = vmatpush.bf16.msrb.mxu0 %v924_v21  ;;  %v1356_v21 = vsel %vm4099_vm4, %v1351_v18, %v1355_v16 }
 0x23f   : > { %3372 = vmatmul.msk.bf16.vlgmr.msrb.gmra.mxu0 %vm929_vm11, %v928_v22  ;;  %vm4129_vm11 = vmor %vm1520_vm9, %vm1521_vm10 }
 0x240   : > { %2466 = vmatpush.bf16.msra.mxu0 %v3646_v7 }
 0x2bc   : > { %v942_v52 = vpop.f32.mrf.mxu0 }
 0x2bd   : > { %v950_v28 = vmul.f32 %v3674_v26, %v942_v52  ;;  %v1146_v26 = vld [vmem:[#allocation2 + $0xc] sm:$0x1] }
 0x2bf   : > { %v955_v39 = vadd.f32 %v3675_v27, %v950_v28  ;;  %v1121_v27 = vsel %vm4106_vm7, 0, %v1120_v19  ;;  %v1147_v28 = vsel %vm4115_vm8, 0, %v1146_v26  ;;  %v3645_v19 = vld [vmem:[%s4908_s10 + $0x80] sm:$0xff] }
 0x2c0   : > { %1122 = vst [vmem:[#allocation2 + $0x8] sm:$0x1] %v1121_v27  ;;  %2467 = vmatpush.bf16.msra.mxu0 %v3645_v19 }
 0x2c1   : > { %v956_v29 = vpack.c.bf16 %v955_v39, %v955_v39  ;;  %v959_v31 = vrot.slane %v955_v39, 4  ;;  %1148 = vst [vmem:[#allocation2 + $0xc] sm:$0x1] %v1147_v28 }
 0x2c3   : > { %966 = vrot.lane.b32.xlu1 %v956_v29, %s3753_s0  ;;  %v962_v34 = vsel %vm961_vm12, %v955_v39, %v959_v31  ;;  %v1123_v39 = vld [vmem:[#allocation2 + $0x10] sm:$0x1]  ;;  %vm4147_vm12 = vmand %vm1109_vm15, %vm1144_vm6 }
 0x2c4   : > { %v944_v30 = vpop.f32.mrf.mxu0  ;;  %v963_v38 = vmul.f32 %v962_v34, %v957_v33  ;;  %v1126_v34 = vld [vmem:[#allocation2 + $0x18] sm:$0x1] }
 0x2c5   : > { %v1124_v30 = vsel %vm4106_vm7, 0, %v1123_v39 }
 0x2c6   : > { %v964_v41 = vpack.c.bf16 %v963_v38, %v963_v38  ;;  %1125 = vst [vmem:[#allocation2 + $0x10] sm:$0x1] %v1124_v30  ;;  %v1127_v38 = vsel %vm4106_vm7, 0, %v1126_v34 }
 0x2c7   : > { %1128 = vst [vmem:[#allocation2 + $0x18] sm:$0x1] %v1127_v38 }
 0x335   : > { %v967_v32 = vpop.permute.xlu1 %966 }
 0x336   : > { %v972_v36 = vsel %vm639_vm0, %v967_v32, 0  ;;  %v1488_v32 = vld [vmem:[#allocation2] sm:$0xe] }
 0x337   : > { %981 = vmatpush.bf16.xpose.msra.mxu2 %v972_v36  ;;  %v1152_v36 = vld [vmem:[#allocation2 + $0x1c] sm:$0x1] }
 0x33e   : > { %3373 = vmatmul.msk.bf16.vlgmr.msra.gmra.mxu2 %vm639_vm0, %v964_v41  ;;  %v1153_v41 = vsel %vm4115_vm8, 0, %v1152_v36 }
 0x33f   : > { %1154 = vst [vmem:[#allocation2 + $0x1c] sm:$0x1] %v1153_v41 }
 0x3c1   : > { %v983_v42 = vpop.f32.mrf.mxu2 }
 0x3c2   : > { %v987_v43 = vmul.f32 0.17677669, %v983_v42 }
 0x3c4   : > { %v989_v45 = vsel %vm988_vm13, %v987_v43, -inf }
 0x3c5   : > { %990 = vmax.xlane.f32.xlu2 %v989_v45 }
 0x3c9   : > { %v985_v46 = vpop.f32.mrf.mxu2 }
 0x3dd   : > { %1001 = vrot.lane.b32.xlu2 %v956_v29, %s3754_s2  ;;  %v1149_v29 = vld [vmem:[#allocation2 + $0x14] sm:$0x1] }
 0x3de   : > { %v1150_v31 = vsel %vm4115_vm8, 0, %v1149_v29 }
 0x3df   : > { %1151 = vst [vmem:[#allocation2 + $0x14] sm:$0x1] %v1150_v31 }
 0x3e6   : > { %v1269_v16 = vld [vmem:[#allocation2 + $0x14] sm:$0x1] }
 0x438   : > { %v991_v47 = vpop.xlane.xlu2 %990 }
 0x439   : > { %v992_v48 = vsub.f32 %v987_v43, %v991_v47  ;;  %v3395_v43 = vrot.slane %v1488_v32, 9  ;;  %v1129_v47 = vld [vmem:[#allocation2 + $0x20] sm:$0x1] }
 0x43b   : > { %v993_v49 = vmul.f32 1.442695, %v992_v48  ;;  %v1155_v48 = vld [vmem:[#allocation2 + $0x24] sm:$0x1] }
 0x43d   : > { %3700 = vpow2.f32 %v993_v49  ;;  %v1130_v49 = vsel %vm4106_vm7, 0, %v1129_v47 }
 0x43e   : > { %1131 = vst [vmem:[#allocation2 + $0x20] sm:$0x1] %v1130_v49  ;;  %v1272_v49 = vld [vmem:[#allocation2 + $0x18] sm:$0xf] }
 0x440   : > { %v1002_v51 = vpop.permute.xlu2 %1001 }
 0x441   : > { %v1008_v53 = vsel %vm1006_vm14, %v1002_v51, 0  ;;  %v1156_v51 = vsel %vm4115_vm8, 0, %v1155_v48 }
 0x442   : > { %1017 = vmatpush.bf16.msra.mxu3 %v1008_v53  ;;  %1157 = vst [vmem:[#allocation2 + $0x24] sm:$0x1] %v1156_v51  ;;  %v1275_v51 = vld [vmem:[#allocation2 + $0x1c] sm:$0x1] }
 0x443   : > { %v3701_v54 = vpop.eup %3700 }
 0x444   : > { %v995_v55 = vsel %vm988_vm13, %v3701_v54, 0.0 }
 0x445   : > { %996 = vadd.xlane.f32.xlu0 %v995_v55 }
 0x459   : > { %1455 = vrot.lane.b32.xlu0 %v1356_v21, %s3756_s23 }
 0x4b8   : > { %v997_v58 = vpop.xlane.xlu0 %996 }
 0x4b9   : > { %3702 = vrcp.f32 %v997_v58  ;;  %v1132_v58 = vld [vmem:[#allocation2 + $0x28] sm:$0x1] }
 0x4bf   : > { %v3703_v50 = vpop.eup %3702 }
 0x4c0   : > { %v999_v60 = vmul.f32 %v3703_v50, %v3701_v54  ;;  %v1158_v50 = vld [vmem:[#allocation2 + $0x2c] sm:$0x1] }
 0x4c2   : > { %v1000_v61 = vpack.c.bf16 %v999_v60, %v999_v60 }
 0x4c4   : > { %3374 = vmatmul.msk.bf16.vlgmr.msra.gmra.mxu3 %vm988_vm13, %v1000_v61  ;;  %v1133_v61 = vsel %vm4106_vm7, 0, %v1132_v58 }
 0x4c5   : > { %1134 = vst [vmem:[#allocation2 + $0x28] sm:$0x1] %v1133_v61 }
 0x547   : > { %v1019_v62 = vpop.f32.mrf.mxu3 }
 0x548   : > { %v1023_v8 = vmul.f32 %v1019_v62, %v957_v33  ;;  %v1489_v33 = vld [vmem:[#allocation2 + $0x4] sm:$0x1]  ;;  %v1159_v62 = vsel %vm4115_vm8, 0, %v1158_v50 }
 0x549   : > { %v1525_v45 = vrot.slane %v1489_v33, 5  ;;  %1160 = vst [vmem:[#allocation2 + $0x2c] sm:$0x1] %v1159_v62 }
 0x54a   : > { %v1025_v63 = vrot.slane %v1023_v8, 4 }
 0x54b   : > { %v1526_v46 = vsel %vm4129_vm11, %v3395_v43, %v1525_v45 }
 0x54c   : > { %v1027_v0 = vadd.f32 %v1025_v63, %v1023_v8  ;;  %1555 = vrot.lane.b32.xlu2 %v1526_v46, %s3754_s2 }
 0x54e   : > { %v1036_v44 = vpack.c.bf16 %v1027_v0, %v1027_v0 }
 0x54f   : > { %v1021_v25 = vpop.f32.mrf.mxu3 }
 0x550   : > { %v1070_v1 = vsel %vm1006_vm14, %v1036_v44, 0  ;;  %v1263_v44 = vld [vmem:[#allocation2 + $0xc] sm:$0x1]  ;;  %vm1579_vm14 = vcmask 781824  }
 0x551   : > { %1079 = vmatpush.bf16.msrb.mxu3 %v1070_v1 }
 0x554   : > { %3391 = vmatmul.msk.bf16.vlgmr.msrb.gmra.mxu3 %vm988_vm13, %v3613_v2 }
 0x564   : > { %3392 = vmatmul.msk.bf16.gmra.mxu3 %vm988_vm13, %v3614_v3 }
 0x574   : > { %3393 = vmatmul.msk.bf16.gmra.mxu3 %vm988_vm13, %v3615_v4 }
 0x584   : > { %3394 = vmatmul.msk.bf16.gmra.mxu3 %vm988_vm13, %v3616_v5  ;;  %vm1479_vm13 = vcmask 519424  }
 0x5d7   : > { %v1081_v53 = vpop.f32.mrf.mxu3 }
 0x5d8   : > { %v1101_v54 = vadd.f32 %v1081_v53, %v3986_v59  ;;  %v1260_v59 = vld [vmem:[#allocation2 + $0x8] sm:$0xf] }
 0x5da   : > { %v1170_v55 = vpack.c.bf16 %v1101_v54, %v1101_v54 }
 0x5dc   : > { %v1179_v60 = vshrl.u32 %v1170_v55, 16  ;;  %v1182_v63 = vshll.u32 %v1170_v55, 16 }
 0x5de   : > { %v1181_v8 = vrot.slane %v1179_v60, 7 }
 0x5df   : > { %v1083_v25 = vpop.f32.mrf.mxu3 }
 0x5e0   : > { %v1184_v1 = vor.u32 %v1182_v63, %v1181_v8  ;;  %v1185_v2 = vrot.slane %v1181_v8, 4  ;;  %v1102_v3 = vadd.f32 %v1083_v25, %v3983_v37  ;;  %v1266_v37 = vld [vmem:[#allocation2 + $0x10] sm:$0xf] }
 0x5e2   : > { %v1261_v4 = vsel %vm4147_vm12, %v1184_v1, %v1260_v59  ;;  %v1264_v5 = vsel %vm4106_vm7, %v1185_v2, %v1263_v44  ;;  %v1171_v6 = vpack.c.bf16 %v1102_v3, %v1102_v3  ;;  %v1138_v59 = vld [vmem:[#allocation2 + $0x38] sm:$0x1] }
 0x5e3   : > { %1262 = vst [vmem:[#allocation2 + $0x8] sm:$0xf] %v1261_v4 }
 0x5e4   : > { %1265 = vst [vmem:[#allocation2 + $0xc] sm:$0x1] %v1264_v5  ;;  %v1187_v9 = vshrl.u32 %v1171_v6, 16  ;;  %v1190_v14 = vshll.u32 %v1171_v6, 16  ;;  %v1164_v6 = vld [vmem:[#allocation2 + $0x3c] sm:$0x1] }
 0x5e5   : > { %v1165_v19 = vsel %vm4115_vm8, 0, %v1164_v6 }
 0x5e6   : > { %v1189_v12 = vrot.slane %v1187_v9, 7  ;;  %1166 = vst [vmem:[#allocation2 + $0x3c] sm:$0x1] %v1165_v19  ;;  %v1141_v19 = vld [vmem:[#allocation2 + $0x40] sm:$0x1] }
 0x5e7   : > { %v1086_v18 = vpop.f32.mrf.mxu3 }
 0x5e8   : > { %v1192_v21 = vor.u32 %v1190_v14, %v1189_v12  ;;  %v1193_v26 = vrot.slane %v1189_v12, 4  ;;  %v1103_v27 = vadd.f32 %v1086_v18, %v3998_v13 }
 0x5ea   : > { %v1267_v28 = vsel %vm4147_vm12, %v1192_v21, %v1266_v37  ;;  %v1270_v39 = vsel %vm4106_vm7, %v1193_v26, %v1269_v16  ;;  %v1172_v29 = vpack.c.bf16 %v1103_v27, %v1103_v27  ;;  %v1588_v30 = vld [vmem:[#allocation2 + $0x8] sm:$0xf]  ;;  %v1139_v37 = vsel %vm4106_vm7, 0, %v1138_v59  ;;  %v1278_v16 = vld [vmem:[#allocation2 + $0x20] sm:$0xf] }
 0x5eb   : > { %v1490_v31 = vld [vmem:[#allocation2 + $0x8] sm:$0xe]  ;;  %1268 = vst [vmem:[#allocation2 + $0x10] sm:$0xf] %v1267_v28  ;;  %1604 = vrot.lane.b32.xlu0 %v1588_v30, %s3753_s0  ;;  %v1491_v32 = vld [vmem:[#allocation2 + $0xc] sm:$0x1] }
 0x5ec   : > { %v3396_v33 = vrot.slane %v1490_v31, 9  ;;  %1271 = vst [vmem:[#allocation2 + $0x14] sm:$0x1] %v1270_v39  ;;  %v1195_v34 = vshrl.u32 %v1172_v29, 16  ;;  %v1529_v36 = vrot.slane %v1491_v32, 5  ;;  %v1198_v13 = vshll.u32 %v1172_v29, 16 }
 0x5ed   : > { %v1781_v38 = vld [vmem:[#allocation2 + $0x8] sm:$0xe]  ;;  %v1782_v46 = vld [vmem:[#allocation2 + $0xc] sm:$0x1]  ;;  %v1281_v21 = vld [vmem:[#allocation2 + $0x24] sm:$0x1] }
 0x5ee   : > { %v1326_v41 = vld [vmem:[#allocation2 + $0x8] sm:$0xf]  ;;  %v1197_v43 = vrot.slane %v1195_v34, 7  ;;  %v1530_v45 = vsel %vm4129_vm11, %v3396_v33, %v1529_v36  ;;  %v1327_v47 = vld [vmem:[#allocation2 + $0xc] sm:$0x1]  ;;  %v3403_v60 = vrot.slane %v1781_v38, 9 }
 0x5ef   : > { %v1358_v48 = vshrl.u32 %v1326_v41, 16  ;;  %1557 = vrot.lane.b32.xlu1 %v1530_v45, %s3754_s2  ;;  %v1088_v53 = vpop.f32.mrf.mxu3  ;;  %v1361_v54 = vshll.u32 %v1326_v41, 16  ;;  %v1815_v61 = vrot.slane %v1782_v46, 5  ;;  %v1367_v63 = vshll.u32 %v1327_v47, 16  ;;  %1140 = vst [vmem:[#allocation2 + $0x38] sm:$0x1] %v1139_v37 }
 0x5f0   : > { %v1200_v55 = vor.u32 %v1198_v13, %v1197_v43  ;;  %v1201_v58 = vrot.slane %v1197_v43, 4  ;;  %v1104_v50 = vadd.f32 %v1088_v53, %v4001_v40 }
 0x5f1   : > { %v1360_v62 = vrot.slane %v1358_v48, 4  ;;  %v1363_v8 = vrot.slane %v1361_v54, 5  ;;  %v1816_v12 = vsel %vm4129_vm11, %v3403_v60, %v1815_v61  ;;  %v1369_v28 = vrot.slane %v1367_v63, 5 }
 0x5f2   : > { %v2086_v44 = vld [vmem:[#allocation2 + $0x10] sm:$0xe]  ;;  %v1273_v25 = vsel %vm4147_vm12, %v1200_v55, %v1272_v49  ;;  %v1276_v1 = vsel %vm4106_vm7, %v1201_v58, %v1275_v51  ;;  %v1173_v2 = vpack.c.bf16 %v1104_v50, %v1104_v50 }
 0x5f3   : > { %v1589_v3 = vld [vmem:[#allocation2 + $0x10] sm:$0xf]  ;;  %v2087_v5 = vld [vmem:[#allocation2 + $0x14] sm:$0x1]  ;;  %1274 = vst [vmem:[#allocation2 + $0x18] sm:$0xf] %v1273_v25  ;;  %v1364_v40 = vor.u32 %v1363_v8, %v1360_v62 }
 0x5f4   : > { %v1783_v4 = vld [vmem:[#allocation2 + $0x10] sm:$0xe]  ;;  %1606 = vrot.lane.b32.xlu2 %v1589_v3, %s3753_s0  ;;  %1277 = vst [vmem:[#allocation2 + $0x1c] sm:$0x1] %v1276_v1  ;;  %v1203_v7 = vshrl.u32 %v1173_v2, 16  ;;  %v3411_v10 = vrot.slane %v2086_v44, 9 }
 0x5f5   : > { %v3404_v9 = vrot.slane %v1783_v4, 9  ;;  %v2120_v11 = vrot.slane %v2087_v5, 5  ;;  %v1784_v14 = vld [vmem:[#allocation2 + $0x14] sm:$0x1]  ;;  %v1206_v15 = vshll.u32 %v1173_v2, 16  ;;  %v1365_v27 = vrot.slane %v1364_v40, 4 }
 0x5f6   : > { %v1205_v35 = vrot.slane %v1203_v7, 7  ;;  %v1819_v18 = vrot.slane %v1784_v14, 5  ;;  %v1926_v39 = vld [vmem:[#allocation2 + $0x10] sm:$0xf]  ;;  %v1493_v46 = vld [vmem:[#allocation2 + $0x14] sm:$0x1] }
 0x5f7   : > { %1845 = vrot.lane.b32.xlu1 %v1816_v12, %s3756_s23  ;;  %v1091_v26 = vpop.f32.mrf.mxu3  ;;  %v1878_v33 = vld [vmem:[#allocation2 + $0x10] sm:$0xf]  ;;  %v1943_v36 = vshrl.u32 %v1926_v39, 16  ;;  %v1946_v13 = vshll.u32 %v1926_v39, 16  ;;  %v1370_v50 = vsel %vm4099_vm4, %v1365_v27, %v1369_v28  ;;  %v1533_v60 = vrot.slane %v1493_v46, 5 }
 0x5f8   : > { %v1208_v29 = vor.u32 %v1206_v15, %v1205_v35  ;;  %v1209_v30 = vrot.slane %v1205_v35, 4  ;;  %v1820_v31 = vsel %vm4129_vm11, %v3404_v9, %v1819_v18  ;;  %v1105_v32 = vadd.f32 %v1091_v26, %v4014_v24  ;;  %v1492_v34 = vld [vmem:[#allocation2 + $0x10] sm:$0xe]  ;;  %v1927_v61 = vld [vmem:[#allocation2 + $0x14] sm:$0x1] }
 0x5f9   : > { %1847 = vrot.lane.b32.xlu0 %v1820_v31, %s3756_s23  ;;  %v2121_v24 = vsel %vm4129_vm11, %v3411_v10, %v2120_v11  ;;  %v1328_v47 = vld [vmem:[#allocation2 + $0x10] sm:$0xf]  ;;  %v1945_v51 = vrot.slane %v1943_v36, 4  ;;  %v3397_v55 = vrot.slane %v1492_v34, 9  ;;  %v1948_v58 = vrot.slane %v1946_v13, 5 }
 0x5fa   : > { %v2088_v38 = vld [vmem:[#allocation2 + $0x18] sm:$0xe]  ;;  %v1279_v41 = vsel %vm4147_vm12, %v1208_v29, %v1278_v16  ;;  %v1282_v43 = vsel %vm4106_vm7, %v1209_v30, %v1281_v21  ;;  %v1174_v45 = vpack.c.bf16 %v1105_v32, %v1105_v32  ;;  %2158 = vst.msk [vmem:[#allocation3 + $0x8] sm:$0xf] %vm1109_vm15, %v2121_v24  ;;  %v1372_v62 = vshrl.u32 %v1328_v47, 16 }
 0x5fb   : > { %v2089_v48 = vld [vmem:[#allocation2 + $0x1c] sm:$0x1]  ;;  %v3412_v49 = vrot.slane %v2088_v38, 9  ;;  %1280 = vst [vmem:[#allocation2 + $0x20] sm:$0xf] %v1279_v41  ;;  %v1375_v44 = vshll.u32 %v1328_v47, 16  ;;  %v1949_v4 = vor.u32 %v1948_v58, %v1945_v51  ;;  %v1534_v16 = vsel %vm4129_vm11, %v3397_v55, %v1533_v60 }
 0x5fc   : > { %1894 = vrot.lane.b32.xlu2 %v1878_v33, %s3754_s2  ;;  %v2124_v53 = vrot.slane %v2089_v48, 5  ;;  %1283 = vst [vmem:[#allocation2 + $0x24] sm:$0x1] %v1282_v43  ;;  %v1211_v54 = vshrl.u32 %v1174_v45, 16  ;;  %v1214_v63 = vshll.u32 %v1174_v45, 16  ;;  %v1952_v9 = vshll.u32 %v1927_v61, 16 }
 0x5fd   : > { %v1330_v25 = vld [vmem:[#allocation2 + $0x18] sm:$0xf]  ;;  %v1284_v1 = vld [vmem:[#allocation2 + $0x28] sm:$0xf]  ;;  %v1287_v2 = vld [vmem:[#allocation2 + $0x2c] sm:$0x1] }
 0x5fe   : > { %v1213_v8 = vrot.slane %v1211_v54, 7  ;;  %v2125_v59 = vsel %vm4129_vm11, %v3412_v49, %v2124_v53  ;;  %v1590_v6 = vld [vmem:[#allocation2 + $0x18] sm:$0xf]  ;;  %v1374_v10 = vrot.slane %v1372_v62, 4  ;;  %v1377_v11 = vrot.slane %v1375_v44, 5 }
 0x5ff   : > { %1457 = vrot.lane.b32.xlu1 %v1370_v50, %s3756_s23  ;;  %v1093_v3 = vpop.f32.mrf.mxu3  ;;  %2159 = vst.msk [vmem:[#allocation3 + $0x14] sm:$0xf] %vm1109_vm15, %v2125_v59  ;;  %v1386_v12 = vshrl.u32 %v1330_v25, 16  ;;  %v1389_v14 = vshll.u32 %v1330_v25, 16  ;;  %v1329_v18 = vld [vmem:[#allocation2 + $0x14] sm:$0x1] }
 0x600   : > { %v1216_v5 = vor.u32 %v1214_v63, %v1213_v8  ;;  %v1217_v40 = vrot.slane %v1213_v8, 4  ;;  %v1106_v7 = vadd.f32 %v1093_v3, %v4011_v23  ;;  %v1950_v23 = vrot.slane %v1949_v4, 4  ;;  %v1167_v21 = vld [vmem:[#allocation2 + $0x44] sm:$0x1]  ;;  %v1879_v27 = vld [vmem:[#allocation2 + $0x18] sm:$0xf] }
 0x601   : > { %1608 = vrot.lane.b32.xlu0 %v1590_v6, %s3753_s0  ;;  %v1954_v28 = vrot.slane %v1952_v9, 5  ;;  %v1331_v39 = vld [vmem:[#allocation2 + $0x1c] sm:$0x1]  ;;  %v1388_v29 = vrot.slane %v1386_v12, 4  ;;  %v1391_v30 = vrot.slane %v1389_v14, 5  ;;  %v1378_v33 = vor.u32 %v1377_v11, %v1374_v10 }
 0x602   : > { %v1285_v37 = vsel %vm4147_vm12, %v1216_v5, %v1284_v1  ;;  %v1288_v35 = vsel %vm4106_vm7, %v1217_v40, %v1287_v2  ;;  %v1175_v15 = vpack.c.bf16 %v1106_v7, %v1106_v7  ;;  %v3429_v32 = vld [vmem:[#allocation3 + $0x8] sm:$0xf]  ;;  %v1381_v34 = vshll.u32 %v1329_v18, 16  ;;  %v1290_v43 = vld [vmem:[#allocation2 + $0x30] sm:$0xf] }
 0x603   : > { %1286 = vst [vmem:[#allocation2 + $0x28] sm:$0xf] %v1285_v37  ;;  %v1142_v36 = vsel %vm4106_vm7, 0, %v1141_v19  ;;  %v1168_v41 = vsel %vm4115_vm8, 0, %v1167_v21  ;;  %v1293_v45 = vld [vmem:[#allocation2 + $0x34] sm:$0x1]  ;;  %v1955_v46 = vsel %vm4099_vm4, %v1950_v23, %v1954_v28  ;;  %v1392_v53 = vor.u32 %v1391_v30, %v1388_v29 }
 0x604   : > { %1559 = vrot.lane.b32.xlu2 %v1534_v16, %s3754_s2  ;;  %1289 = vst [vmem:[#allocation2 + $0x2c] sm:$0x1] %v1288_v35  ;;  %v1219_v26 = vshrl.u32 %v1175_v15, 16  ;;  %v1222_v31 = vshll.u32 %v1175_v15, 16  ;;  %v2090_v54 = vld [vmem:[#allocation2 + $0x20] sm:$0xe] }
 0x605   : > { %1143 = vst [vmem:[#allocation2 + $0x40] sm:$0x1] %v1142_v36  ;;  %v1379_v52 = vrot.slane %v1378_v33, 4  ;;  %v1383_v55 = vrot.slane %v1381_v34, 5  ;;  %v1395_v58 = vshll.u32 %v1331_v39, 16  ;;  %v3413_v60 = vrot.slane %v2090_v54, 9 }
 0x606   : > { %v1221_v13 = vrot.slane %v1219_v26, 7  ;;  %v3619_v38 = vld [vmem:[#allocation3 + $0x10] sm:$0xf0]  ;;  %1169 = vst [vmem:[#allocation2 + $0x44] sm:$0x1] %v1168_v41  ;;  %v1393_v3 = vrot.slane %v1392_v53, 4 }
 0x607   : > { %1896 = vrot.lane.b32.xlu1 %v1879_v27, %s3754_s2  ;;  %v1096_v24 = vpop.f32.mrf.mxu3  ;;  %v3430_v47 = vor.u32 %v3619_v38, %v3429_v32  ;;  %v2091_v50 = vld [vmem:[#allocation2 + $0x24] sm:$0x1]  ;;  %v1591_v63 = vld [vmem:[#allocation2 + $0x20] sm:$0xf]  ;;  %v1928_v59 = vld [vmem:[#allocation2 + $0x18] sm:$0xf]  ;;  %v1384_v9 = vsel %vm4099_vm4, %v1379_v52, %v1383_v55 }
 0x608   : > { %v1224_v48 = vor.u32 %v1222_v31, %v1221_v13  ;;  %v1225_v49 = vrot.slane %v1221_v13, 4  ;;  %v1107_v51 = vadd.f32 %v1096_v24, %v4026_v56  ;;  %v2128_v25 = vrot.slane %v2091_v50, 5  ;;  %v1494_v4 = vld [vmem:[#allocation2 + $0x18] sm:$0xe]  ;;  %v1299_v7 = vld [vmem:[#allocation2 + $0x3c] sm:$0x1] }
 0x609   : > { %2054 = vrot.lane.b32.xlu0 %v1955_v46, %s3753_s0  ;;  %3539 = vmatmul.msk.bf16.vlgmr.msra.gmra.mxu0 %vm639_vm0, %v3430_v47  ;;  %v1957_v40 = vshrl.u32 %v1928_v59, 16  ;;  %v1296_v6 = vld [vmem:[#allocation2 + $0x38] sm:$0xf]  ;;  %v1397_v10 = vrot.slane %v1395_v58, 5  ;;  %v1495_v11 = vld [vmem:[#allocation2 + $0x1c] sm:$0x1] }
 0x60a   : > { %v1291_v61 = vsel %vm4147_vm12, %v1224_v48, %v1290_v43  ;;  %v1294_v62 = vsel %vm4106_vm7, %v1225_v49, %v1293_v45  ;;  %v1176_v8 = vpack.c.bf16 %v1107_v51, %v1107_v51  ;;  %v2092_v56 = vld [vmem:[#allocation2 + $0x28] sm:$0xe]  ;;  %v1787_v12 = vld [vmem:[#allocation2 + $0x20] sm:$0xe]  ;;  %v2129_v14 = vsel %vm4129_vm11, %v3413_v60, %v2128_v25  ;;  %v1788_v23 = vld [vmem:[#allocation2 + $0x24] sm:$0x1] }
 0x60b   : > { %1292 = vst [vmem:[#allocation2 + $0x30] sm:$0xf] %v1291_v61  ;;  %v2093_v44 = vld [vmem:[#allocation2 + $0x2c] sm:$0x1]  ;;  %v3414_v1 = vrot.slane %v2092_v56, 9  ;;  %v1960_v37 = vshll.u32 %v1928_v59, 16  ;;  %v1398_v28 = vsel %vm4099_vm4, %v1393_v3, %v1397_v10 }
 0x60c   : > { %1610 = vrot.lane.b32.xlu2 %v1591_v63, %s3753_s0  ;;  %1295 = vst [vmem:[#allocation2 + $0x34] sm:$0x1] %v1294_v62  ;;  %v1227_v2 = vshrl.u32 %v1176_v8, 16  ;;  %v2132_v5 = vrot.slane %v2093_v44, 5  ;;  %v1230_v15 = vshll.u32 %v1176_v8, 16  ;;  %v1959_v18 = vrot.slane %v1957_v40, 4 }
 0x60d   : > { %2160 = vst.msk [vmem:[#allocation3 + $0x20] sm:$0xf] %vm1109_vm15, %v2129_v14  ;;  %v1962_v21 = vrot.slane %v1960_v37, 5  ;;  %v3398_v29 = vrot.slane %v1494_v4, 9  ;;  %v1537_v30 = vrot.slane %v1495_v11, 5  ;;  %v3406_v31 = vrot.slane %v1787_v12, 9 }
 0x60e   : > { %v1229_v35 = vrot.slane %v1227_v2, 7  ;;  %v2133_v16 = vsel %vm4129_vm11, %v3414_v1, %v2132_v5  ;;  %v1929_v32 = vld [vmem:[#allocation2 + $0x1c] sm:$0x1]  ;;  %v1880_v38 = vld [vmem:[#allocation2 + $0x20] sm:$0xf]  ;;  %v1827_v41 = vrot.slane %v1788_v23, 5 }
 0x60f   : > { %1459 = vrot.lane.b32.xlu1 %v1384_v9, %s3756_s23  ;;  %v1098_v19 = vpop.f32.mrf.mxu3  ;;  %2161 = vst.msk [vmem:[#allocation3 + $0x2c] sm:$0xf] %vm1109_vm15, %v2133_v16  ;;  %v1963_v33 = vor.u32 %v1962_v21, %v1959_v18  ;;  %v1966_v43 = vshll.u32 %v1929_v32, 16  ;;  %v1785_v45 = vld [vmem:[#allocation2 + $0x18] sm:$0xe]  ;;  %v1538_v52 = vsel %vm4129_vm11, %v3398_v29, %v1537_v30 }
 0x610   : > { %v1232_v26 = vor.u32 %v1230_v15, %v1229_v35  ;;  %v1233_v27 = vrot.slane %v1229_v35, 4  ;;  %v1108_v39 = vadd.f32 %v1098_v19, %v4029_v57  ;;  %v1786_v46 = vld [vmem:[#allocation2 + $0x1c] sm:$0x1]  ;;  %v1930_v24 = vld [vmem:[#allocation2 + $0x20] sm:$0xf]  ;;  %v1828_v55 = vsel %vm4129_vm11, %v3406_v31, %v1827_v41 }
 0x611   : > { %1461 = vrot.lane.b32.xlu0 %v1398_v28, %s3756_s23  ;;  %v1302_v47 = vld [vmem:[#allocation2 + $0x40] sm:$0xf]  ;;  %v1964_v49 = vrot.slane %v1963_v33, 4  ;;  %v1305_v60 = vld [vmem:[#allocation2 + $0x44] sm:$0x1]  ;;  %v1971_v62 = vshrl.u32 %v1930_v24, 16 }
 0x612   : > { %v1297_v34 = vsel %vm4147_vm12, %v1232_v26, %v1296_v6  ;;  %v1300_v36 = vsel %vm4106_vm7, %v1233_v27, %v1299_v7  ;;  %v1177_v13 = vpack.c.bf16 %v1108_v39, %v1108_v39  ;;  %v2094_v51 = vld [vmem:[#allocation2 + $0x30] sm:$0xe]  ;;  %v1968_v44 = vrot.slane %v1966_v43, 5  ;;  %v1496_v3 = vld [vmem:[#allocation2 + $0x20] sm:$0xe] }
 0x613   : > { %1298 = vst [vmem:[#allocation2 + $0x38] sm:$0xf] %v1297_v34  ;;  %v2095_v50 = vld [vmem:[#allocation2 + $0x34] sm:$0x1]  ;;  %v3415_v8 = vrot.slane %v2094_v51, 9  ;;  %v1974_v25 = vshll.u32 %v1930_v24, 16 }
 0x614   : > { %1898 = vrot.lane.b32.xlu2 %v1880_v38, %s3754_s2  ;;  %1301 = vst [vmem:[#allocation2 + $0x3c] sm:$0x1] %v1300_v36  ;;  %v1235_v57 = vshrl.u32 %v1177_v13, 16  ;;  %v3441_v48 = vld [vmem:[#allocation3 + $0x20] sm:$0xf]  ;;  %v1238_v54 = vshll.u32 %v1177_v13, 16  ;;  %v1969_v7 = vsel %vm4099_vm4, %v1964_v49, %v1968_v44 }
 0x615   : > { %v2136_v63 = vrot.slane %v2095_v50, 5  ;;  %v3405_v1 = vrot.slane %v1785_v45, 9  ;;  %v1823_v2 = vrot.slane %v1786_v46, 5  ;;  %v1497_v4 = vld [vmem:[#allocation2 + $0x24] sm:$0x1]  ;;  %v1973_v11 = vrot.slane %v1971_v62, 4 }
 0x616   : > { %v1237_v53 = vrot.slane %v1235_v57, 7  ;;  %v3622_v58 = vld [vmem:[#allocation3 + $0x28] sm:$0xf0]  ;;  %v1332_v10 = vld [vmem:[#allocation2 + $0x20] sm:$0xf]  ;;  %v1976_v37 = vrot.slane %v1974_v25, 5 }
 0x617   : > { %1561 = vrot.lane.b32.xlu1 %v1538_v52, %s3754_s2  ;;  %v3442_v61 = vor.u32 %v3622_v58, %v3441_v48  ;;  %v2137_v5 = vsel %vm4129_vm11, %v3415_v8, %v2136_v63  ;;  %v1334_v35 = vld [vmem:[#allocation2 + $0x28] sm:$0xf]  ;;  %v1400_v15 = vshrl.u32 %v1332_v10, 16  ;;  %v1403_v22 = vshll.u32 %v1332_v10, 16  ;;  %v1931_v21 = vld [vmem:[#allocation2 + $0x24] sm:$0x1] }
 0x618   : > { %v1240_v56 = vor.u32 %v1238_v54, %v1237_v53  ;;  %v1241_v59 = vrot.slane %v1237_v53, 4  ;;  %2162 = vst.msk [vmem:[#allocation3 + $0x38] sm:$0xf] %vm1109_vm15, %v2137_v5  ;;  %v1824_v16 = vsel %vm4129_vm11, %v3405_v1, %v1823_v2  ;;  %v3399_v18 = vrot.slane %v1496_v3, 9  ;;  %v1592_v28 = vld [vmem:[#allocation2 + $0x28] sm:$0xf] }
 0x619   : > { %1851 = vrot.lane.b32.xlu0 %v1828_v55, %s3756_s23  ;;  %3540 = vmatmul.msk.bf16.gmra.mxu0 %vm639_vm0, %v3442_v61  ;;  %v1541_v19 = vrot.slane %v1497_v4, 5  ;;  %v1414_v26 = vshrl.u32 %v1334_v35, 16  ;;  %v1417_v27 = vshll.u32 %v1334_v35, 16  ;;  %v1977_v39 = vor.u32 %v1976_v37, %v1973_v11  ;;  %v2100_v29 = vld [vmem:[#allocation2 + $0x48] sm:$0xe] }
 0x61a   : > { %v1303_v40 = vsel %vm4147_vm12, %v1240_v56, %v1302_v47  ;;  %v1306_v6 = vsel %vm4106_vm7, %v1241_v59, %v1305_v60  ;;  %v2096_v9 = vld [vmem:[#allocation2 + $0x38] sm:$0xe]  ;;  %v1402_v30 = vrot.slane %v1400_v15, 4  ;;  %v1405_v31 = vrot.slane %v1403_v22, 5  ;;  %v2101_v32 = vld [vmem:[#allocation2 + $0x4c] sm:$0x1] }
 0x61b   : > { %1304 = vst [vmem:[#allocation2 + $0x40] sm:$0xf] %v1303_v40  ;;  %v2097_v12 = vld [vmem:[#allocation2 + $0x3c] sm:$0x1]  ;;  %v3416_v14 = vrot.slane %v2096_v9, 9  ;;  %v1542_v34 = vsel %vm4129_vm11, %v3399_v18, %v1541_v19  ;;  %v1980_v36 = vshll.u32 %v1931_v21, 16 }
 0x61c   : > { %2056 = vrot.lane.b32.xlu2 %v1969_v7, %s3753_s0  ;;  %1307 = vst [vmem:[#allocation2 + $0x44] sm:$0x1] %v1306_v6  ;;  %v2140_v0 = vrot.slane %v2097_v12, 5  ;;  %v1637_v33 = vld [vmem:[#allocation2 + $0x8] sm:$0xf]  ;;  %v3418_v38 = vrot.slane %v2100_v29, 9  ;;  %v1406_v53 = vor.u32 %v1405_v31, %v1402_v30 }
 0x61d   : > { %v2148_v41 = vrot.slane %v2101_v32, 5  ;;  %v1416_v57 = vrot.slane %v1414_v26, 4  ;;  %v1419_v43 = vrot.slane %v1417_v27, 5  ;;  %v1881_v24 = vld [vmem:[#allocation2 + $0x28] sm:$0xf]  ;;  %v1978_v47 = vrot.slane %v1977_v39, 4 }
 0x61e   : > { %v2141_v23 = vsel %vm4129_vm11, %v3416_v14, %v2140_v0  ;;  %v1333_v48 = vld [vmem:[#allocation2 + $0x24] sm:$0x1]  ;;  %v1335_v54 = vld [vmem:[#allocation2 + $0x2c] sm:$0x1]  ;;  %v1654_v52 = vshrl.u32 %v1637_v33, 16  ;;  %v1657_v55 = vshll.u32 %v1637_v33, 16 }
 0x61f   : > { %1849 = vrot.lane.b32.xlu1 %v1824_v16, %s3756_s23  ;;  %2163 = vst.msk [vmem:[#allocation3 + $0x44] sm:$0xf] %vm1109_vm15, %v2141_v23  ;;  %v2149_v51 = vsel %vm4129_vm11, %v3418_v38, %v2148_v41  ;;  %v1982_v58 = vrot.slane %v1980_v36, 5  ;;  %v3453_v50 = vld [vmem:[#allocation3 + $0x38] sm:$0xf]  ;;  %v1409_v8 = vshll.u32 %v1333_v48, 16  ;;  %v1420_v63 = vor.u32 %v1419_v43, %v1416_v57 }
 0x620   : > { %2165 = vst.msk [vmem:[#allocation3 + $0x5c] sm:$0xf] %vm1109_vm15, %v2149_v51  ;;  %v1932_v56 = vld [vmem:[#allocation2 + $0x28] sm:$0xf]  ;;  %v1593_v44 = vld [vmem:[#allocation2 + $0x30] sm:$0xf] }
 0x621   : > { %1612 = vrot.lane.b32.xlu0 %v1592_v28, %s3753_s0  ;;  %v1983_v59 = vsel %vm4099_vm4, %v1978_v47, %v1982_v58  ;;  %v1423_v25 = vshll.u32 %v1335_v54, 16  ;;  %v4284_v1 = vld [vmem:[#allocation2 + $0x28] sm:$0xe]  ;;  %v1407_v2 = vrot.slane %v1406_v53, 4  ;;  %v1934_v3 = vld [vmem:[#allocation2 + $0x30] sm:$0xf] }
 0x622   : > { %v2098_v13 = vld [vmem:[#allocation2 + $0x40] sm:$0xe]  ;;  %v1656_v4 = vrot.slane %v1654_v52, 4  ;;  %v1659_v5 = vrot.slane %v1657_v55, 5  ;;  %v1499_v40 = vld [vmem:[#allocation2 + $0x2c] sm:$0x1]  ;;  %v1456_v55 = vpop.permute.xlu0 %1455 }
 0x623   : > { %v2099_v45 = vld [vmem:[#allocation2 + $0x44] sm:$0x1]  ;;  %v3417_v46 = vrot.slane %v2098_v13, 9  ;;  %v1933_v6 = vld [vmem:[#allocation2 + $0x2c] sm:$0x1]  ;;  %v1985_v7 = vshrl.u32 %v1932_v56, 16 }
 0x624   : > { %1563 = vrot.lane.b32.xlu2 %v1542_v34, %s3754_s2  ;;  %v2144_v49 = vrot.slane %v2099_v45, 5  ;;  %v1988_v9 = vshll.u32 %v1932_v56, 16  ;;  %v1411_v10 = vrot.slane %v1409_v8, 5  ;;  %v1421_v11 = vrot.slane %v1420_v63, 4  ;;  %v1791_v12 = vld [vmem:[#allocation2 + $0x30] sm:$0xe] }
 0x625   : > { %v1638_v14 = vld [vmem:[#allocation2 + $0xc] sm:$0x1]  ;;  %v1425_v37 = vrot.slane %v1423_v25, 5  ;;  %v3400_v0 = vrot.slane %v4284_v1, 9  ;;  %v1792_v35 = vld [vmem:[#allocation2 + $0x34] sm:$0x1]  ;;  %v1660_v21 = vor.u32 %v1659_v5, %v1656_v4 }
 0x626   : > { %v3625_v60 = vld [vmem:[#allocation3 + $0x40] sm:$0xf0]  ;;  %v2145_v61 = vsel %vm4129_vm11, %v3417_v46, %v2144_v49  ;;  %v1999_v15 = vshrl.u32 %v1934_v3, 16  ;;  %v2002_v22 = vshll.u32 %v1934_v3, 16  ;;  %v1545_v16 = vrot.slane %v1499_v40, 5 }
 0x627   : > { %1900 = vrot.lane.b32.xlu1 %v1881_v24, %s3754_s2  ;;  %v3454_v62 = vor.u32 %v3625_v60, %v3453_v50  ;;  %2164 = vst.msk [vmem:[#allocation3 + $0x50] sm:$0xf] %vm1109_vm15, %v2145_v61  ;;  %v1994_v18 = vshll.u32 %v1933_v6, 16  ;;  %v4290_v19 = vld [vmem:[#allocation2 + $0x28] sm:$0xe]  ;;  %v1412_v26 = vsel %vm4099_vm4, %v1407_v2, %v1411_v10  ;;  %v3408_v27 = vrot.slane %v1791_v12, 9 }
 0x628   : > { %v4292_v23 = vld [vmem:[#allocation2 + $0x2c] sm:$0x1]  ;;  %v1987_v28 = vrot.slane %v1985_v7, 4  ;;  %v1990_v39 = vrot.slane %v1988_v9, 5  ;;  %v1426_v29 = vsel %vm4099_vm4, %v1421_v11, %v1425_v37  ;;  %v1835_v30 = vrot.slane %v1792_v35, 5 }
 0x629   : > { %2058 = vrot.lane.b32.xlu0 %v1983_v59, %s3753_s0  ;;  %3541 = vmatmul.msk.bf16.gmra.mxu0 %vm639_vm0, %v3454_v62  ;;  %v1935_v31 = vld [vmem:[#allocation2 + $0x34] sm:$0x1]  ;;  %v1336_v32 = vld [vmem:[#allocation2 + $0x30] sm:$0xf]  ;;  %v1663_v33 = vshll.u32 %v1638_v14, 16  ;;  %v3407_v36 = vrot.slane %v4290_v19, 9  ;;  %v1546_v8 = vsel %vm4129_vm11, %v3400_v0, %v1545_v16 }
 0x62a   : > { %v1882_v34 = vld [vmem:[#allocation2 + $0x30] sm:$0xf]  ;;  %v1831_v13 = vrot.slane %v4292_v23, 5  ;;  %v2001_v38 = vrot.slane %v1999_v15, 4  ;;  %v2004_v41 = vrot.slane %v2002_v22, 5  ;;  %v1996_v57 = vrot.slane %v1994_v18, 5  ;;  %v1556_v18 = vpop.permute.xlu2 %1555 }
 0x62b   : > { %v4302_v43 = vld [vmem:[#allocation2 + $0x30] sm:$0xe]  ;;  %v1337_v45 = vld [vmem:[#allocation2 + $0x34] sm:$0x1]  ;;  %v1661_v46 = vrot.slane %v1660_v21, 4  ;;  %v1991_v47 = vor.u32 %v1990_v39, %v1987_v28  ;;  %v2008_v49 = vshll.u32 %v1935_v31, 16  ;;  %v1836_v63 = vsel %vm4129_vm11, %v3408_v27, %v1835_v30 }
 0x62c   : > { %1614 = vrot.lane.b32.xlu2 %v1593_v44, %s3753_s0  ;;  %v3628_v24 = vld [vmem:[#allocation3 + $0x58] sm:$0xf0]  ;;  %v4304_v48 = vld [vmem:[#allocation2 + $0x34] sm:$0x1]  ;;  %v1428_v51 = vshrl.u32 %v1336_v32, 16  ;;  %v1431_v53 = vshll.u32 %v1336_v32, 16  ;;  %v2005_v61 = vor.u32 %v2004_v41, %v2001_v38  ;;  %v1832_v38 = vsel %vm4129_vm11, %v3407_v36, %v1831_v13 }
 0x62d   : > { %v1338_v54 = vld [vmem:[#allocation2 + $0x38] sm:$0xf]  ;;  %v1308_v52 = vld [vmem:[#allocation2] sm:$0xf]  ;;  %v1665_v58 = vrot.slane %v1663_v33, 5  ;;  %v3401_v60 = vrot.slane %v4302_v43, 9 }
 0x62e   : > { %v3465_v50 = vld [vmem:[#allocation3 + $0x50] sm:$0xf]  ;;  %v1437_v62 = vshll.u32 %v1337_v45, 16  ;;  %1316 = vst.msk [vmem:[#allocation3] sm:$0xf] %vm1109_vm15, %v1308_v52  ;;  %v1992_v25 = vrot.slane %v1991_v47, 4 }
 0x62f   : > { %1463 = vrot.lane.b32.xlu1 %v1412_v26, %s3756_s23  ;;  %v1339_v56 = vld [vmem:[#allocation2 + $0x3c] sm:$0x1]  ;;  %v1936_v59 = vld [vmem:[#allocation2 + $0x38] sm:$0xf]  ;;  %1480 = vst.msk [vmem:[#allocation3] sm:$0xf] %vm1479_vm13, %v1456_v55  ;;  %v1666_v44 = vsel %vm4099_vm4, %v1661_v46, %v1665_v58  ;;  %v3466_v4 = vor.u32 %v3628_v24, %v3465_v50 }
 0x630   : > { %v1430_v1 = vrot.slane %v1428_v51, 4  ;;  %v1433_v2 = vrot.slane %v1431_v53, 5  ;;  %v1442_v3 = vshrl.u32 %v1338_v54, 16  ;;  %v1549_v5 = vrot.slane %v4304_v48, 5  ;;  %1773 = vst.msk [vmem:[#allocation3 + $0x4] sm:$0xf] %vm1109_vm15, %v1666_v44 }
 0x631   : > { %1465 = vrot.lane.b32.xlu0 %v1426_v29, %s3756_s23  ;;  %v4318_v40 = vrot.slane %v2008_v49, 5  ;;  %v1445_v6 = vshll.u32 %v1338_v54, 16  ;;  %v4320_v7 = vrot.slane %v2005_v61, 4  ;;  %v4322_v9 = vrot.slane %v1437_v62, 5  ;;  %v1640_v12 = vld [vmem:[#allocation2 + $0x14] sm:$0x1] }
 0x632   : > { %v1451_v10 = vshll.u32 %v1339_v56, 16  ;;  %v2013_v11 = vshrl.u32 %v1936_v59, 16  ;;  %v1639_v14 = vld [vmem:[#allocation2 + $0x10] sm:$0xf]  ;;  %v1309_v37 = vld [vmem:[#allocation2 + $0x8] sm:$0xf]  ;;  %v1997_v0 = vsel %vm4099_vm4, %v1992_v25, %v1996_v57  ;;  %v1434_v35 = vor.u32 %v1433_v2, %v1430_v1 }
 0x633   : > { %v4329_v15 = vrot.slane %v1442_v3, 4  ;;  %v4331_v22 = vld [vmem:[#allocation2 + $0x3c] sm:$0x1]  ;;  %v2016_v16 = vshll.u32 %v1936_v59, 16  ;;  %1317 = vst.msk [vmem:[#allocation3 + $0xc] sm:$0xf] %vm1109_vm15, %v1309_v37  ;;  %v1550_v61 = vsel %vm4129_vm11, %v3401_v60, %v1549_v5 }
 0x634   : > { %1902 = vrot.lane.b32.xlu2 %v1882_v34, %s3754_s2  ;;  %v1677_v21 = vshll.u32 %v1640_v12, 16  ;;  %v1668_v26 = vshrl.u32 %v1639_v14, 16  ;;  %v1671_v27 = vshll.u32 %v1639_v14, 16  ;;  %v1310_v28 = vld [vmem:[#allocation2 + $0x10] sm:$0xf]  ;;  %v4335_v39 = vrot.slane %v1445_v6, 5 }
 0x635   : > { %v4337_v29 = vrot.slane %v1451_v10, 5  ;;  %1580 = vst.msk [vmem:[#allocation3] sm:$0xf] %vm1579_vm14, %v1556_v18  ;;  %v1311_v30 = vld [vmem:[#allocation2 + $0x18] sm:$0xf]  ;;  %v4340_v31 = vrot.slane %v2013_v11, 4  ;;  %v2011_v11 = vsel %vm4099_vm4, %v4320_v7, %v4318_v40 }
 0x636   : > { %v2022_v32 = vshll.u32 %v4331_v22, 16  ;;  %v1670_v33 = vrot.slane %v1668_v26, 4  ;;  %v1673_v34 = vrot.slane %v1671_v27, 5  ;;  %1318 = vst.msk [vmem:[#allocation3 + $0x18] sm:$0xf] %vm1109_vm15, %v1310_v28  ;;  %v4350_v57 = vrot.slane %v1434_v35, 4 }
 0x637   : > { %1565 = vrot.lane.b32.xlu1 %v1546_v8, %s3754_s2  ;;  %v1594_v41 = vld [vmem:[#allocation2 + $0x38] sm:$0xf]  ;;  %1319 = vst.msk [vmem:[#allocation3 + $0x24] sm:$0xf] %vm1109_vm15, %v1311_v30  ;;  %v1644_v46 = vld [vmem:[#allocation2 + $0x24] sm:$0x1]  ;;  %v1448_v12 = vor.u32 %v4335_v39, %v4329_v15 }
 0x638   : > { %v3636_v45 = vld [vmem:[%s4908_s10 + $0x38] sm:$0xff]  ;;  %v4357_v24 = vrot.slane %v2016_v16, 5  ;;  %v1679_v23 = vrot.slane %v1677_v21, 5  ;;  %v1674_v47 = vor.u32 %v1673_v34, %v1670_v33  ;;  %v1643_v19 = vld [vmem:[#allocation2 + $0x20] sm:$0xf]  ;;  %v3635_v53 = vld [vmem:[%s4908_s10 + $0x30] sm:$0xff] }
 0x639   : > { %1855 = vrot.lane.b32.xlu0 %v1836_v63, %s3756_s23  ;;  %3542 = vmatmul.msk.bf16.gmra.mxu0 %vm639_vm0, %v3466_v4  ;;  %v1641_v48 = vld [vmem:[#allocation2 + $0x18] sm:$0xf]  ;;  %v1696_v36 = vshrl.u32 %v1643_v19, 16  ;;  %v1699_v13 = vshll.u32 %v1643_v19, 16  ;;  %v1642_v49 = vld [vmem:[#allocation2 + $0x1c] sm:$0x1] }
 0x63a   : > { %2402 = vmatpush.bf16.msrb.mxu2 %v3636_v45  ;;  %v1312_v51 = vld [vmem:[#allocation2 + $0x20] sm:$0xf]  ;;  %v3644_v54 = vld [vmem:[%s4908_s10 + $0x78] sm:$0xff]  ;;  %v1675_v52 = vrot.slane %v1674_v47, 4  ;;  %v1705_v55 = vshll.u32 %v1644_v46, 16  ;;  %v1682_v58 = vshrl.u32 %v1641_v48, 16  ;;  %v2019_v15 = vor.u32 %v4357_v24, %v4340_v31 }
 0x63b   : > { %v1685_v50 = vshll.u32 %v1641_v48, 16  ;;  %v1698_v62 = vrot.slane %v1696_v36, 4  ;;  %v1701_v8 = vrot.slane %v1699_v13, 5  ;;  %1320 = vst.msk [vmem:[#allocation3 + $0x30] sm:$0xf] %vm1109_vm15, %v1312_v51  ;;  %2431 = vmatpush.bf16.msra.mxu1 %v3644_v54  ;;  %v1691_v25 = vshll.u32 %v1642_v49, 16 }
 0x63c   : > { %2060 = vrot.lane.b32.xlu2 %v1997_v0, %s3753_s0  ;;  %v1313_v63 = vld [vmem:[#allocation2 + $0x28] sm:$0xf]  ;;  %v1680_v56 = vsel %vm4099_vm4, %v1675_v52, %v1679_v23  ;;  %v1684_v59 = vrot.slane %v1682_v58, 4  ;;  %v1648_v60 = vld [vmem:[#allocation2 + $0x34] sm:$0x1]  ;;  %v1707_v4 = vrot.slane %v1705_v55, 5 }
 0x63d   : > { %v1687_v44 = vrot.slane %v1685_v50, 5  ;;  %1321 = vst.msk [vmem:[#allocation3 + $0x3c] sm:$0xf] %vm1109_vm15, %v1313_v63  ;;  %v1702_v43 = vor.u32 %v1701_v8, %v1698_v62  ;;  %v1647_v1 = vld [vmem:[#allocation2 + $0x30] sm:$0xf]  ;;  %v3634_v3 = vld [vmem:[%s4908_s10 + $0x28] sm:$0xff]  ;;  %v1440_v8 = vsel %vm4099_vm4, %v4350_v57, %v4322_v9 }
 0x63e   : > { %2403 = vmatpush.bf16.msrb.mxu2 %v3635_v53  ;;  %1774 = vst.msk [vmem:[#allocation3 + $0x10] sm:$0xf] %vm1109_vm15, %v1680_v56  ;;  %v1883_v2 = vld [vmem:[#allocation2 + $0x38] sm:$0xf]  ;;  %v1724_v6 = vshrl.u32 %v1647_v1, 16  ;;  %v1727_v10 = vshll.u32 %v1647_v1, 16 }
 0x63f   : > { %1853 = vrot.lane.b32.xlu1 %v1832_v38, %s3756_s23  ;;  %v1688_v5 = vor.u32 %v1687_v44, %v1684_v59  ;;  %v1703_v14 = vrot.slane %v1702_v43, 4  ;;  %v1733_v37 = vshll.u32 %v1648_v60, 16  ;;  %v1645_v0 = vld [vmem:[#allocation2 + $0x28] sm:$0xf]  ;;  %v1646_v35 = vld [vmem:[#allocation2 + $0x2c] sm:$0x1] }
 0x640   : > { %v1693_v18 = vrot.slane %v1691_v25, 5  ;;  %v1726_v21 = vrot.slane %v1724_v6, 4  ;;  %v1729_v26 = vrot.slane %v1727_v10, 5  ;;  %v1314_v27 = vld [vmem:[#allocation2 + $0x30] sm:$0xf]  ;;  %v1710_v40 = vshrl.u32 %v1645_v0, 16 }
 0x641   : > { %1616 = vrot.lane.b32.xlu0 %v1594_v41, %s3753_s0  ;;  %v1689_v16 = vrot.slane %v1688_v5, 4  ;;  %v1595_v28 = vld [vmem:[#allocation2 + $0x40] sm:$0xf]  ;;  %v1708_v30 = vsel %vm4099_vm4, %v1703_v14, %v1707_v4  ;;  %v1713_v7 = vshll.u32 %v1645_v0, 16  ;;  %v1719_v33 = vshll.u32 %v1646_v35, 16  ;;  %v3643_v49 = vld [vmem:[%s4908_s10 + $0x70] sm:$0xff] }
 0x642   : > { %2404 = vmatpush.bf16.msrb.mxu2 %v3634_v3  ;;  %1322 = vst.msk [vmem:[#allocation3 + $0x48] sm:$0xf] %vm1109_vm15, %v1314_v27  ;;  %v1730_v34 = vor.u32 %v1729_v26, %v1726_v21  ;;  %v1315_v38 = vld [vmem:[#allocation2 + $0x38] sm:$0xf]  ;;  %v1735_v45 = vrot.slane %v1733_v37, 5  ;;  %v1712_v46 = vrot.slane %v1710_v40, 4  ;;  %2432 = vmatpush.bf16.msra.mxu1 %v3643_v49 }
 0x643   : > { %1776 = vst.msk [vmem:[#allocation3 + $0x28] sm:$0xf] %vm1109_vm15, %v1708_v30  ;;  %v1694_v39 = vsel %vm4099_vm4, %v1689_v16, %v1693_v18  ;;  %v1649_v41 = vld [vmem:[#allocation2 + $0x38] sm:$0xf]  ;;  %v1715_v23 = vrot.slane %v1713_v7, 5  ;;  %v1449_v36 = vrot.slane %v1448_v12, 4 }
 0x644   : > { %1567 = vrot.lane.b32.xlu2 %v1550_v61, %s3754_s2  ;;  %1775 = vst.msk [vmem:[#allocation3 + $0x1c] sm:$0xf] %vm1109_vm15, %v1694_v39  ;;  %v1738_v47 = vshrl.u32 %v1649_v41, 16  ;;  %v1502_v19 = vld [vmem:[#allocation2 + $0x38] sm:$0xe]  ;;  %v1731_v48 = vrot.slane %v1730_v34, 4 }
 0x645   : > { %1323 = vst.msk [vmem:[#allocation3 + $0x54] sm:$0xf] %vm1109_vm15, %v1315_v38  ;;  %v1650_v31 = vld [vmem:[#allocation2 + $0x3c] sm:$0x1]  ;;  %v1741_v24 = vshll.u32 %v1649_v41, 16  ;;  %v3633_v51 = vld [vmem:[%s4908_s10 + $0x20] sm:$0xff]  ;;  %v1716_v53 = vor.u32 %v1715_v23, %v1712_v46  ;;  %v1454_v60 = vsel %vm4099_vm4, %v1449_v36, %v4337_v29 }
 0x646   : > { %v1938_v13 = vld [vmem:[#allocation2 + $0x40] sm:$0xf]  ;;  %v1740_v54 = vrot.slane %v1738_v47, 4  ;;  %v2020_v55 = vrot.slane %v2019_v15, 4  ;;  %v1503_v58 = vld [vmem:[#allocation2 + $0x3c] sm:$0x1]  ;;  %v1736_v50 = vsel %vm4099_vm4, %v1731_v48, %v1735_v45  ;;  %2405 = vmatpush.bf16.msrb.mxu2 %v3633_v51 }
 0x647   : > { %1904 = vrot.lane.b32.xlu1 %v1883_v2, %s3754_s2  ;;  %v1721_v61 = vrot.slane %v1719_v33, 5  ;;  %v1743_v62 = vrot.slane %v1741_v24, 5  ;;  %v3642_v63 = vld [vmem:[%s4908_s10 + $0x68] sm:$0xff]  ;;  %v3632_v56 = vld [vmem:[%s4908_s10 + $0x18] sm:$0xff]  ;;  %1778 = vst.msk [vmem:[#allocation3 + $0x40] sm:$0xf] %vm1109_vm15, %v1736_v50 }
 0x648   : > { %v1717_v59 = vrot.slane %v1716_v53, 4  ;;  %v1747_v44 = vshll.u32 %v1650_v31, 16  ;;  %v2024_v25 = vrot.slane %v2022_v32, 5  ;;  %v2027_v9 = vshrl.u32 %v1938_v13, 16  ;;  %v1795_v3 = vld [vmem:[#allocation2 + $0x40] sm:$0xe]  ;;  %2433 = vmatpush.bf16.msra.mxu1 %v3642_v63 }
 0x649   : > { %2062 = vrot.lane.b32.xlu0 %v2011_v11, %s3753_s0  ;;  %v2030_v57 = vshll.u32 %v1938_v13, 16  ;;  %v1744_v43 = vor.u32 %v1743_v62, %v1740_v54  ;;  %v3402_v1 = vrot.slane %v1502_v19, 9  ;;  %v1553_v2 = vrot.slane %v1503_v58, 5  ;;  %v1796_v4 = vld [vmem:[#allocation2 + $0x44] sm:$0x1]  ;;  %v3631_v18 = vld [vmem:[%s4908_s10 + $0x10] sm:$0xff] }
 0x64a   : > { %v1722_v5 = vsel %vm4099_vm4, %v1717_v59, %v1721_v61  ;;  %v2025_v22 = vsel %vm4099_vm4, %v2020_v55, %v2024_v25  ;;  %v1652_v32 = vld [vmem:[#allocation2 + $0x44] sm:$0x1]  ;;  %v1651_v6 = vld [vmem:[#allocation2 + $0x40] sm:$0xf]  ;;  %2406 = vmatpush.bf16.msrb.mxu2 %v3632_v56  ;;  %v1749_v12 = vrot.slane %v1747_v44, 5  ;;  %v3410_v14 = vrot.slane %v1795_v3, 9 }
 0x64b   : > { %1777 = vst.msk [vmem:[#allocation3 + $0x34] sm:$0xf] %vm1109_vm15, %v1722_v5  ;;  %v1752_v10 = vshrl.u32 %v1651_v6, 16  ;;  %v1755_v29 = vshll.u32 %v1651_v6, 16  ;;  %v1745_v11 = vrot.slane %v1744_v43, 4  ;;  %v1843_v37 = vrot.slane %v1796_v4, 5 }
 0x64c   : > { %1618 = vrot.lane.b32.xlu2 %v1595_v28, %s3753_s0  ;;  %v2029_v0 = vrot.slane %v2027_v9, 4  ;;  %v2032_v35 = vrot.slane %v2030_v57, 5  ;;  %v3641_v16 = vld [vmem:[%s4908_s10 + $0x60] sm:$0xff]  ;;  %v1761_v21 = vshll.u32 %v1652_v32, 16  ;;  %v1554_v40 = vsel %vm4129_vm11, %v3402_v1, %v1553_v2  ;;  %v3640_v7 = vld [vmem:[%s4908_s10 + $0x58] sm:$0xff]  ;;  %v3630_v33 = vld [vmem:[%s4908_s10 + $0x8] sm:$0xff] }
 0x64d   : > { %v1754_v26 = vrot.slane %v1752_v10, 4  ;;  %v1757_v27 = vrot.slane %v1755_v29, 5  ;;  %v1750_v28 = vsel %vm4099_vm4, %v1745_v11, %v1749_v12  ;;  %2434 = vmatpush.bf16.msra.mxu1 %v3641_v16  ;;  %v1793_v39 = vld [vmem:[#allocation2 + $0x38] sm:$0xe]  ;;  %v1794_v34 = vld [vmem:[#allocation2 + $0x3c] sm:$0x1]  ;;  %v1844_v41 = vsel %vm4129_vm11, %v3410_v14, %v1843_v37 }
 0x64e   : > { %v4404_v52 = vpop.permute.xlu2 %1606  ;;  %1779 = vst.msk [vmem:[#allocation3 + $0x4c] sm:$0xf] %vm1109_vm15, %v1750_v28  ;;  %2407 = vmatpush.bf16.msrb.mxu2 %v3631_v18  ;;  %v1939_v38 = vld [vmem:[#allocation2 + $0x44] sm:$0x1]  ;;  %v2033_v45 = vor.u32 %v2032_v35, %v2029_v0  ;;  %v1763_v46 = vrot.slane %v1761_v21, 5  ;;  %v3409_v19 = vrot.slane %v1793_v39, 9 }
 0x64f   : > { %1467 = vrot.lane.b32.xlu1 %v1440_v8, %s3756_s23  ;;  %v1758_v15 = vor.u32 %v1757_v27, %v1754_v26  ;;  %v1884_v47 = vld [vmem:[#allocation2 + $0x40] sm:$0xf]  ;;  %v1839_v48 = vrot.slane %v1794_v34, 5  ;;  %v2036_v31 = vshll.u32 %v1939_v38, 16  ;;  %v3639_v13 = vld [vmem:[%s4908_s10 + $0x50] sm:$0xff]  ;;  %v3638_v58 = vld [vmem:[%s4908_s10 + $0x48] sm:$0xff] }
 0x650   : > { %v2034_v36 = vrot.slane %v2033_v45, 4  ;;  %v3629_v49 = vld [vmem:[%s4908_s10] sm:$0xff]  ;;  %v1940_v50 = vld [vmem:[#allocation2 + $0x48] sm:$0xf]  ;;  %v1941_v61 = vld [vmem:[#allocation2 + $0x4c] sm:$0x1] }
 0x651   : > { %1469 = vrot.lane.b32.xlu0 %v1454_v60, %s3756_s23  ;;  %v1759_v23 = vrot.slane %v1758_v15, 4  ;;  %2435 = vmatpush.bf16.msra.mxu1 %v3640_v7  ;;  %v1840_v54 = vsel %vm4129_vm11, %v3409_v19, %v1839_v48  ;;  %v2038_v55 = vrot.slane %v2036_v31, 5  ;;  %v2041_v62 = vshrl.u32 %v1940_v50, 16  ;;  %v1885_v57 = vld [vmem:[#allocation2 + $0x48] sm:$0xf]  ;;  %v3637_v1 = vld [vmem:[%s4908_s10 + $0x40] sm:$0xff] }
 0x652   : > { %2408 = vmatpush.bf16.msrb.mxu2 %v3630_v33  ;;  %v2044_v8 = vshll.u32 %v1940_v50, 16  ;;  %v2050_v56 = vshll.u32 %v1941_v61, 16 }
 0x653   : > { %v1764_v24 = vsel %vm4099_vm4, %v1759_v23, %v1763_v46  ;;  %v2039_v63 = vsel %vm4099_vm4, %v2034_v36, %v2038_v55  ;;  %v2043_v59 = vrot.slane %v2041_v62, 4 }
 0x654   : > { %2064 = vrot.lane.b32.xlu2 %v2025_v22, %s3753_s0  ;;  %1780 = vst.msk [vmem:[#allocation3 + $0x58] sm:$0xf] %vm1109_vm15, %v1764_v24  ;;  %v2046_v44 = vrot.slane %v2044_v8, 5  ;;  %v2052_v9 = vrot.slane %v2050_v56, 5 }
 0x655   : > { %2436 = vmatpush.bf16.msra.mxu1 %v3639_v13 }
 0x656   : > { %v1895_v30 = vpop.permute.xlu2 %1894  ;;  %2409 = vmatpush.bf16.msrb.mxu2 %v3629_v49  ;;  %v2047_v25 = vor.u32 %v2046_v44, %v2043_v59 }
 0x657   : > { %1569 = vrot.lane.b32.xlu1 %v1554_v40, %s3754_s2 }
 0x658   : > { %v2048_v60 = vrot.slane %v2047_v25, 4 }
 0x659   : > { %1859 = vrot.lane.b32.xlu0 %v1844_v41, %s3756_s23  ;;  %2437 = vmatpush.bf16.msra.mxu1 %v3638_v58 }
 0x65a   : > { %v2053_v2 = vsel %vm4099_vm4, %v2048_v60, %v2052_v9 }
 0x65c   : > { %1906 = vrot.lane.b32.xlu2 %v1884_v47, %s3754_s2 }
 0x65d   : > { %v1605_v51 = vpop.permute.xlu0 %1604  ;;  %2438 = vmatpush.bf16.msra.mxu1 %v3637_v1 }
 0x65e   : > { %v1560_v53 = vpop.permute.xlu2 %1559  ;;  %1629 = vst.msk [vmem:[#allocation3] sm:$0xf] %vm1628_vm1, %v1605_v51 }
 0x65f   : > { %1857 = vrot.lane.b32.xlu1 %v1840_v54, %s3756_s23 }
 0x661   : > { %2066 = vrot.lane.b32.xlu0 %v2039_v63, %s3753_s0  ;;  %v1558_v42 = vpop.permute.xlu1 %1557 }
 0x664   : > { %2068 = vrot.lane.b32.xlu2 %v2053_v2, %s3753_s0 }
 0x665   : > { %v3421_v29 = vld [vmem:[#allocation3] sm:$0xf] }
 0x666   : > { %v1611_v43 = vpop.permute.xlu2 %1610 }
 0x667   : > { %1908 = vrot.lane.b32.xlu1 %v1885_v57, %s3754_s2 }
 0x669   : > { %v1846_v3 = vpop.permute.xlu1 %1845 }
 0x66a   : > { %1869 = vst.msk [vmem:[#allocation3 + $0x4] sm:$0xf] %vm1479_vm13, %v1846_v3 }
 0x66b   : > { %1918 = vst.msk [vmem:[#allocation3 + $0x4] sm:$0xf] %vm1579_vm14, %v1895_v30  ;;  %v1848_v4 = vpop.permute.xlu0 %1847 }
 0x66c   : > { %1870 = vst.msk [vmem:[#allocation3 + $0x10] sm:$0xf] %vm1479_vm13, %v1848_v4  ;;  %v3648_v4 = vld [vmem:[%s4910_s12 + $0x8] sm:$0xff] }
 0x66d   : > { %2531 = vmatpush.bf16.msra.mxu3 %v3648_v4  ;;  %v3737_v4 = vld [vmem:[%s3878_s3 + $0x8] sm:$0xff] }
 0x66e   : > { %v1899_v5 = vpop.permute.xlu2 %1898 }
 0x671   : > { %v1458_v22 = vpop.permute.xlu1 %1457 }
 0x672   : > { %1481 = vst.msk [vmem:[#allocation3 + $0xc] sm:$0xf] %vm1479_vm13, %v1458_v22 }
 0x673   : > { %1581 = vst.msk [vmem:[#allocation3 + $0xc] sm:$0xf] %vm1579_vm14, %v1558_v42  ;;  %v1609_v32 = vpop.permute.xlu0 %1608 }
 0x674   : > { %1630 = vst.msk [vmem:[#allocation3 + $0xc] sm:$0xf] %vm1628_vm1, %v4404_v52 }
 0x676   : > { %v2057_v17 = vpop.permute.xlu2 %2056 }
 0x679   : > { %v1897_v6 = vpop.permute.xlu1 %1896 }
 0x67a   : > { %1919 = vst.msk [vmem:[#allocation3 + $0x10] sm:$0xf] %vm1579_vm14, %v1897_v6 }
 0x67b   : > { %2079 = vst.msk [vmem:[#allocation3 + $0x10] sm:$0xf] %vm1628_vm1, %v2057_v17  ;;  %v2055_v10 = vpop.permute.xlu0 %2054  ;;  %v3618_v11 = vld [vmem:[#allocation3 + $0x8] sm:$0xf0] }
 0x67c   : > { %2078 = vst.msk [vmem:[#allocation3 + $0x4] sm:$0xf] %vm1628_vm1, %v2055_v10  ;;  %v3422_v12 = vor.u32 %v3618_v11, %v3421_v29 }
 0x67e   : > { %v1564_v14 = vpop.permute.xlu2 %1563  ;;  %2410 = vmatmul.bf16.vlgmr.msrb.gmra.mxu2 %v3422_v12 }
 0x681   : > { %v1460_v37 = vpop.permute.xlu1 %1459 }
 0x682   : > { %1482 = vst.msk [vmem:[#allocation3 + $0x18] sm:$0xf] %vm1479_vm13, %v1460_v37  ;;  %v3423_v0 = vld [vmem:[#allocation3 + $0xc] sm:$0xf0] }
 0x683   : > { %1582 = vst.msk [vmem:[#allocation3 + $0x18] sm:$0xf] %vm1579_vm14, %v1560_v53  ;;  %v1462_v52 = vpop.permute.xlu0 %1461  ;;  %v3617_v35 = vld [vmem:[#allocation3 + $0x4] sm:$0xf] }
 0x684   : > { %1631 = vst.msk [vmem:[#allocation3 + $0x18] sm:$0xf] %vm1628_vm1, %v1609_v32  ;;  %v3426_v16 = vor.u32 %v3617_v35, %v3423_v0  ;;  %v3676_v32 = vld [vmem:[%s4909_s11] ss:$0 sm:$0xff] }
 0x685   : > { %1483 = vst.msk [vmem:[#allocation3 + $0x24] sm:$0xf] %vm1479_vm13, %v1462_v52 }
 0x686   : > { %2439 = vmatmul.bf16.vlgmr.msra.gmra.mxu1 %v3426_v16  ;;  %v1615_v18 = vpop.permute.xlu2 %1614  ;;  %v2469_v17 = vpop.f32.mrf.mxu0 }
 0x689   : > { %v1562_v21 = vpop.permute.xlu1 %1561 }
 0x68a   : > { %1583 = vst.msk [vmem:[#allocation3 + $0x24] sm:$0xf] %vm1579_vm14, %v1562_v21 }
 0x68b   : > { %1632 = vst.msk [vmem:[#allocation3 + $0x24] sm:$0xf] %vm1628_vm1, %v1611_v43  ;;  %v1852_v26 = vpop.permute.xlu0 %1851  ;;  %v3433_v30 = vld [vmem:[#allocation3 + $0x18] sm:$0xf] }
 0x68c   : > { %1872 = vst.msk [vmem:[#allocation3 + $0x28] sm:$0xf] %vm1479_vm13, %v1852_v26 }
 0x68e   : > { %v1903_v27 = vpop.permute.xlu2 %1902  ;;  %v2471_v0 = vpop.f32.mrf.mxu0 }
 0x691   : > { %v1850_v28 = vpop.permute.xlu1 %1849 }
 0x692   : > { %1871 = vst.msk [vmem:[#allocation3 + $0x1c] sm:$0xf] %vm1479_vm13, %v1850_v28  ;;  %v3621_v40 = vld [vmem:[#allocation3 + $0x20] sm:$0xf0] }
 0x693   : > { %1920 = vst.msk [vmem:[#allocation3 + $0x1c] sm:$0xf] %vm1579_vm14, %v1899_v5  ;;  %v1613_v7 = vpop.permute.xlu0 %1612  ;;  %v3434_v33 = vor.u32 %v3621_v40, %v3433_v30  ;;  %v3647_v5 = vld [vmem:[%s4910_s12] sm:$0xff] }
 0x694   : > { %2532 = vmatpush.bf16.msra.mxu3 %v3647_v5 }
 0x695   : > { %2415 = vmatmul.bf16.gmra.mxu2 %v3434_v33 }
 0x696   : > { %v2061_v39 = vpop.permute.xlu2 %2060  ;;  %v2474_v21 = vpop.f32.mrf.mxu0 }
 0x699   : > { %v1901_v15 = vpop.permute.xlu1 %1900 }
 0x69a   : > { %1921 = vst.msk [vmem:[#allocation3 + $0x28] sm:$0xf] %vm1579_vm14, %v1901_v15 }
 0x69b   : > { %2081 = vst.msk [vmem:[#allocation3 + $0x28] sm:$0xf] %vm1628_vm1, %v2061_v39  ;;  %v2059_v34 = vpop.permute.xlu0 %2058 }
 0x69c   : > { %2080 = vst.msk [vmem:[#allocation3 + $0x1c] sm:$0xf] %vm1628_vm1, %v2059_v34 }
 0x69e   : > { %v1568_v47 = vpop.permute.xlu2 %1567  ;;  %v2476_v15 = vpop.f32.mrf.mxu0 }
 0x6a1   : > { %v1464_v38 = vpop.permute.xlu1 %1463 }
 0x6a2   : > { %1484 = vst.msk [vmem:[#allocation3 + $0x30] sm:$0xf] %vm1479_vm13, %v1464_v38  ;;  %v3435_v41 = vld [vmem:[#allocation3 + $0x24] sm:$0xf0] }
 0x6a3   : > { %1584 = vst.msk [vmem:[#allocation3 + $0x30] sm:$0xf] %vm1579_vm14, %v1564_v14  ;;  %v1466_v45 = vpop.permute.xlu0 %1465  ;;  %v3620_v46 = vld [vmem:[#allocation3 + $0x1c] sm:$0xf] }
 0x6a4   : > { %1633 = vst.msk [vmem:[#allocation3 + $0x30] sm:$0xf] %vm1628_vm1, %v1613_v7  ;;  %v3438_v23 = vor.u32 %v3620_v46, %v3435_v41 }
 0x6a5   : > { %1485 = vst.msk [vmem:[#allocation3 + $0x3c] sm:$0xf] %vm1479_vm13, %v1466_v45 }
 0x6a6   : > { %2444 = vmatmul.bf16.gmra.mxu1 %v3438_v23  ;;  %v1619_v31 = vpop.permute.xlu2 %1618  ;;  %v2479_v45 = vpop.f32.mrf.mxu0 }
 0x6a9   : > { %v1566_v19 = vpop.permute.xlu1 %1565 }
 0x6aa   : > { %1585 = vst.msk [vmem:[#allocation3 + $0x3c] sm:$0xf] %vm1579_vm14, %v1566_v19 }
 0x6ab   : > { %1634 = vst.msk [vmem:[#allocation3 + $0x3c] sm:$0xf] %vm1628_vm1, %v1615_v18  ;;  %v1856_v48 = vpop.permute.xlu0 %1855  ;;  %v3445_v36 = vld [vmem:[#allocation3 + $0x30] sm:$0xf] }
 0x6ac   : > { %1874 = vst.msk [vmem:[#allocation3 + $0x40] sm:$0xf] %vm1479_vm13, %v1856_v48 }
 0x6ae   : > { %v2065_v54 = vpop.permute.xlu2 %2064 }
 0x6b1   : > { %v1854_v24 = vpop.permute.xlu1 %1853 }
 0x6b2   : > { %1873 = vst.msk [vmem:[#allocation3 + $0x34] sm:$0xf] %vm1479_vm13, %v1854_v24  ;;  %v3624_v13 = vld [vmem:[#allocation3 + $0x38] sm:$0xf0] }
 0x6b3   : > { %1922 = vst.msk [vmem:[#allocation3 + $0x34] sm:$0xf] %vm1579_vm14, %v1903_v27  ;;  %v1617_v49 = vpop.permute.xlu0 %1616  ;;  %v3446_v51 = vor.u32 %v3624_v13, %v3445_v36  ;;  %v2481_v36 = vpop.f32.mrf.mxu0 }
 0x6b5   : > { %2420 = vmatmul.bf16.gmra.mxu2 %v3446_v51 }
 0x6b6   : > { %v1907_v42 = vpop.permute.xlu2 %1906 }
 0x6b9   : > { %v1905_v53 = vpop.permute.xlu1 %1904 }
 0x6ba   : > { %1923 = vst.msk [vmem:[#allocation3 + $0x40] sm:$0xf] %vm1579_vm14, %v1905_v53 }
 0x6bb   : > { %2083 = vst.msk [vmem:[#allocation3 + $0x40] sm:$0xf] %vm1628_vm1, %v2065_v54  ;;  %v2063_v55 = vpop.permute.xlu0 %2062  ;;  %v2484_v54 = vpop.f32.mrf.mxu0 }
 0x6bc   : > { %2082 = vst.msk [vmem:[#allocation3 + $0x34] sm:$0xf] %vm1628_vm1, %v2063_v55 }
 0x6be   : > { %v2069_v43 = vpop.permute.xlu2 %2068 }
 0x6c1   : > { %v1468_v58 = vpop.permute.xlu1 %1467 }
 0x6c2   : > { %1486 = vst.msk [vmem:[#allocation3 + $0x48] sm:$0xf] %vm1479_vm13, %v1468_v58  ;;  %v3447_v50 = vld [vmem:[#allocation3 + $0x3c] sm:$0xf0] }
 0x6c3   : > { %1586 = vst.msk [vmem:[#allocation3 + $0x48] sm:$0xf] %vm1579_vm14, %v1568_v47  ;;  %v1470_v61 = vpop.permute.xlu0 %1469  ;;  %v3623_v62 = vld [vmem:[#allocation3 + $0x34] sm:$0xf] }
 0x6c4   : > { %1635 = vst.msk [vmem:[#allocation3 + $0x48] sm:$0xf] %vm1628_vm1, %v1617_v49  ;;  %v3450_v8 = vor.u32 %v3623_v62, %v3447_v50 }
 0x6c5   : > { %1487 = vst.msk [vmem:[#allocation3 + $0x54] sm:$0xf] %vm1479_vm13, %v1470_v61 }
 0x6c6   : > { %2449 = vmatmul.bf16.gmra.mxu1 %v3450_v8 }
 0x6c9   : > { %v1570_v63 = vpop.permute.xlu1 %1569 }
 0x6ca   : > { %1587 = vst.msk [vmem:[#allocation3 + $0x54] sm:$0xf] %vm1579_vm14, %v1570_v63 }
 0x6cb   : > { %1636 = vst.msk [vmem:[#allocation3 + $0x54] sm:$0xf] %vm1628_vm1, %v1619_v31  ;;  %v1860_v56 = vpop.permute.xlu0 %1859  ;;  %v3457_v44 = vld [vmem:[#allocation3 + $0x48] sm:$0xf] }
 0x6cc   : > { %1876 = vst.msk [vmem:[#allocation3 + $0x58] sm:$0xf] %vm1479_vm13, %v1860_v56  ;;  %v2486_v56 = vpop.f32.mrf.mxu0 }
 0x6d1   : > { %v1858_v59 = vpop.permute.xlu1 %1857 }
 0x6d2   : > { %1875 = vst.msk [vmem:[#allocation3 + $0x4c] sm:$0xf] %vm1479_vm13, %v1858_v59  ;;  %v3627_v25 = vld [vmem:[#allocation3 + $0x50] sm:$0xf0] }
 0x6d3   : > { %1924 = vst.msk [vmem:[#allocation3 + $0x4c] sm:$0xf] %vm1579_vm14, %v1907_v42  ;;  %v2067_v9 = vpop.permute.xlu0 %2066  ;;  %v3458_v57 = vor.u32 %v3627_v25, %v3457_v44  ;;  %v3677_v25 = vld [vmem:[%s4911_s13] ss:$0 sm:$0xff] }
 0x6d4   : > { %2084 = vst.msk [vmem:[#allocation3 + $0x4c] sm:$0xf] %vm1628_vm1, %v2067_v9 }
 0x6d5   : > { %2425 = vmatmul.bf16.gmra.mxu2 %v3458_v57 }
 0x6d9   : > { %v1909_v60 = vpop.permute.xlu1 %1908 }
 0x6da   : > { %1925 = vst.msk [vmem:[#allocation3 + $0x58] sm:$0xf] %vm1579_vm14, %v1909_v60 }
 0x6db   : > { %2085 = vst.msk [vmem:[#allocation3 + $0x58] sm:$0xf] %vm1628_vm1, %v2069_v43  ;;  %v3626_v1 = vld [vmem:[#allocation3 + $0x4c] sm:$0xf]  ;;  %v3736_v43 = vld [vmem:[%s3878_s3] sm:$0xff] }
 0x6e2   : > { %v3459_v2 = vld [vmem:[#allocation3 + $0x54] sm:$0xf0] }
 0x6e3   : > { %v3462_v3 = vor.u32 %v3626_v1, %v3459_v2 }
 0x6e5   : > { %2454 = vmatmul.bf16.gmra.mxu1 %v3462_v3 }
 0x701   : > { %v2411_v22 = vpop.f32.mrf.mxu2 }
 0x702   : > { %v2412_v10 = vadd.f32 %v3676_v32, %v2411_v22 }
 0x703   : > { %v2440_v6 = vpop.f32.mrf.mxu1 }
 0x704   : > { %v2441_v11 = vadd.f32 %v2440_v6, %v2412_v10  ;;  %v3738_v6 = vld [vmem:[%s3878_s3 + $0x10] sm:$0xff] }
 0x706   : > { %v2470_v52 = vadd.f32 %v2469_v17, %v2441_v11 }
 0x709   : > { %v2413_v29 = vpop.f32.mrf.mxu2 }
 0x70a   : > { %v2414_v12 = vadd.f32 %v3676_v32, %v2413_v29 }
 0x70b   : > { %v2442_v14 = vpop.f32.mrf.mxu1 }
 0x70c   : > { %v2443_v37 = vadd.f32 %v2442_v14, %v2414_v12  ;;  %v3739_v14 = vld [vmem:[%s3878_s3 + $0x18] sm:$0xff] }
 0x70e   : > { %v2472_v35 = vadd.f32 %v2471_v0, %v2443_v37 }
 0x710   : > { %v2489_v16 = vpack.c.bf16 %v2472_v35, %v2470_v52 }
 0x712   : > { %3551 = vmatmul.msk.bf16.vlgmr.msra.gmra.mxu3 %vm639_vm0, %v2489_v16  ;;  %v3740_v16 = vld [vmem:[%s3878_s3 + $0x20] sm:$0xff] }
 0x718   : > { %v2416_v18 = vpop.f32.mrf.mxu2 }
 0x719   : > { %v2417_v28 = vadd.f32 %v3676_v32, %v2416_v18 }
 0x720   : > { %v2418_v27 = vpop.f32.mrf.mxu2 }
 0x721   : > { %v2419_v30 = vadd.f32 %v3676_v32, %v2418_v27 }
 0x723   : > { %v2445_v26 = vpop.f32.mrf.mxu1 }
 0x724   : > { %v2446_v40 = vadd.f32 %v2445_v26, %v2417_v28  ;;  %v3741_v28 = vld [vmem:[%s3878_s3 + $0x28] sm:$0xff] }
 0x726   : > { %v2475_v39 = vadd.f32 %v2474_v21, %v2446_v40 }
 0x72b   : > { %v2447_v7 = vpop.f32.mrf.mxu1 }
 0x72c   : > { %v2448_v33 = vadd.f32 %v2447_v7, %v2419_v30 }
 0x72e   : > { %v2477_v34 = vadd.f32 %v2476_v15, %v2448_v33  ;;  %v3742_v15 = vld [vmem:[%s3878_s3 + $0x30] sm:$0xff] }
 0x730   : > { %v2490_v38 = vpack.c.bf16 %v2477_v34, %v2475_v39 }
 0x732   : > { %3552 = vmatmul.msk.bf16.gmra.mxu3 %vm639_vm0, %v2490_v38 }
 0x738   : > { %v2421_v41 = vpop.f32.mrf.mxu2 }
 0x739   : > { %v2422_v47 = vadd.f32 %v3676_v32, %v2421_v41 }
 0x740   : > { %v2423_v23 = vpop.f32.mrf.mxu2 }
 0x741   : > { %v2424_v19 = vadd.f32 %v3676_v32, %v2423_v23 }
 0x743   : > { %v2450_v46 = vpop.f32.mrf.mxu1 }
 0x744   : > { %v2451_v48 = vadd.f32 %v2450_v46, %v2422_v47 }
 0x746   : > { %v2480_v13 = vadd.f32 %v2479_v45, %v2451_v48 }
 0x74b   : > { %v2452_v31 = vpop.f32.mrf.mxu1 }
 0x74c   : > { %v2453_v24 = vadd.f32 %v2452_v31, %v2424_v19 }
 0x74e   : > { %v2482_v49 = vadd.f32 %v2481_v36, %v2453_v24  ;;  %v3743_v24 = vld [vmem:[%s3878_s3 + $0x38] sm:$0xff] }
 0x750   : > { %v2491_v51 = vpack.c.bf16 %v2482_v49, %v2480_v13 }
 0x752   : > { %3553 = vmatmul.msk.bf16.gmra.mxu3 %vm639_vm0, %v2491_v51 }
 0x758   : > { %v2426_v53 = vpop.f32.mrf.mxu2 }
 0x759   : > { %v2427_v50 = vadd.f32 %v3676_v32, %v2426_v53 }
 0x760   : > { %v2428_v58 = vpop.f32.mrf.mxu2 }
 0x761   : > { %v2429_v61 = vadd.f32 %v3676_v32, %v2428_v58 }
 0x762   : > { %v2455_v55 = vpop.f32.mrf.mxu1 }
 0x763   : > { %v2456_v62 = vadd.f32 %v2455_v55, %v2427_v50 }
 0x765   : > { %v2485_v42 = vadd.f32 %v2484_v54, %v2456_v62 }
 0x76a   : > { %v2457_v8 = vpop.f32.mrf.mxu1 }
 0x76b   : > { %v2458_v63 = vadd.f32 %v2457_v8, %v2429_v61 }
 0x76d   : > { %v2487_v59 = vadd.f32 %v2486_v56, %v2458_v63 }
 0x76f   : > { %v2492_v44 = vpack.c.bf16 %v2487_v59, %v2485_v42 }
 0x771   : > { %3554 = vmatmul.msk.bf16.gmra.mxu3 %vm639_vm0, %v2492_v44 }
 0x795   : > { %v2534_v9 = vpop.f32.mrf.mxu3 }
 0x796   : > { %v2535_v57 = vadd.f32 %v3677_v25, %v2534_v9 }
 0x798   : > { %v4543_v60 = vadd.f32 %v3736_v43, %v2535_v57 }
 0x79a   : > { %v2562_v1 = vsel %vm639_vm0, %v4543_v60, 0.0 }
 0x79b   : > { %2563 = vadd.xlane.f32.xlu1 %v2562_v1 }
 0x79d   : > { %v2536_v2 = vpop.f32.mrf.mxu3 }
 0x79e   : > { %v2537_v3 = vadd.f32 %v3677_v25, %v2536_v2 }
 0x7a0   : > { %v4548_v5 = vadd.f32 %v3737_v4, %v2537_v3 }
 0x7a2   : > { %v2565_v22 = vsel %vm639_vm0, %v4548_v5, 0.0 }
 0x7a3   : > { %2566 = vadd.xlane.f32.xlu0 %v2565_v22 }
 0x7b5   : > { %v2539_v32 = vpop.f32.mrf.mxu3 }
 0x7b6   : > { %v2540_v17 = vadd.f32 %v3677_v25, %v2539_v32 }
 0x7b8   : > { %v4553_v10 = vadd.f32 %v3738_v6, %v2540_v17 }
 0x7ba   : > { %v2568_v29 = vsel %vm639_vm0, %v4553_v10, 0.0 }
 0x7bb   : > { %2569 = vadd.xlane.f32.xlu2 %v2568_v29 }
 0x7bd   : > { %v2541_v11 = vpop.f32.mrf.mxu3 }
 0x7be   : > { %v2542_v12 = vadd.f32 %v3677_v25, %v2541_v11 }
 0x7c0   : > { %v4558_v37 = vadd.f32 %v3739_v14, %v2542_v12 }
 0x7c2   : > { %v2571_v0 = vsel %vm639_vm0, %v4558_v37, 0.0 }
 0x7c3   : > { %2572 = vadd.xlane.f32.xlu1 %v2571_v0 }
 0x7d5   : > { %v2544_v52 = vpop.f32.mrf.mxu3 }
 0x7d6   : > { %v2545_v35 = vadd.f32 %v3677_v25, %v2544_v52 }
 0x7d8   : > { %v4563_v18 = vadd.f32 %v3740_v16, %v2545_v35 }
 0x7da   : > { %v2574_v21 = vsel %vm639_vm0, %v4563_v18, 0.0 }
 0x7db   : > { %2575 = vadd.xlane.f32.xlu0 %v2574_v21 }
 0x7dd   : > { %v2546_v26 = vpop.f32.mrf.mxu3 }
 0x7de   : > { %v2547_v27 = vadd.f32 %v3677_v25, %v2546_v26 }
 0x7e0   : > { %v4568_v30 = vadd.f32 %v3741_v28, %v2547_v27 }
 0x7e2   : > { %v2577_v40 = vsel %vm639_vm0, %v4568_v30, 0.0 }
 0x7e3   : > { %2578 = vadd.xlane.f32.xlu2 %v2577_v40 }
 0x7f4   : > { %v2549_v7 = vpop.f32.mrf.mxu3 }
 0x7f5   : > { %v2550_v33 = vadd.f32 %v3677_v25, %v2549_v7 }
 0x7f7   : > { %v4573_v39 = vadd.f32 %v3742_v15, %v2550_v33 }
 0x7f9   : > { %v2580_v34 = vsel %vm639_vm0, %v4573_v39, 0.0 }
 0x7fa   : > { %2581 = vadd.xlane.f32.xlu2 %v2580_v34 }
 0x7fc   : > { %v2551_v46 = vpop.f32.mrf.mxu3 }
 0x7fd   : > { %v2552_v47 = vadd.f32 %v3677_v25, %v2551_v46 }
 0x7ff   : > { %v4586_v36 = vadd.f32 %v3743_v24, %v2552_v47  ;;  %v3650_v47 = vld [vmem:[%s4914_s16 + $0x8] sm:$0xff] }
 0x800   : > { %2804 = vmatpush.bf16.msra.mxu2 %v3650_v47 }
 0x801   : > { %v2583_v53 = vsel %vm639_vm0, %v4586_v36, 0.0 }
 0x80e   : > { %v2564_v38 = vpop.xlane.xlu1 %2563 }
 0x80f   : > { %v2586_v41 = vmul.f32 %v2564_v38, %v3894_v20 }
 0x811   : > { %v4579_v45 = vsub.f32 %v4543_v60, %v2586_v41 }
 0x813   : > { %v2602_v23 = vmul.f32 %v4579_v45, %v4579_v45 }
 0x815   : > { %v2610_v19 = vsel %vm639_vm0, %v2602_v23, 0.0 }
 0x816   : > { %v2567_v48 = vpop.xlane.xlu0 %2566  ;;  %2611 = vadd.xlane.f32.xlu1 %v2610_v19 }
 0x817   : > { %v2587_v31 = vmul.f32 %v2567_v48, %v3894_v20 }
 0x819   : > { %v4589_v13 = vsub.f32 %v4548_v5, %v2587_v31  ;;  %v3649_v31 = vld [vmem:[%s4914_s16] sm:$0xff] }
 0x81a   : > { %2805 = vmatpush.bf16.msra.mxu2 %v3649_v31 }
 0x81b   : > { %v2603_v49 = vmul.f32 %v4589_v13, %v4589_v13 }
 0x81d   : > { %v2613_v51 = vsel %vm639_vm0, %v2603_v49, 0.0  ;;  %v4649_v49 = vld [vmem:[%s4912_s14] ss:$0 sm:$0xff] }
 0x81e   : > { %2614 = vadd.xlane.f32.xlu0 %v2613_v51  ;;  %2584 = vadd.xlane.f32.xlu1 %v2583_v53 }
 0x82e   : > { %v2570_v54 = vpop.xlane.xlu2 %2569 }
 0x82f   : > { %v2588_v55 = vmul.f32 %v2570_v54, %v3894_v20 }
 0x831   : > { %v4598_v58 = vsub.f32 %v4553_v10, %v2588_v55  ;;  %v4655_v55 = vld [vmem:[%s4913_s15] ss:$0 sm:$0xff] }
 0x833   : > { %v2604_v50 = vmul.f32 %v4598_v58, %v4598_v58 }
 0x835   : > { %v2616_v61 = vsel %vm639_vm0, %v2604_v50, 0.0 }
 0x836   : > { %2617 = vadd.xlane.f32.xlu0 %v2616_v61  ;;  %v2573_v62 = vpop.xlane.xlu1 %2572 }
 0x837   : > { %v2589_v8 = vmul.f32 %v2573_v62, %v3894_v20 }
 0x839   : > { %v4605_v63 = vsub.f32 %v4558_v37, %v2589_v8 }
 0x83b   : > { %v2605_v56 = vmul.f32 %v4605_v63, %v4605_v63 }
 0x83d   : > { %v2619_v42 = vsel %vm639_vm0, %v2605_v56, 0.0 }
 0x83e   : > { %2620 = vadd.xlane.f32.xlu2 %v2619_v42 }
 0x84e   : > { %v2576_v59 = vpop.xlane.xlu0 %2575 }
 0x84f   : > { %v2590_v44 = vmul.f32 %v2576_v59, %v3894_v20 }
 0x851   : > { %v4612_v25 = vsub.f32 %v4563_v18, %v2590_v44 }
 0x853   : > { %v2606_v9 = vmul.f32 %v4612_v25, %v4612_v25 }
 0x855   : > { %v2622_v57 = vsel %vm639_vm0, %v2606_v9, 0.0 }
 0x856   : > { %v2579_v43 = vpop.xlane.xlu2 %2578  ;;  %2623 = vadd.xlane.f32.xlu1 %v2622_v57 }
 0x857   : > { %v2591_v1 = vmul.f32 %v2579_v43, %v3894_v20 }
 0x859   : > { %v4619_v2 = vsub.f32 %v4568_v30, %v2591_v1 }
 0x85b   : > { %v2607_v3 = vmul.f32 %v4619_v2, %v4619_v2 }
 0x85d   : > { %v2625_v4 = vsel %vm639_vm0, %v2607_v3, 0.0 }
 0x85e   : > { %2626 = vadd.xlane.f32.xlu0 %v2625_v4 }
 0x86d   : > { %v2582_v22 = vpop.xlane.xlu2 %2581 }
 0x86e   : > { %v2592_v32 = vmul.f32 %v2582_v22, %v3894_v20 }
 0x870   : > { %v4626_v17 = vsub.f32 %v4573_v39, %v2592_v32 }
 0x872   : > { %v2608_v6 = vmul.f32 %v4626_v17, %v4626_v17 }
 0x874   : > { %v2628_v29 = vsel %vm639_vm0, %v2608_v6, 0.0 }
 0x875   : > { %2629 = vadd.xlane.f32.xlu2 %v2628_v29 }
 0x889   : > { %v2612_v11 = vpop.xlane.xlu1 %2611 }
 0x88a   : > { %v2634_v12 = vmul.f32 %v2612_v11, %v3894_v20 }
 0x88c   : > { %v2642_v14 = vadd.f32 1e-05, %v2634_v12 }
 0x88e   : > { %3704 = vrsqrt.f32 %v2642_v14  ;;  %vm2656_vm2 = vweird.f32 %v2642_v14 }
 0x891   : > { %v2615_v0 = vpop.xlane.xlu0 %2614  ;;  %v2585_v52 = vpop.xlane.xlu1 %2584 }
 0x892   : > { %v2635_v35 = vmul.f32 %v2615_v0, %v3894_v20  ;;  %v2593_v16 = vmul.f32 %v2585_v52, %v3894_v20 }
 0x894   : > { %v3705_v21 = vpop.eup %3704  ;;  %v2643_v26 = vadd.f32 1e-05, %v2635_v35  ;;  %v4635_v27 = vsub.f32 %v4586_v36, %v2593_v16 }
 0x895   : > { %v2651_v28 = vmul.f32 %v3705_v21, %v2642_v14  ;;  %vm2657_vm15 = vweird.f32 %v3705_v21 }
 0x896   : > { %3706 = vrsqrt.f32 %v2643_v26  ;;  %v2609_v40 = vmul.f32 %v4635_v27, %v4635_v27  ;;  %vm2658_vm3 = vmor %vm2656_vm2, %vm2657_vm15  ;;  %vm2666_vm5 = vweird.f32 %v2643_v26 }
 0x897   : > { %v2652_v7 = vmul.f32 %v3705_v21, %v2651_v28 }
 0x898   : > { %v2631_v33 = vsel %vm639_vm0, %v2609_v40, 0.0 }
 0x899   : > { %v2653_v15 = vmul.f32 0.5, %v2652_v7  ;;  %2632 = vadd.xlane.f32.xlu1 %v2631_v33 }
 0x89b   : > { %v2654_v34 = vsub.f32 1.5, %v2653_v15 }
 0x89c   : > { %v3707_v38 = vpop.eup %3706 }
 0x89d   : > { %v2655_v41 = vmul.f32 %v3705_v21, %v2654_v34  ;;  %v2661_v46 = vmul.f32 %v3707_v38, %v2643_v26  ;;  %vm2667_vm4 = vweird.f32 %v3707_v38 }
 0x89e   : > { %vm2668_vm6 = vmor %vm2666_vm5, %vm2667_vm4 }
 0x89f   : > { %v2662_v23 = vmul.f32 %v3707_v38, %v2661_v46  ;;  %v2659_v19 = vsel %vm2658_vm3, %v3705_v21, %v2655_v41 }
 0x8a0   : > { %v2730_v51 = vmul.f32 %v2659_v19, %v4579_v45 }
 0x8a1   : > { %v2663_v48 = vmul.f32 0.5, %v2662_v23 }
 0x8a2   : > { %v2742_v50 = vmul.f32 %v4649_v49, %v2730_v51 }
 0x8a3   : > { %v2664_v24 = vsub.f32 1.5, %v2663_v48 }
 0x8a4   : > { %v2754_v45 = vadd.f32 %v4655_v55, %v2742_v50 }
 0x8a5   : > { %v2665_v53 = vmul.f32 %v3707_v38, %v2664_v24 }
 0x8a7   : > { %v2669_v54 = vsel %vm2668_vm6, %v3707_v38, %v2665_v53 }
 0x8a8   : > { %v2731_v61 = vmul.f32 %v2669_v54, %v4589_v13 }
 0x8a9   : > { %v2618_v62 = vpop.xlane.xlu0 %2617 }
 0x8aa   : > { %v2743_v8 = vmul.f32 %v4649_v49, %v2731_v61  ;;  %v2636_v56 = vmul.f32 %v2618_v62, %v3894_v20 }
 0x8ac   : > { %v2755_v42 = vadd.f32 %v4655_v55, %v2743_v8  ;;  %v2644_v59 = vadd.f32 1e-05, %v2636_v56 }
 0x8ae   : > { %3708 = vrsqrt.f32 %v2644_v59  ;;  %v2762_v44 = vpack.c.bf16 %v2755_v42, %v2754_v45  ;;  %vm2676_vm8 = vweird.f32 %v2644_v59 }
 0x8b0   : > { %3563 = vmatmul.msk.bf16.vlgmr.msra.gmra.mxu2 %vm639_vm0, %v2762_v44 }
 0x8b1   : > { %v2621_v9 = vpop.xlane.xlu2 %2620 }
 0x8b2   : > { %v2637_v57 = vmul.f32 %v2621_v9, %v3894_v20 }
 0x8b4   : > { %v3709_v43 = vpop.eup %3708  ;;  %v2645_v1 = vadd.f32 1e-05, %v2637_v57 }
 0x8b5   : > { %v2671_v13 = vmul.f32 %v3709_v43, %v2644_v59  ;;  %vm2677_vm7 = vweird.f32 %v3709_v43 }
 0x8b6   : > { %3710 = vrsqrt.f32 %v2645_v1  ;;  %vm2678_vm9 = vmor %vm2676_vm8, %vm2677_vm7  ;;  %vm2686_vm11 = vweird.f32 %v2645_v1 }
 0x8b7   : > { %v2672_v3 = vmul.f32 %v3709_v43, %v2671_v13 }
 0x8b9   : > { %v2673_v4 = vmul.f32 0.5, %v2672_v3 }
 0x8bb   : > { %v2674_v22 = vsub.f32 1.5, %v2673_v4 }
 0x8bc   : > { %v3711_v32 = vpop.eup %3710 }
 0x8bd   : > { %v2675_v6 = vmul.f32 %v3709_v43, %v2674_v22  ;;  %v2681_v29 = vmul.f32 %v3711_v32, %v2645_v1  ;;  %vm2687_vm10 = vweird.f32 %v3711_v32 }
 0x8be   : > { %vm2688_vm12 = vmor %vm2686_vm11, %vm2687_vm10 }
 0x8bf   : > { %v2682_v11 = vmul.f32 %v3711_v32, %v2681_v29  ;;  %v2679_v12 = vsel %vm2678_vm9, %v3709_v43, %v2675_v6 }
 0x8c0   : > { %v2732_v52 = vmul.f32 %v2679_v12, %v4598_v58 }
 0x8c1   : > { %v2683_v14 = vmul.f32 0.5, %v2682_v11 }
 0x8c2   : > { %v2744_v26 = vmul.f32 %v4649_v49, %v2732_v52 }
 0x8c3   : > { %v2684_v0 = vsub.f32 1.5, %v2683_v14 }
 0x8c4   : > { %v2756_v15 = vadd.f32 %v4655_v55, %v2744_v26 }
 0x8c5   : > { %v2685_v35 = vmul.f32 %v3711_v32, %v2684_v0 }
 0x8c7   : > { %v2689_v16 = vsel %vm2688_vm12, %v3711_v32, %v2685_v35 }
 0x8c8   : > { %v2733_v21 = vmul.f32 %v2689_v16, %v4605_v63 }
 0x8c9   : > { %v2624_v28 = vpop.xlane.xlu1 %2623 }
 0x8ca   : > { %v2638_v40 = vmul.f32 %v2624_v28, %v3894_v20  ;;  %v2745_v7 = vmul.f32 %v4649_v49, %v2733_v21 }
 0x8cc   : > { %v2646_v33 = vadd.f32 1e-05, %v2638_v40  ;;  %v2757_v34 = vadd.f32 %v4655_v55, %v2745_v7 }
 0x8ce   : > { %3712 = vrsqrt.f32 %v2646_v33  ;;  %v2763_v58 = vpack.c.bf16 %v2757_v34, %v2756_v15  ;;  %vm2696_vm14 = vweird.f32 %v2646_v33 }
 0x8d0   : > { %3564 = vmatmul.msk.bf16.gmra.mxu2 %vm639_vm0, %v2763_v58 }
 0x8d1   : > { %v2627_v38 = vpop.xlane.xlu0 %2626 }
 0x8d2   : > { %v2639_v41 = vmul.f32 %v2627_v38, %v3894_v20 }
 0x8d4   : > { %v3713_v63 = vpop.eup %3712  ;;  %v2647_v46 = vadd.f32 1e-05, %v2639_v41 }
 0x8d5   : > { %v2691_v23 = vmul.f32 %v3713_v63, %v2646_v33  ;;  %vm2697_vm13 = vweird.f32 %v3713_v63 }
 0x8d6   : > { %3714 = vrsqrt.f32 %v2647_v46  ;;  %vm2698_vm1 = vmor %vm2696_vm14, %vm2697_vm13  ;;  %vm2706_vm2 = vweird.f32 %v2647_v46 }
 0x8d7   : > { %v2692_v47 = vmul.f32 %v3713_v63, %v2691_v23 }
 0x8d9   : > { %v2693_v19 = vmul.f32 0.5, %v2692_v47 }
 0x8db   : > { %v2694_v48 = vsub.f32 1.5, %v2693_v19 }
 0x8dc   : > { %v3715_v31 = vpop.eup %3714 }
 0x8dd   : > { %v2695_v24 = vmul.f32 %v3713_v63, %v2694_v48  ;;  %v2701_v51 = vmul.f32 %v3715_v31, %v2647_v46  ;;  %vm2707_vm15 = vweird.f32 %v3715_v31 }
 0x8de   : > { %vm2708_vm3 = vmor %vm2706_vm2, %vm2707_vm15 }
 0x8df   : > { %v2702_v53 = vmul.f32 %v3715_v31, %v2701_v51  ;;  %v2699_v54 = vsel %vm2698_vm1, %v3713_v63, %v2695_v24 }
 0x8e0   : > { %v2734_v62 = vmul.f32 %v2699_v54, %v4612_v25 }
 0x8e1   : > { %v2703_v50 = vmul.f32 0.5, %v2702_v53 }
 0x8e2   : > { %v2746_v42 = vmul.f32 %v4649_v49, %v2734_v62 }
 0x8e3   : > { %v2704_v61 = vsub.f32 1.5, %v2703_v50 }
 0x8e4   : > { %v2758_v44 = vadd.f32 %v4655_v55, %v2746_v42 }
 0x8e5   : > { %v2705_v8 = vmul.f32 %v3715_v31, %v2704_v61 }
 0x8e7   : > { %v2709_v56 = vsel %vm2708_vm3, %v3715_v31, %v2705_v8 }
 0x8e8   : > { %v2735_v45 = vmul.f32 %v2709_v56, %v4619_v2  ;;  %v2630_v43 = vpop.xlane.xlu2 %2629 }
 0x8e9   : > { %v2640_v25 = vmul.f32 %v2630_v43, %v3894_v20 }
 0x8ea   : > { %v2747_v59 = vmul.f32 %v4649_v49, %v2735_v45 }
 0x8eb   : > { %v2648_v1 = vadd.f32 1e-05, %v2640_v25 }
 0x8ec   : > { %v2759_v9 = vadd.f32 %v4655_v55, %v2747_v59 }
 0x8ed   : > { %3716 = vrsqrt.f32 %v2648_v1  ;;  %vm2716_vm5 = vweird.f32 %v2648_v1 }
 0x8ee   : > { %v2764_v57 = vpack.c.bf16 %v2759_v9, %v2758_v44 }
 0x8f0   : > { %3565 = vmatmul.msk.bf16.gmra.mxu2 %vm639_vm0, %v2764_v57 }
 0x8f3   : > { %v3717_v13 = vpop.eup %3716 }
 0x8f4   : > { %v2711_v3 = vmul.f32 %v3717_v13, %v2648_v1  ;;  %vm2717_vm4 = vweird.f32 %v3717_v13 }
 0x8f5   : > { %vm2718_vm6 = vmor %vm2716_vm5, %vm2717_vm4 }
 0x8f6   : > { %v2712_v4 = vmul.f32 %v3717_v13, %v2711_v3 }
 0x8f8   : > { %v2713_v6 = vmul.f32 0.5, %v2712_v4 }
 0x8fa   : > { %v2714_v29 = vsub.f32 1.5, %v2713_v6 }
 0x8fc   : > { %v2715_v12 = vmul.f32 %v3717_v13, %v2714_v29 }
 0x8fe   : > { %v2719_v52 = vsel %vm2718_vm6, %v3717_v13, %v2715_v12  ;;  %v3658_v12 = vld [vmem:[%s4916_s18 + $0x38] sm:$0xff] }
 0x8ff   : > { %v2736_v21 = vmul.f32 %v2719_v52, %v4626_v17  ;;  %v4693_v17 = vld [vmem:[%s4915_s17] ss:$0 sm:$0xff]  ;;  %3251 = vmatpush.bf16.msrb.mxu1 %v3658_v12 }
 0x901   : > { %v2748_v40 = vmul.f32 %v4649_v49, %v2736_v21 }
 0x903   : > { %v2760_v33 = vadd.f32 %v4655_v55, %v2748_v40 }
 0x90c   : > { %v2633_v2 = vpop.xlane.xlu1 %2632 }
 0x90d   : > { %v2641_v22 = vmul.f32 %v2633_v2, %v3894_v20 }
 0x90f   : > { %v2649_v32 = vadd.f32 1e-05, %v2641_v22 }
 0x911   : > { %3718 = vrsqrt.f32 %v2649_v32  ;;  %vm2726_vm8 = vweird.f32 %v2649_v32 }
 0x917   : > { %v3719_v11 = vpop.eup %3718 }
 0x918   : > { %v2721_v14 = vmul.f32 %v3719_v11, %v2649_v32  ;;  %vm2727_vm7 = vweird.f32 %v3719_v11 }
 0x919   : > { %vm2728_vm9 = vmor %vm2726_vm8, %vm2727_vm7 }
 0x91a   : > { %v2722_v0 = vmul.f32 %v3719_v11, %v2721_v14 }
 0x91c   : > { %v2723_v35 = vmul.f32 0.5, %v2722_v0 }
 0x91e   : > { %v2724_v16 = vsub.f32 1.5, %v2723_v35  ;;  %v3657_v35 = vld [vmem:[%s4916_s18 + $0x30] sm:$0xff] }
 0x91f   : > { %3252 = vmatpush.bf16.msrb.mxu1 %v3657_v35 }
 0x920   : > { %v2725_v26 = vmul.f32 %v3719_v11, %v2724_v16 }
 0x922   : > { %v2729_v20 = vsel %vm2728_vm9, %v3719_v11, %v2725_v26 }
 0x923   : > { %v2737_v28 = vmul.f32 %v2729_v20, %v4635_v27 }
 0x925   : > { %v2749_v7 = vmul.f32 %v4649_v49, %v2737_v28 }
 0x927   : > { %v2761_v15 = vadd.f32 %v4655_v55, %v2749_v7  ;;  %v3656_v7 = vld [vmem:[%s4916_s18 + $0x28] sm:$0xff] }
 0x928   : > { %3253 = vmatpush.bf16.msrb.mxu1 %v3656_v7 }
 0x929   : > { %v2765_v34 = vpack.c.bf16 %v2761_v15, %v2760_v33 }
 0x92b   : > { %3566 = vmatmul.msk.bf16.gmra.mxu2 %vm639_vm0, %v2765_v34 }
 0x933   : > { %v2807_v58 = vpop.f32.mrf.mxu2 }
 0x934   : > { %v4696_v38 = vadd.f32 %v4693_v17, %v2807_v58 }
 0x936   : > { %v4699_v27 = vmul.f32 0.70710677, %v4696_v38 }
 0x938   : > { %v2843_v49 = vmul.f32 %v4699_v27, %v4699_v27 }
 0x93a   : > { %v2844_v41 = vmin.f32 %v2843_v49, 16.0 }
 0x93b   : > { %v2809_v31 = vpop.f32.mrf.mxu2 }
 0x93c   : > { %v2856_v55 = vmul.f32 3.8918573e-05, %v2844_v41  ;;  %v2845_v47 = vmul.f32 2.1237322e-06, %v2844_v41  ;;  %v4704_v53 = vadd.f32 %v4693_v17, %v2809_v31 }
 0x93e   : > { %v2857_v63 = vadd.f32 0.001143296, %v2856_v55  ;;  %v2846_v24 = vadd.f32 0.00028619796, %v2845_v47  ;;  %v4707_v50 = vmul.f32 0.70710677, %v4704_v53 }
 0x93f   : > { %v3655_v55 = vld [vmem:[%s4916_s18 + $0x20] sm:$0xff] }
 0x940   : > { %v2858_v46 = vmul.f32 %v2857_v63, %v2844_v41  ;;  %v2847_v61 = vmul.f32 %v2846_v24, %v2844_v41  ;;  %v2883_v8 = vmul.f32 %v4707_v50, %v4707_v50  ;;  %3254 = vmatpush.bf16.msrb.mxu1 %v3655_v55  ;;  %v3654_v24 = vld [vmem:[%s4916_s18 + $0x18] sm:$0xff] }
 0x942   : > { %v2859_v23 = vadd.f32 0.014752088, %v2858_v46  ;;  %v2884_v45 = vmin.f32 %v2883_v8, 16.0  ;;  %v2848_v42 = vadd.f32 0.0036580483, %v2847_v61 }
 0x944   : > { %v2860_v19 = vmul.f32 %v2859_v23, %v2844_v41  ;;  %v2885_v59 = vmul.f32 2.1237322e-06, %v2884_v45  ;;  %v2896_v44 = vmul.f32 3.8918573e-05, %v2884_v45  ;;  %v2849_v43 = vmul.f32 %v2848_v42, %v2844_v41  ;;  %3255 = vmatpush.bf16.msrb.mxu1 %v3654_v24 }
 0x946   : > { %v2861_v48 = vadd.f32 0.112945676, %v2860_v19  ;;  %v2886_v9 = vadd.f32 0.00028619796, %v2885_v59  ;;  %v2897_v57 = vadd.f32 0.001143296, %v2896_v44 }
 0x947   : > { %v2850_v4 = vadd.f32 0.05243302, %v2849_v43  ;;  %v3653_v44 = vld [vmem:[%s4916_s18 + $0x10] sm:$0xff] }
 0x948   : > { %v2862_v51 = vmul.f32 %v2861_v48, %v2844_v41  ;;  %v2887_v25 = vmul.f32 %v2886_v9, %v2884_v45  ;;  %v2898_v1 = vmul.f32 %v2897_v57, %v2884_v45  ;;  %3256 = vmatpush.bf16.msrb.mxu1 %v3653_v44 }
 0x949   : > { %v2851_v29 = vmul.f32 %v2850_v4, %v2844_v41 }
 0x94a   : > { %v2863_v54 = vadd.f32 0.4994258, %v2862_v51  ;;  %v2899_v3 = vadd.f32 0.014752088, %v2898_v1  ;;  %v2888_v2 = vadd.f32 0.0036580483, %v2887_v25 }
 0x94b   : > { %v2852_v21 = vadd.f32 0.18741608, %v2851_v29 }
 0x94c   : > { %v2864_v62 = vmul.f32 %v2863_v54, %v2844_v41  ;;  %v2900_v32 = vmul.f32 %v2899_v3, %v2884_v45  ;;  %v2889_v11 = vmul.f32 %v2888_v2, %v2884_v45  ;;  %v3652_v3 = vld [vmem:[%s4916_s18 + $0x8] sm:$0xff] }
 0x94d   : > { %v2853_v33 = vmul.f32 %v2852_v21, %v2844_v41  ;;  %3257 = vmatpush.bf16.msrb.mxu1 %v3652_v3  ;;  %v2828_v21 = vmul.f32 0.5, %v4704_v53 }
 0x94e   : > { %v2865_v56 = vadd.f32 1.0, %v2864_v62  ;;  %v2901_v6 = vadd.f32 0.112945676, %v2900_v32  ;;  %v2890_v26 = vadd.f32 0.05243302, %v2889_v11 }
 0x94f   : > { %v2854_v47 = vadd.f32 1.1283791, %v2853_v33 }
 0x950   : > { %3720 = vrcp.f32 %v2865_v56  ;;  %v2902_v0 = vmul.f32 %v2901_v6, %v2884_v45  ;;  %v2891_v15 = vmul.f32 %v2890_v26, %v2884_v45  ;;  %v2877_v49 = vand.u32 2147483648, %v2865_v56 }
 0x951   : > { %vm2871_vm11 = vweird.f32 %v2865_v56  ;;  %v2875_v63 = vand.u32 2147483647, %v2865_v56  ;;  %v2855_v8 = vmul.f32 %v2854_v47, %v4699_v27 }
 0x952   : > { %v2903_v16 = vadd.f32 0.4994258, %v2902_v0  ;;  %v2892_v23 = vadd.f32 0.18741608, %v2891_v15  ;;  %v2878_v48 = vor.u32 1.1754944e-38, %v2877_v49 }
 0x953   : > { %v2812_v52 = vpop.f32.mrf.mxu2  ;;  %vm2876_vm13 = vcmp.eq.f32.partialorder %v2875_v63, 8.507059e+37 }
 0x954   : > { %v2904_v28 = vmul.f32 %v2903_v16, %v2884_v45  ;;  %v4721_v58 = vadd.f32 %v4693_v17, %v2812_v52  ;;  %v2893_v61 = vmul.f32 %v2892_v23, %v2884_v45  ;;  %v2827_v16 = vmul.f32 0.5, %v4696_v38 }
 0x956   : > { %v3721_v13 = vpop.eup %3720  ;;  %v2905_v40 = vadd.f32 1.0, %v2904_v28  ;;  %v4727_v19 = vmul.f32 0.70710677, %v4721_v58  ;;  %v2894_v43 = vadd.f32 1.1283791, %v2893_v61 }
 0x957   : > { %v2867_v22 = vmul.f32 %v3721_v13, %v2865_v56  ;;  %vm2872_vm10 = vweird.f32 %v3721_v13 }
 0x958   : > { %3722 = vrcp.f32 %v2905_v40  ;;  %vm2873_vm12 = vmor %vm2871_vm11, %vm2872_vm10  ;;  %v2923_v56 = vmul.f32 %v4727_v19, %v4727_v19  ;;  %v2917_v57 = vand.u32 2147483648, %v2905_v40  ;;  %v2915_v45 = vand.u32 2147483647, %v2905_v40 }
 0x959   : > { %v2868_v14 = vsub.f32 1.0, %v2867_v22  ;;  %vm2911_vm1 = vweird.f32 %v2905_v40  ;;  %v2895_v22 = vmul.f32 %v2894_v43, %v4707_v50 }
 0x95a   : > { %v4744_v1 = vmin.f32 %v2923_v56, 16.0  ;;  %v2918_v4 = vor.u32 1.1754944e-38, %v2917_v57  ;;  %vm2916_vm2 = vcmp.eq.f32.partialorder %v2915_v45, 8.507059e+37 }
 0x95b   : > { %v2869_v20 = vmul.f32 %v3721_v13, %v2868_v14  ;;  %v2814_v46 = vpop.f32.mrf.mxu2  ;;  %v3651_v14 = vld [vmem:[%s4916_s18] sm:$0xff] }
 0x95c   : > { %v4730_v31 = vadd.f32 %v4693_v17, %v2814_v46  ;;  %v2925_v29 = vmul.f32 2.1237322e-06, %v4744_v1  ;;  %v2936_v35 = vmul.f32 3.8918573e-05, %v4744_v1  ;;  %3258 = vmatpush.bf16.msrb.mxu1 %v3651_v14 }
 0x95d   : > { %v2870_v34 = vadd.f32 %v3721_v13, %v2869_v20 }
 0x95e   : > { %v3723_v51 = vpop.eup %3722  ;;  %v4739_v59 = vmul.f32 0.70710677, %v4730_v31  ;;  %v2926_v50 = vadd.f32 0.00028619796, %v2925_v29  ;;  %v2937_v28 = vadd.f32 0.001143296, %v2936_v35 }
 0x95f   : > { %v2874_v41 = vsel %vm2873_vm12, %v3721_v13, %v2870_v34  ;;  %v2907_v62 = vmul.f32 %v3723_v51, %v2905_v40  ;;  %vm2912_vm14 = vweird.f32 %v3723_v51 }
 0x960   : > { %v2879_v54 = vsel %vm2876_vm13, %v2878_v48, %v2874_v41  ;;  %v2963_v13 = vmul.f32 %v4739_v59, %v4739_v59  ;;  %vm2913_vm15 = vmor %vm2911_vm1, %vm2912_vm14  ;;  %v2938_v33 = vmul.f32 %v2937_v28, %v4744_v1  ;;  %v2927_v15 = vmul.f32 %v2926_v50, %v4744_v1 }
 0x961   : > { %v2908_v42 = vsub.f32 1.0, %v2907_v62  ;;  %v2880_v9 = vmul.f32 %v2879_v54, %v2855_v8 }
 0x962   : > { %v4753_v12 = vmin.f32 %v2963_v13, 16.0  ;;  %v2939_v55 = vadd.f32 0.014752088, %v2938_v33  ;;  %v2928_v63 = vadd.f32 0.0036580483, %v2927_v15 }
 0x963   : > { %v2909_v25 = vmul.f32 %v3723_v51, %v2908_v42  ;;  %v3567_v2 = vclamps-f32 %v2880_v9, 1.0 }
 0x964   : > { %v2965_v20 = vmul.f32 2.1237322e-06, %v4753_v12  ;;  %v2976_v38 = vmul.f32 3.8918573e-05, %v4753_v12  ;;  %v2940_v53 = vmul.f32 %v2939_v55, %v4744_v1  ;;  %v2929_v48 = vmul.f32 %v2928_v63, %v4744_v1 }
 0x965   : > { %v2910_v27 = vadd.f32 %v3723_v51, %v2909_v25  ;;  %v3163_v0 = vadd.f32 1.0, %v3567_v2 }
 0x966   : > { %v2966_v34 = vadd.f32 0.00028619796, %v2965_v20  ;;  %v2977_v23 = vadd.f32 0.001143296, %v2976_v38  ;;  %v2941_v47 = vadd.f32 0.112945676, %v2940_v53 }
 0x967   : > { %v2914_v32 = vsel %vm2913_vm15, %v3723_v51, %v2910_v27  ;;  %v3171_v40 = vmul.f32 %v3163_v0, %v2827_v16  ;;  %v2930_v8 = vadd.f32 0.05243302, %v2929_v48 }
 0x968   : > { %v2919_v6 = vsel %vm2916_vm2, %v2918_v4, %v2914_v32  ;;  %v2967_v46 = vmul.f32 %v2966_v34, %v4753_v12  ;;  %v2978_v41 = vmul.f32 %v2977_v23, %v4753_v12  ;;  %v2942_v24 = vmul.f32 %v2941_v47, %v4744_v1 }
 0x969   : > { %v2920_v11 = vmul.f32 %v2919_v6, %v2895_v22  ;;  %v2931_v25 = vmul.f32 %v2930_v8, %v4744_v1 }
 0x96a   : > { %v2968_v51 = vadd.f32 0.0036580483, %v2967_v46  ;;  %v2979_v54 = vadd.f32 0.014752088, %v2978_v41  ;;  %v2943_v61 = vadd.f32 0.4994258, %v2942_v24 }
 0x96b   : > { %v3568_v52 = vclamps-f32 %v2920_v11, 1.0  ;;  %v2932_v3 = vadd.f32 0.18741608, %v2931_v25 }
 0x96c   : > { %v2980_v62 = vmul.f32 %v2979_v54, %v4753_v12  ;;  %v2944_v56 = vmul.f32 %v2943_v61, %v4744_v1  ;;  %v2969_v42 = vmul.f32 %v2968_v51, %v4753_v12 }
 0x96d   : > { %v3164_v26 = vadd.f32 1.0, %v3568_v52  ;;  %v2933_v29 = vmul.f32 %v2932_v3, %v4744_v1 }
 0x96e   : > { %v2981_v44 = vadd.f32 0.112945676, %v2980_v62  ;;  %v2945_v9 = vadd.f32 1.0, %v2944_v56  ;;  %v2970_v45 = vadd.f32 0.05243302, %v2969_v42 }
 0x96f   : > { %v3172_v7 = vmul.f32 %v3164_v26, %v2828_v21  ;;  %v2934_v21 = vadd.f32 1.1283791, %v2933_v29 }
 0x970   : > { %v2982_v43 = vmul.f32 %v2981_v44, %v4753_v12  ;;  %3724 = vrcp.f32 %v2945_v9  ;;  %v2971_v4 = vmul.f32 %v2970_v45, %v4753_v12  ;;  %v2957_v35 = vand.u32 2147483648, %v2945_v9 }
 0x971   : > { %v3179_v49 = vpack.c.bf16 %v3172_v7, %v3171_v40  ;;  %v2955_v50 = vand.u32 2147483647, %v2945_v9  ;;  %vm2951_vm4 = vweird.f32 %v2945_v9  ;;  %v2935_v34 = vmul.f32 %v2934_v21, %v4727_v19 }
 0x972   : > { %v2983_v27 = vadd.f32 0.4994258, %v2982_v43  ;;  %v2972_v11 = vadd.f32 0.18741608, %v2971_v4  ;;  %v2958_v7 = vor.u32 1.1754944e-38, %v2957_v35  ;;  %v2830_v43 = vmul.f32 0.5, %v4730_v31 }
 0x973   : > { %3259 = vmatmul.bf16.vlgmr.msrb.gmra.mxu1 %v3179_v49  ;;  %v2817_v57 = vpop.f32.mrf.mxu2  ;;  %vm2956_vm6 = vcmp.eq.f32.partialorder %v2955_v50, 8.507059e+37 }
 0x974   : > { %v2984_v13 = vmul.f32 %v2983_v27, %v4753_v12  ;;  %v4778_v2 = vadd.f32 %v4693_v17, %v2817_v57  ;;  %v2973_v28 = vmul.f32 %v2972_v11, %v4753_v12  ;;  %v2829_v57 = vmul.f32 0.5, %v4721_v58 }
 0x976   : > { %v2985_v22 = vadd.f32 1.0, %v2984_v13  ;;  %v3725_v32 = vpop.eup %3724  ;;  %v4782_v14 = vmul.f32 0.70710677, %v4778_v2  ;;  %v2974_v63 = vadd.f32 1.1283791, %v2973_v28 }
 0x977   : > { %v2947_v6 = vmul.f32 %v3725_v32, %v2945_v9  ;;  %vm2952_vm3 = vweird.f32 %v3725_v32 }
 0x978   : > { %3726 = vrcp.f32 %v2985_v22  ;;  %v3003_v1 = vmul.f32 %v4782_v14, %v4782_v14  ;;  %vm2953_vm5 = vmor %vm2951_vm4, %vm2952_vm3  ;;  %v2997_v12 = vand.u32 2147483648, %v2985_v22  ;;  %v2995_v47 = vand.u32 2147483647, %v2985_v22 }
 0x979   : > { %v2948_v52 = vsub.f32 1.0, %v2947_v6  ;;  %vm2991_vm8 = vweird.f32 %v2985_v22  ;;  %v2975_v51 = vmul.f32 %v2974_v63, %v4739_v59 }
 0x97a   : > { %v4794_v53 = vmin.f32 %v3003_v1, 16.0  ;;  %v2998_v24 = vor.u32 1.1754944e-38, %v2997_v12  ;;  %vm2996_vm10 = vcmp.eq.f32.partialorder %v2995_v47, 8.507059e+37 }
 0x97b   : > { %v2819_v0 = vpop.f32.mrf.mxu2  ;;  %v2949_v16 = vmul.f32 %v3725_v32, %v2948_v52 }
 0x97c   : > { %v4785_v26 = vadd.f32 %v4693_v17, %v2819_v0  ;;  %v3005_v19 = vmul.f32 2.1237322e-06, %v4794_v53  ;;  %v3016_v27 = vmul.f32 3.8918573e-05, %v4794_v53 }
 0x97d   : > { %v2950_v40 = vadd.f32 %v3725_v32, %v2949_v16 }
 0x97e   : > { %v3727_v20 = vpop.eup %3726  ;;  %v4792_v49 = vmul.f32 0.70710677, %v4785_v26  ;;  %v3006_v42 = vadd.f32 0.00028619796, %v3005_v19  ;;  %v3017_v4 = vadd.f32 0.001143296, %v3016_v27 }
 0x97f   : > { %v2987_v33 = vmul.f32 %v3727_v20, %v2985_v22  ;;  %v2954_v15 = vsel %vm2953_vm5, %v3725_v32, %v2950_v40  ;;  %vm2992_vm7 = vweird.f32 %v3727_v20 }
 0x980   : > { %v2959_v55 = vsel %vm2956_vm6, %v2958_v7, %v2954_v15  ;;  %v3043_v41 = vmul.f32 %v4792_v49, %v4792_v49  ;;  %vm2993_vm9 = vmor %vm2991_vm8, %vm2992_vm7  ;;  %v3007_v59 = vmul.f32 %v3006_v42, %v4794_v53  ;;  %v3018_v6 = vmul.f32 %v3017_v4, %v4794_v53 }
 0x981   : > { %v2988_v38 = vsub.f32 1.0, %v2987_v33  ;;  %v2960_v46 = vmul.f32 %v2959_v55, %v2935_v34 }
 0x982   : > { %v4800_v8 = vmin.f32 %v3043_v41, 16.0  ;;  %v3008_v11 = vadd.f32 0.0036580483, %v3007_v59  ;;  %v3019_v31 = vadd.f32 0.014752088, %v3018_v6 }
 0x983   : > { %v2989_v23 = vmul.f32 %v3727_v20, %v2988_v38  ;;  %v3569_v54 = vclamps-f32 %v2960_v46, 1.0 }
 0x984   : > { %v3045_v25 = vmul.f32 2.1237322e-06, %v4800_v8  ;;  %v3056_v0 = vmul.f32 3.8918573e-05, %v4800_v8  ;;  %v3020_v35 = vmul.f32 %v3019_v31, %v4794_v53  ;;  %v3009_v50 = vmul.f32 %v3008_v11, %v4794_v53 }
 0x985   : > { %v2990_v48 = vadd.f32 %v3727_v20, %v2989_v23  ;;  %v3165_v9 = vadd.f32 1.0, %v3569_v54 }
 0x986   : > { %v3046_v22 = vadd.f32 0.00028619796, %v3045_v25  ;;  %v3057_v16 = vadd.f32 0.001143296, %v3056_v0  ;;  %v3010_v33 = vadd.f32 0.05243302, %v3009_v50 }
 0x987   : > { %v2994_v61 = vsel %vm2993_vm9, %v3727_v20, %v2990_v48  ;;  %v3173_v13 = vmul.f32 %v3165_v9, %v2829_v57  ;;  %v3021_v20 = vadd.f32 0.112945676, %v3020_v35 }
 0x988   : > { %v2999_v62 = vsel %vm2996_vm10, %v2998_v24, %v2994_v61  ;;  %v3047_v52 = vmul.f32 %v3046_v22, %v4800_v8  ;;  %v3058_v28 = vmul.f32 %v3057_v16, %v4800_v8  ;;  %v3011_v46 = vmul.f32 %v3010_v33, %v4794_v53 }
 0x989   : > { %v3000_v56 = vmul.f32 %v2999_v62, %v2975_v51  ;;  %v3022_v40 = vmul.f32 %v3021_v20, %v4794_v53 }
 0x98a   : > { %v3048_v1 = vadd.f32 0.0036580483, %v3047_v52  ;;  %v3059_v7 = vadd.f32 0.014752088, %v3058_v28  ;;  %v3012_v24 = vadd.f32 0.18741608, %v3011_v46 }
 0x98b   : > { %v3570_v44 = vclamps-f32 %v3000_v56, 1.0  ;;  %v3023_v34 = vadd.f32 0.4994258, %v3022_v40 }
 0x98c   : > { %v3060_v55 = vmul.f32 %v3059_v7, %v4800_v8  ;;  %v3049_v38 = vmul.f32 %v3048_v1, %v4800_v8  ;;  %v3013_v25 = vmul.f32 %v3012_v24, %v4794_v53 }
 0x98d   : > { %v3166_v45 = vadd.f32 1.0, %v3570_v44  ;;  %v3024_v63 = vmul.f32 %v3023_v34, %v4794_v53 }
 0x98e   : > { %v3061_v12 = vadd.f32 0.112945676, %v3060_v55  ;;  %v3050_v48 = vadd.f32 0.05243302, %v3049_v38  ;;  %v3014_v22 = vadd.f32 1.1283791, %v3013_v25 }
 0x98f   : > { %v3174_v3 = vmul.f32 %v3166_v45, %v2830_v43  ;;  %v3025_v47 = vadd.f32 1.0, %v3024_v63 }
 0x990   : > { %v3062_v41 = vmul.f32 %v3061_v12, %v4800_v8  ;;  %v3051_v56 = vmul.f32 %v3050_v48, %v4800_v8  ;;  %v3015_v28 = vmul.f32 %v3014_v22, %v4782_v14 }
 0x991   : > { %v3180_v32 = vpack.c.bf16 %v3174_v3, %v3173_v13  ;;  %3728 = vrcp.f32 %v3025_v47  ;;  %v3035_v11 = vand.u32 2147483647, %v3025_v47  ;;  %vm3031_vm12 = vweird.f32 %v3025_v47 }
 0x992   : > { %v3063_v19 = vadd.f32 0.4994258, %v3062_v41  ;;  %v3052_v59 = vadd.f32 0.18741608, %v3051_v56 }
 0x993   : > { %3264 = vmatmul.bf16.gmra.mxu1 %v3180_v32  ;;  %v3037_v32 = vand.u32 2147483648, %v3025_v47  ;;  %vm3036_vm14 = vcmp.eq.f32.partialorder %v3035_v11, 8.507059e+37  ;;  %v2832_v11 = vmul.f32 0.5, %v4785_v26 }
 0x994   : > { %v3064_v61 = vmul.f32 %v3063_v19, %v4800_v8  ;;  %v3053_v31 = vmul.f32 %v3052_v59, %v4800_v8 }
 0x995   : > { %v3038_v1 = vor.u32 1.1754944e-38, %v3037_v32 }
 0x996   : > { %v3065_v9 = vadd.f32 1.0, %v3064_v61  ;;  %v3054_v34 = vadd.f32 1.1283791, %v3053_v31 }
 0x997   : > { %v3729_v43 = vpop.eup %3728 }
 0x998   : > { %v3027_v27 = vmul.f32 %v3729_v43, %v3025_v47  ;;  %3730 = vrcp.f32 %v3065_v9  ;;  %vm3032_vm11 = vweird.f32 %v3729_v43  ;;  %v3077_v12 = vand.u32 2147483648, %v3065_v9 }
 0x999   : > { %vm3033_vm13 = vmor %vm3031_vm12, %vm3032_vm11  ;;  %v3075_v19 = vand.u32 2147483647, %v3065_v9  ;;  %vm3071_vm15 = vweird.f32 %v3065_v9  ;;  %v3055_v25 = vmul.f32 %v3054_v34, %v4792_v49 }
 0x99a   : > { %v3028_v3 = vsub.f32 1.0, %v3027_v27  ;;  %v3078_v56 = vor.u32 1.1754944e-38, %v3077_v12 }
 0x99b   : > { %vm3076_vm3 = vcmp.eq.f32.partialorder %v3075_v19, 8.507059e+37 }
 0x99e   : > { %v3731_v16 = vpop.eup %3730 }
 0x99f   : > { %v3067_v40 = vmul.f32 %v3731_v16, %v3065_v9  ;;  %vm3072_vm1 = vweird.f32 %v3731_v16 }
 0x9a0   : > { %vm3073_vm2 = vmor %vm3071_vm15, %vm3072_vm1 }
 0x9a1   : > { %v3068_v63 = vsub.f32 1.0, %v3067_v40 }
 0x9a3   : > { %v3069_v48 = vmul.f32 %v3731_v16, %v3068_v63 }
 0x9a5   : > { %v3070_v61 = vadd.f32 %v3731_v16, %v3069_v48 }
 0x9a7   : > { %v3074_v27 = vsel %vm3073_vm2, %v3731_v16, %v3070_v61 }
 0x9a8   : > { %v3079_v59 = vsel %vm3076_vm3, %v3078_v56, %v3074_v27 }
 0x9ae   : > { %v2822_v29 = vpop.f32.mrf.mxu2 }
 0x9af   : > { %v4809_v58 = vadd.f32 %v4693_v17, %v2822_v29  ;;  %v3029_v29 = vmul.f32 %v3729_v43, %v3028_v3 }
 0x9b1   : > { %v4816_v21 = vmul.f32 0.70710677, %v4809_v58  ;;  %v3030_v50 = vadd.f32 %v3729_v43, %v3029_v29  ;;  %v2831_v29 = vmul.f32 0.5, %v4778_v2 }
 0x9b3   : > { %v3083_v15 = vmul.f32 %v4816_v21, %v4816_v21  ;;  %v3034_v33 = vsel %vm3033_vm13, %v3729_v43, %v3030_v50 }
 0x9b4   : > { %v3039_v38 = vsel %vm3036_vm14, %v3038_v1, %v3034_v33 }
 0x9b5   : > { %v4826_v23 = vmin.f32 %v3083_v15, 16.0  ;;  %v3040_v14 = vmul.f32 %v3039_v38, %v3015_v28 }
 0x9b6   : > { %v2824_v51 = vpop.f32.mrf.mxu2 }
 0x9b7   : > { %v3096_v54 = vmul.f32 3.8918573e-05, %v4826_v23  ;;  %v4832_v62 = vadd.f32 %v4693_v17, %v2824_v51  ;;  %v3085_v42 = vmul.f32 2.1237322e-06, %v4826_v23 }
 0x9b9   : > { %v3097_v44 = vadd.f32 0.001143296, %v3096_v54  ;;  %v4837_v57 = vmul.f32 0.70710677, %v4832_v62  ;;  %v3086_v13 = vadd.f32 0.00028619796, %v3085_v42 }
 0x9bb   : > { %v3098_v45 = vmul.f32 %v3097_v44, %v4826_v23  ;;  %v3123_v17 = vmul.f32 %v4837_v57, %v4837_v57  ;;  %v3087_v0 = vmul.f32 %v3086_v13, %v4826_v23 }
 0x9bd   : > { %v3099_v4 = vadd.f32 0.014752088, %v3098_v45  ;;  %v4843_v6 = vmin.f32 %v3123_v17, 16.0  ;;  %v3088_v55 = vadd.f32 0.0036580483, %v3087_v0  ;;  %v3571_v45 = vclamps-f32 %v3040_v14, 1.0 }
 0x9be   : > { %v3080_v17 = vmul.f32 %v3079_v59, %v3055_v25  ;;  %v2833_v59 = vmul.f32 0.5, %v4809_v58 }
 0x9bf   : > { %v3100_v53 = vmul.f32 %v3099_v4, %v4826_v23  ;;  %v3125_v52 = vmul.f32 2.1237322e-06, %v4843_v6  ;;  %v3136_v35 = vmul.f32 3.8918573e-05, %v4843_v6  ;;  %v3089_v54 = vmul.f32 %v3088_v55, %v4826_v23 }
 0x9c0   : > { %v3572_v22 = vclamps-f32 %v3080_v17, 1.0  ;;  %v3167_v9 = vadd.f32 1.0, %v3571_v45 }
 0x9c1   : > { %v3101_v20 = vadd.f32 0.112945676, %v3100_v53  ;;  %v3126_v7 = vadd.f32 0.00028619796, %v3125_v52  ;;  %v3137_v15 = vadd.f32 0.001143296, %v3136_v35 }
 0x9c2   : > { %v3090_v13 = vadd.f32 0.05243302, %v3089_v54  ;;  %v3168_v53 = vadd.f32 1.0, %v3572_v22  ;;  %v3175_v35 = vmul.f32 %v3167_v9, %v2831_v29 }
 0x9c3   : > { %v3102_v8 = vmul.f32 %v3101_v20, %v4826_v23  ;;  %v3127_v46 = vmul.f32 %v3126_v7, %v4843_v6  ;;  %v3138_v41 = vmul.f32 %v3137_v15, %v4843_v6 }
 0x9c4   : > { %v3091_v49 = vmul.f32 %v3090_v13, %v4826_v23  ;;  %v3176_v16 = vmul.f32 %v3168_v53, %v2832_v11  ;;  %v2834_v13 = vmul.f32 0.5, %v4832_v62 }
 0x9c5   : > { %v3103_v47 = vadd.f32 0.4994258, %v3102_v8  ;;  %v3139_v51 = vadd.f32 0.014752088, %v3138_v41  ;;  %v3128_v42 = vadd.f32 0.0036580483, %v3127_v46 }
 0x9c6   : > { %v3092_v28 = vadd.f32 0.18741608, %v3091_v49  ;;  %v3181_v1 = vpack.c.bf16 %v3176_v16, %v3175_v35 }
 0x9c7   : > { %v3104_v24 = vmul.f32 %v3103_v47, %v4826_v23  ;;  %v3140_v43 = vmul.f32 %v3139_v51, %v4843_v6  ;;  %v3129_v3 = vmul.f32 %v3128_v42, %v4843_v6 }
 0x9c8   : > { %3269 = vmatmul.bf16.gmra.mxu1 %v3181_v1  ;;  %v3093_v26 = vmul.f32 %v3092_v28, %v4826_v23 }
 0x9c9   : > { %v3105_v44 = vadd.f32 1.0, %v3104_v24  ;;  %v3141_v4 = vadd.f32 0.112945676, %v3140_v43  ;;  %v3130_v0 = vadd.f32 0.05243302, %v3129_v3 }
 0x9ca   : > { %v3094_v38 = vadd.f32 1.1283791, %v3093_v26 }
 0x9cb   : > { %3732 = vrcp.f32 %v3105_v44  ;;  %v3142_v32 = vmul.f32 %v3141_v4, %v4843_v6  ;;  %v3131_v7 = vmul.f32 %v3130_v0, %v4843_v6  ;;  %v3117_v34 = vand.u32 2147483648, %v3105_v44 }
 0x9cc   : > { %vm3111_vm5 = vweird.f32 %v3105_v44  ;;  %v3115_v55 = vand.u32 2147483647, %v3105_v44  ;;  %v3095_v48 = vmul.f32 %v3094_v38, %v4816_v21 }
 0x9cd   : > { %v3143_v52 = vadd.f32 0.4994258, %v3142_v32  ;;  %v3132_v15 = vadd.f32 0.18741608, %v3131_v7  ;;  %v3118_v47 = vor.u32 1.1754944e-38, %v3117_v34 }
 0x9ce   : > { %vm3116_vm7 = vcmp.eq.f32.partialorder %v3115_v55, 8.507059e+37 }
 0x9cf   : > { %v3144_v20 = vmul.f32 %v3143_v52, %v4843_v6  ;;  %v3133_v46 = vmul.f32 %v3132_v15, %v4843_v6 }
 0x9d1   : > { %v3733_v31 = vpop.eup %3732  ;;  %v3145_v33 = vadd.f32 1.0, %v3144_v20  ;;  %v3134_v23 = vadd.f32 1.1283791, %v3133_v46 }
 0x9d2   : > { %v3107_v50 = vmul.f32 %v3733_v31, %v3105_v44  ;;  %vm3112_vm4 = vweird.f32 %v3733_v31 }
 0x9d3   : > { %3734 = vrcp.f32 %v3145_v33  ;;  %vm3113_vm6 = vmor %vm3111_vm5, %vm3112_vm4  ;;  %v3157_v24 = vand.u32 2147483648, %v3145_v33  ;;  %v3155_v61 = vand.u32 2147483647, %v3145_v33  ;;  %vm3151_vm9 = vweird.f32 %v3145_v33 }
 0x9d4   : > { %v3108_v40 = vsub.f32 1.0, %v3107_v50  ;;  %v3135_v44 = vmul.f32 %v3134_v23, %v4837_v57  ;;  %v3681_v57 = vld [vmem:[%s4917_s19] ss:$0 sm:$0xff] }
 0x9d5   : > { %v3158_v42 = vor.u32 1.1754944e-38, %v3157_v24  ;;  %vm3156_vm11 = vcmp.eq.f32.partialorder %v3155_v61, 8.507059e+37 }
 0x9d6   : > { %v3109_v2 = vmul.f32 %v3733_v31, %v3108_v40 }
 0x9d8   : > { %v3110_v8 = vadd.f32 %v3733_v31, %v3109_v2 }
 0x9d9   : > { %v3735_v12 = vpop.eup %3734 }
 0x9da   : > { %v3114_v63 = vsel %vm3113_vm6, %v3733_v31, %v3110_v8  ;;  %v3147_v41 = vmul.f32 %v3735_v12, %v3145_v33  ;;  %vm3152_vm8 = vweird.f32 %v3735_v12 }
 0x9db   : > { %v3119_v14 = vsel %vm3116_vm7, %v3118_v47, %v3114_v63  ;;  %vm3153_vm10 = vmor %vm3151_vm9, %vm3152_vm8 }
 0x9dc   : > { %v3148_v19 = vsub.f32 1.0, %v3147_v41  ;;  %v3120_v51 = vmul.f32 %v3119_v14, %v3095_v48 }
 0x9de   : > { %v3149_v54 = vmul.f32 %v3735_v12, %v3148_v19  ;;  %v3573_v6 = vclamps-f32 %v3120_v51, 1.0 }
 0x9e0   : > { %v3150_v56 = vadd.f32 %v3735_v12, %v3149_v54  ;;  %v3169_v27 = vadd.f32 1.0, %v3573_v6 }
 0x9e2   : > { %v3154_v43 = vsel %vm3153_vm10, %v3735_v12, %v3150_v56  ;;  %v3177_v3 = vmul.f32 %v3169_v27, %v2833_v59 }
 0x9e3   : > { %v3159_v25 = vsel %vm3156_vm11, %v3158_v42, %v3154_v43 }
 0x9e4   : > { %v3160_v45 = vmul.f32 %v3159_v25, %v3135_v44 }
 0x9e6   : > { %v3574_v21 = vclamps-f32 %v3160_v45, 1.0 }
 0x9e8   : > { %v3170_v17 = vadd.f32 1.0, %v3574_v21 }
 0x9ea   : > { %v3178_v4 = vmul.f32 %v3170_v17, %v2834_v13 }
 0x9ec   : > { %v3182_v22 = vpack.c.bf16 %v3178_v4, %v3177_v3 }
 0x9ee   : > { %3274 = vmatmul.bf16.gmra.mxu1 %v3182_v22 }
 0x9f0   : > { %v3260_v9 = vpop.f32.mrf.mxu1 }
 0x9f1   : > { %v3261_v32 = vadd.f32 %v3681_v57, %v3260_v9 }
 0x9f3   : > { %v3280_v58 = vadd.f32 %v3261_v32, %v4543_v60 }
 0x9f5   : > { %3288 = vst.msk [vmem:[%s629_s30] sm:$0xff] %vm639_vm0, %v3280_v58 }
 0x9f8   : > { %v3262_v62 = vpop.f32.mrf.mxu1 }
 0x9f9   : > { %v3263_v29 = vadd.f32 %v3681_v57, %v3262_v62 }
 0x9fb   : > { %v3281_v11 = vadd.f32 %v3263_v29, %v4548_v5 }
 0x9fd   : > { %3289 = vst.msk [vmem:[%s629_s30 + $0x8] sm:$0xff] %vm639_vm0, %v3281_v11 }
 0xa10   : > { %v3265_v49 = vpop.f32.mrf.mxu1 }
 0xa11   : > { %v3266_v53 = vadd.f32 %v3681_v57, %v3265_v49 }
 0xa13   : > { %v3282_v31 = vadd.f32 %v3266_v53, %v4553_v10 }
 0xa15   : > { %3290 = vst.msk [vmem:[%s629_s30 + $0x10] sm:$0xff] %vm639_vm0, %v3282_v31 }
 0xa18   : > { %v3267_v0 = vpop.f32.mrf.mxu1 }
 0xa19   : > { %v3268_v52 = vadd.f32 %v3681_v57, %v3267_v0 }
 0xa1b   : > { %v3283_v35 = vadd.f32 %v3268_v52, %v4558_v37 }
 0xa1d   : > { %3291 = vst.msk [vmem:[%s629_s30 + $0x18] sm:$0xff] %vm639_vm0, %v3283_v35 }
 0xa45   : > { %v3270_v60 = vpop.f32.mrf.mxu1 }
 0xa46   : > { %v3271_v16 = vadd.f32 %v3681_v57, %v3270_v60 }
 0xa48   : > { %v3284_v50 = vadd.f32 %v3271_v16, %v4563_v18 }
 0xa4a   : > { %3292 = vst.msk [vmem:[%s629_s30 + $0x20] sm:$0xff] %vm639_vm0, %v3284_v50 }
 0xa4d   : > { %v3272_v5 = vpop.f32.mrf.mxu1 }
 0xa4e   : > { %v3273_v20 = vadd.f32 %v3681_v57, %v3272_v5 }
 0xa50   : > { %v3285_v28 = vadd.f32 %v3273_v20, %v4568_v30 }
 0xa52   : > { %3293 = vst.msk [vmem:[%s629_s30 + $0x28] sm:$0xff] %vm639_vm0, %v3285_v28 }
 0xa6b   : > { %v3275_v10 = vpop.f32.mrf.mxu1 }
 0xa6c   : > { %v3276_v1 = vadd.f32 %v3681_v57, %v3275_v10 }
 0xa6e   : > { %v3286_v40 = vadd.f32 %v3276_v1, %v4573_v39 }
 0xa70   : > { %3294 = vst.msk [vmem:[%s629_s30 + $0x30] sm:$0xff] %vm639_vm0, %v3286_v40 }
 0xa73   : > { %v3277_v37 = vpop.f32.mrf.mxu1 }
 0xa74   : > { %v3278_v7 = vadd.f32 %v3681_v57, %v3277_v37 }
 0xa76   : > { %v3287_v33 = vadd.f32 %v3278_v7, %v4586_v36 }
 0xa78   : > { %3295 = vst.msk [vmem:[%s629_s30 + $0x38] sm:$0xff] %vm639_vm0, %v3287_v33 }
 0xa79 PF: > { %s30_s1 = sadd.s32 1, %s3750_s1  }
 0xa7a   : > { %p27_p4 = scmp.ge.s32.totalorder %s30_s1, 4  }
 0xa7c   :  { %29 = sbr.rel (!%p27_p4) target bundleno = 6 (0x6), region = 133 }

</bundles_post_ra>
